<compile_context>
chip_gen: v7x
topology: tpu7x:2x2x1
jax: 0.10.0
libtpu: 0.0.40
codegen_flags: <defaults>
</compile_context>

<pallas_src>
import functools

import jax
import jax.numpy as jnp
from jax import lax
from jax.experimental import pallas as pl
from jax.experimental.pallas import tpu as pltpu


def _round_up(x, m):
    return (x + m - 1) // m * m


def _tracking_cost_kernel(actions_ref, init_ref, w1_ref, w2_ref, b2_ref, tgt_ref,
                          out_ref, *, mpc_T, gamma):
    # actions_ref : (mpc_T, M_TILE, nu)   time-major tile of flattened rows
    # init_ref    : (1, nz)
    # w1_ref      : (nz + nu + 1, H_pad)  [Wz; Wu; b1] fused, lane-padded
    # w2_ref      : (H_pad, nz)           zero rows beyond the true hidden dim
    # b2_ref      : (1, nz)
    # tgt_ref     : (1, nz)
    # out_ref     : (1, M_TILE)           lane-dense cost slab
    m_tile = actions_ref.shape[1]
    nz = init_ref.shape[1]

    w1 = w1_ref[...]
    w2 = w2_ref[...]
    b2 = b2_ref[...]
    target = tgt_ref[...]

    # Loop-invariant values hoisted out of the unrolled rollout.
    z = jnp.broadcast_to(init_ref[...], (m_tile, nz))        # lat_state_init.repeat(...)
    ones_col = jnp.ones((m_tile, 1), dtype=jnp.float32)      # folds b1 into W1
    ones_row = jnp.ones((1, nz), dtype=jnp.float32)          # row-sum helper (MXU)
    total = jnp.zeros((1, m_tile), dtype=jnp.float32)        # lane-dense accumulator
    inv_T = 1.0 / mpc_T

    # mpc_T is small & static -> unrolled rollout (sequential state dependency).
    for i in range(mpc_T):
        disc = gamma ** (mpc_T - i - 1)
        u = actions_ref[i]                                   # (m_tile, nu), contiguous slice
        x = jnp.concatenate([z, u, ones_col], axis=-1)       # (m_tile, nz + nu + 1)
        h = jnp.tanh(jnp.dot(x, w1, preferred_element_type=jnp.float32))   # (m_tile, H_pad)
        z = jnp.dot(h, w2, preferred_element_type=jnp.float32) + b2        # (m_tile, nz)
        diff = z - target
        dsq = diff * diff
        # Row-wise sum over nz expressed as ones_row @ dsq^T so the per-row cost
        # lands lane-major (1, m_tile): the final store is a dense, unmasked slab.
        sq_row = lax.dot_general(ones_row, dsq, (((1,), (1,)), ((), ())),
                                 preferred_element_type=jnp.float32)        # (1, m_tile)
        total = total + disc * jnp.sqrt(sq_row)

    out_ref[...] = total * inv_T


def tracking_cost(actions, lat_state_init, lat_state_target,
                  wz, wu, b1, w2, b2, *, gamma=1.0, m_tile=512):
    """Pallas wrapper reproducing tracking_cost_helper_batch semantics."""
    if actions.ndim == 3:
        actions = actions[None, ...]
    actions = actions.astype(jnp.float32)
    num_samples, n_batch, mpc_T, nu = actions.shape
    nz = lat_state_init.shape[-1]
    H = wz.shape[1]

    # --- wrapper-side layout plumbing (pure relayout, no per-element math) ---
    # Fused layer-1 weights with the bias folded in as an extra row.
    w1 = jnp.concatenate(
        [wz.astype(jnp.float32), wu.astype(jnp.float32), b1.reshape(1, H).astype(jnp.float32)],
        axis=0)                                              # (nz + nu + 1, H)
    H_pad = _round_up(H, 128)
    if H_pad != H:                                           # lane-pad hidden dim (zeros)
        w1 = jnp.pad(w1, ((0, 0), (0, H_pad - H)))
        w2p = jnp.pad(w2.astype(jnp.float32), ((0, H_pad - H), (0, 0)))
    else:
        w2p = w2.astype(jnp.float32)

    # Flatten (num_samples, n_batch) into one row axis, time-major, pad to the tile.
    M = num_samples * n_batch
    m_tile = max(128, min(int(m_tile), _round_up(M, 128)))
    M_pad = _round_up(M, m_tile)
    acts = jnp.transpose(actions.reshape(M, mpc_T, nu), (1, 0, 2))   # (mpc_T, M, nu)
    if M_pad != M:
        acts = jnp.pad(acts, ((0, 0), (0, M_pad - M), (0, 0)))

    init = lat_state_init.reshape(1, nz).astype(jnp.float32)
    target = lat_state_target.reshape(1, nz).astype(jnp.float32)
    b2r = b2.reshape(1, nz).astype(jnp.float32)

    kernel = functools.partial(_tracking_cost_kernel, mpc_T=mpc_T, gamma=gamma)

    def full(shape):
        return pl.BlockSpec(shape, lambda t: tuple(0 for _ in shape))

    out = pl.pallas_call(
        kernel,
        out_shape=jax.ShapeDtypeStruct((1, M_pad), jnp.float32),
        grid=(M_pad // m_tile,),
        in_specs=[
            pl.BlockSpec((mpc_T, m_tile, nu), lambda t: (0, t, 0)),  # actions (time-major tile)
            full((1, nz)),                 # lat_state_init
            full((nz + nu + 1, H_pad)),    # fused W1 (incl. bias row)
            full((H_pad, nz)),             # W2 (zero-padded rows)
            full((1, nz)),                 # b2
            full((1, nz)),                 # lat_state_target
        ],
        out_specs=pl.BlockSpec((1, m_tile), lambda t: (0, t)),
        compiler_params=pltpu.CompilerParams(
            dimension_semantics=("parallel",)),
    )(acts, init, w1, w2p, b2r, target)

    return out[0, :M].reshape(num_samples, n_batch)


def _reference(actions, init, target, wz, wu, b1, w2, b2, gamma=1.0):
    """Pure-JAX reference mirroring the PyTorch helper."""
    if actions.ndim == 3:
        actions = actions[None, ...]
    num_samples, n_batch, mpc_T, nu = actions.shape
    nz = init.shape[-1]
    z = jnp.broadcast_to(init, (num_samples, n_batch, nz))
    total = jnp.zeros((num_samples, n_batch), jnp.float32)
    for i in range(mpc_T):
        u = actions[:, :, i, :].astype(jnp.float32)
        h = jnp.tanh(z @ wz + u @ wu + b1)
        z = h @ w2 + b2
        diff = z - target
        total = total + gamma ** (mpc_T - i - 1) * jnp.sqrt(jnp.sum(diff ** 2, axis=-1))
    return total / mpc_T


def _run_case(key, num_samples, n_batch, mpc_T, nu, nz, H):
    k_act, k_init, k_tgt, k_wz, k_wu, k_b1, k_w2, k_b2 = jax.random.split(key, 8)
    actions = jax.random.normal(k_act, (num_samples, n_batch, mpc_T, nu), jnp.float32)
    lat_state_init = jax.random.normal(k_init, (1, nz), jnp.float32)
    lat_state_target = jax.random.normal(k_tgt, (1, nz), jnp.float32)

    # Deterministic forward-model parameters (synthetic, small scale).
    wz = 0.2 * jax.random.normal(k_wz, (nz, H), jnp.float32)
    wu = 0.2 * jax.random.normal(k_wu, (nu, H), jnp.float32)
    b1 = 0.05 * jax.random.normal(k_b1, (1, H), jnp.float32)
    w2 = 0.2 * jax.random.normal(k_w2, (H, nz), jnp.float32)
    b2 = 0.05 * jax.random.normal(k_b2, (1, nz), jnp.float32)

    cost = tracking_cost(actions, lat_state_init, lat_state_target, wz, wu, b1, w2, b2)
    jax.block_until_ready(cost)
    ref = _reference(actions, lat_state_init, lat_state_target, wz, wu, b1, w2, b2)
    assert cost.shape == (num_samples, n_batch)
    assert jnp.allclose(cost, ref, atol=1e-4, rtol=1e-4), \
        f"max abs err {jnp.max(jnp.abs(cost - ref))}"


if __name__ == "__main__":
    key = jax.random.PRNGKey(0)
    k1, k2 = jax.random.split(key)

    # Small case (matches the module's typical shapes; single 128-row tile).
    _run_case(k1, num_samples=2, n_batch=4, mpc_T=8, nu=4, nz=8, H=32)
    # Larger case exercising multi-tile grid + row padding (M = 528 -> 2 tiles of 512).
    _run_case(k2, num_samples=16, n_batch=33, mpc_T=8, nu=4, nz=8, H=32)

    print("KERNEL_OK")
</pallas_src>

<mosaic_0001>
module attributes {stable_mosaic.version = 11 : i64} {
  func.func @_tracking_cost_kernel(%arg0: i32, %arg1: memref<8x128x4xf32, #tpu.memory_space<vmem>>, %arg2: memref<1x8xf32, #tpu.memory_space<vmem>>, %arg3: memref<13x128xf32, #tpu.memory_space<vmem>>, %arg4: memref<128x8xf32, #tpu.memory_space<vmem>>, %arg5: memref<1x8xf32, #tpu.memory_space<vmem>>, %arg6: memref<1x8xf32, #tpu.memory_space<vmem>>, %arg7: memref<1x128xf32, #tpu.memory_space<vmem>>) attributes {dimension_semantics = [#tpu.dimension_semantics<parallel>], iteration_bounds = array<i64: 1>, scalar_prefetch = 0 : i64, scratch_operands = 0 : i64, tpu.core_type = #tpu.core_type<tc>, window_params = [{transform_indices = @transform_0, window_bounds = array<i64: 8, 128, 4>}, {pipeline_mode = #tpu.pipeline_mode<synchronous>, transform_indices = @transform_1, window_bounds = array<i64: 1, 8>}, {pipeline_mode = #tpu.pipeline_mode<synchronous>, transform_indices = @transform_2, window_bounds = array<i64: 13, 128>}, {pipeline_mode = #tpu.pipeline_mode<synchronous>, transform_indices = @transform_3, window_bounds = array<i64: 128, 8>}, {pipeline_mode = #tpu.pipeline_mode<synchronous>, transform_indices = @transform_4, window_bounds = array<i64: 1, 8>}, {pipeline_mode = #tpu.pipeline_mode<synchronous>, transform_indices = @transform_5, window_bounds = array<i64: 1, 8>}, {transform_indices = @transform_6, window_bounds = array<i64: 1, 128>}]} {
    %c0 = arith.constant 0 : index
    %c0_0 = arith.constant 0 : index
    %0 = vector.load %arg3[%c0, %c0_0] : memref<13x128xf32, #tpu.memory_space<vmem>>, vector<13x128xf32>
    %c0_1 = arith.constant 0 : index
    %c0_2 = arith.constant 0 : index
    %1 = vector.load %arg4[%c0_1, %c0_2] : memref<128x8xf32, #tpu.memory_space<vmem>>, vector<128x8xf32>
    %c0_3 = arith.constant 0 : index
    %c0_4 = arith.constant 0 : index
    %2 = vector.load %arg5[%c0_3, %c0_4] : memref<1x8xf32, #tpu.memory_space<vmem>>, vector<1x8xf32>
    %c0_5 = arith.constant 0 : index
    %c0_6 = arith.constant 0 : index
    %3 = vector.load %arg6[%c0_5, %c0_6] : memref<1x8xf32, #tpu.memory_space<vmem>>, vector<1x8xf32>
    %c0_7 = arith.constant 0 : index
    %c0_8 = arith.constant 0 : index
    %4 = vector.load %arg2[%c0_7, %c0_8] : memref<1x8xf32, #tpu.memory_space<vmem>>, vector<1x8xf32>
    %5 = vector.shape_cast %4 : vector<1x8xf32> to vector<1x8xf32>
    %6 = vector.broadcast %5 : vector<1x8xf32> to vector<128x8xf32>
    %cst = arith.constant 1.000000e+00 : f32
    %7 = vector.broadcast %cst : f32 to vector<128x1xf32>
    %cst_9 = arith.constant 1.000000e+00 : f32
    %8 = vector.broadcast %cst_9 : f32 to vector<1x8xf32>
    %cst_10 = arith.constant 0.000000e+00 : f32
    %9 = vector.broadcast %cst_10 : f32 to vector<1x128xf32>
    %c0_11 = arith.constant 0 : index
    %c0_12 = arith.constant 0 : index
    %c0_13 = arith.constant 0 : index
    %10 = vector.load %arg1[%c0_11, %c0_12, %c0_13] : memref<8x128x4xf32, #tpu.memory_space<vmem>>, vector<1x128x4xf32>
    %11 = vector.shape_cast %10 : vector<1x128x4xf32> to vector<128x4xf32>
    %12 = tpu.concatenate %6, %11, %7 in 1 : vector<128x8xf32>, vector<128x4xf32>, vector<128x1xf32> -> vector<128x13xf32>
    %cst_14 = arith.constant dense<0.000000e+00> : vector<128x128xf32>
    %13 = tpu.matmul %12, %0, %cst_14 {dimension_numbers = #tpu.dot_dimension_numbers<[1], [0], [0], [1], [0, 0, 1, 1], [], []>} : vector<128x13xf32>, vector<13x128xf32>, vector<128x128xf32> -> vector<128x128xf32>
    %14 = math.tanh %13 : vector<128x128xf32>
    %cst_15 = arith.constant dense<0.000000e+00> : vector<128x8xf32>
    %15 = tpu.matmul %14, %1, %cst_15 {dimension_numbers = #tpu.dot_dimension_numbers<[1], [0], [0], [1], [0, 0, 1, 1], [], []>} : vector<128x128xf32>, vector<128x8xf32>, vector<128x8xf32> -> vector<128x8xf32>
    %16 = vector.broadcast %2 : vector<1x8xf32> to vector<128x8xf32>
    %17 = arith.addf %15, %16 : vector<128x8xf32>
    %18 = vector.broadcast %3 : vector<1x8xf32> to vector<128x8xf32>
    %19 = arith.subf %17, %18 : vector<128x8xf32>
    %20 = arith.mulf %19, %19 : vector<128x8xf32>
    %cst_16 = arith.constant dense<0.000000e+00> : vector<1x128xf32>
    %21 = tpu.matmul %8, %20, %cst_16 {dimension_numbers = #tpu.dot_dimension_numbers<[1], [1], [0], [0], [0, 0, 1, 0], [], []>} : vector<1x8xf32>, vector<128x8xf32>, vector<1x128xf32> -> vector<1x128xf32>
    %22 = math.sqrt %21 : vector<1x128xf32>
    %cst_17 = arith.constant 1.000000e+00 : f32
    %23 = vector.broadcast %cst_17 : f32 to vector<1x128xf32>
    %24 = arith.mulf %23, %22 : vector<1x128xf32>
    %25 = arith.addf %9, %24 : vector<1x128xf32>
    %c1 = arith.constant 1 : index
    %c0_18 = arith.constant 0 : index
    %c0_19 = arith.constant 0 : index
    %26 = vector.load %arg1[%c1, %c0_18, %c0_19] : memref<8x128x4xf32, #tpu.memory_space<vmem>>, vector<1x128x4xf32>
    %27 = vector.shape_cast %26 : vector<1x128x4xf32> to vector<128x4xf32>
    %28 = tpu.concatenate %17, %27, %7 in 1 : vector<128x8xf32>, vector<128x4xf32>, vector<128x1xf32> -> vector<128x13xf32>
    %cst_20 = arith.constant dense<0.000000e+00> : vector<128x128xf32>
    %29 = tpu.matmul %28, %0, %cst_20 {dimension_numbers = #tpu.dot_dimension_numbers<[1], [0], [0], [1], [0, 0, 1, 1], [], []>} : vector<128x13xf32>, vector<13x128xf32>, vector<128x128xf32> -> vector<128x128xf32>
    %30 = math.tanh %29 : vector<128x128xf32>
    %cst_21 = arith.constant dense<0.000000e+00> : vector<128x8xf32>
    %31 = tpu.matmul %30, %1, %cst_21 {dimension_numbers = #tpu.dot_dimension_numbers<[1], [0], [0], [1], [0, 0, 1, 1], [], []>} : vector<128x128xf32>, vector<128x8xf32>, vector<128x8xf32> -> vector<128x8xf32>
    %32 = vector.broadcast %2 : vector<1x8xf32> to vector<128x8xf32>
    %33 = arith.addf %31, %32 : vector<128x8xf32>
    %34 = vector.broadcast %3 : vector<1x8xf32> to vector<128x8xf32>
    %35 = arith.subf %33, %34 : vector<128x8xf32>
    %36 = arith.mulf %35, %35 : vector<128x8xf32>
    %cst_22 = arith.constant dense<0.000000e+00> : vector<1x128xf32>
    %37 = tpu.matmul %8, %36, %cst_22 {dimension_numbers = #tpu.dot_dimension_numbers<[1], [1], [0], [0], [0, 0, 1, 0], [], []>} : vector<1x8xf32>, vector<128x8xf32>, vector<1x128xf32> -> vector<1x128xf32>
    %38 = math.sqrt %37 : vector<1x128xf32>
    %cst_23 = arith.constant 1.000000e+00 : f32
    %39 = vector.broadcast %cst_23 : f32 to vector<1x128xf32>
    %40 = arith.mulf %39, %38 : vector<1x128xf32>
    %41 = arith.addf %25, %40 : vector<1x128xf32>
    %c2 = arith.constant 2 : index
    %c0_24 = arith.constant 0 : index
    %c0_25 = arith.constant 0 : index
    %42 = vector.load %arg1[%c2, %c0_24, %c0_25] : memref<8x128x4xf32, #tpu.memory_space<vmem>>, vector<1x128x4xf32>
    %43 = vector.shape_cast %42 : vector<1x128x4xf32> to vector<128x4xf32>
    %44 = tpu.concatenate %33, %43, %7 in 1 : vector<128x8xf32>, vector<128x4xf32>, vector<128x1xf32> -> vector<128x13xf32>
    %cst_26 = arith.constant dense<0.000000e+00> : vector<128x128xf32>
    %45 = tpu.matmul %44, %0, %cst_26 {dimension_numbers = #tpu.dot_dimension_numbers<[1], [0], [0], [1], [0, 0, 1, 1], [], []>} : vector<128x13xf32>, vector<13x128xf32>, vector<128x128xf32> -> vector<128x128xf32>
    %46 = math.tanh %45 : vector<128x128xf32>
    %cst_27 = arith.constant dense<0.000000e+00> : vector<128x8xf32>
    %47 = tpu.matmul %46, %1, %cst_27 {dimension_numbers = #tpu.dot_dimension_numbers<[1], [0], [0], [1], [0, 0, 1, 1], [], []>} : vector<128x128xf32>, vector<128x8xf32>, vector<128x8xf32> -> vector<128x8xf32>
    %48 = vector.broadcast %2 : vector<1x8xf32> to vector<128x8xf32>
    %49 = arith.addf %47, %48 : vector<128x8xf32>
    %50 = vector.broadcast %3 : vector<1x8xf32> to vector<128x8xf32>
    %51 = arith.subf %49, %50 : vector<128x8xf32>
    %52 = arith.mulf %51, %51 : vector<128x8xf32>
    %cst_28 = arith.constant dense<0.000000e+00> : vector<1x128xf32>
    %53 = tpu.matmul %8, %52, %cst_28 {dimension_numbers = #tpu.dot_dimension_numbers<[1], [1], [0], [0], [0, 0, 1, 0], [], []>} : vector<1x8xf32>, vector<128x8xf32>, vector<1x128xf32> -> vector<1x128xf32>
    %54 = math.sqrt %53 : vector<1x128xf32>
    %cst_29 = arith.constant 1.000000e+00 : f32
    %55 = vector.broadcast %cst_29 : f32 to vector<1x128xf32>
    %56 = arith.mulf %55, %54 : vector<1x128xf32>
    %57 = arith.addf %41, %56 : vector<1x128xf32>
    %c3 = arith.constant 3 : index
    %c0_30 = arith.constant 0 : index
    %c0_31 = arith.constant 0 : index
    %58 = vector.load %arg1[%c3, %c0_30, %c0_31] : memref<8x128x4xf32, #tpu.memory_space<vmem>>, vector<1x128x4xf32>
    %59 = vector.shape_cast %58 : vector<1x128x4xf32> to vector<128x4xf32>
    %60 = tpu.concatenate %49, %59, %7 in 1 : vector<128x8xf32>, vector<128x4xf32>, vector<128x1xf32> -> vector<128x13xf32>
    %cst_32 = arith.constant dense<0.000000e+00> : vector<128x128xf32>
    %61 = tpu.matmul %60, %0, %cst_32 {dimension_numbers = #tpu.dot_dimension_numbers<[1], [0], [0], [1], [0, 0, 1, 1], [], []>} : vector<128x13xf32>, vector<13x128xf32>, vector<128x128xf32> -> vector<128x128xf32>
    %62 = math.tanh %61 : vector<128x128xf32>
    %cst_33 = arith.constant dense<0.000000e+00> : vector<128x8xf32>
    %63 = tpu.matmul %62, %1, %cst_33 {dimension_numbers = #tpu.dot_dimension_numbers<[1], [0], [0], [1], [0, 0, 1, 1], [], []>} : vector<128x128xf32>, vector<128x8xf32>, vector<128x8xf32> -> vector<128x8xf32>
    %64 = vector.broadcast %2 : vector<1x8xf32> to vector<128x8xf32>
    %65 = arith.addf %63, %64 : vector<128x8xf32>
    %66 = vector.broadcast %3 : vector<1x8xf32> to vector<128x8xf32>
    %67 = arith.subf %65, %66 : vector<128x8xf32>
    %68 = arith.mulf %67, %67 : vector<128x8xf32>
    %cst_34 = arith.constant dense<0.000000e+00> : vector<1x128xf32>
    %69 = tpu.matmul %8, %68, %cst_34 {dimension_numbers = #tpu.dot_dimension_numbers<[1], [1], [0], [0], [0, 0, 1, 0], [], []>} : vector<1x8xf32>, vector<128x8xf32>, vector<1x128xf32> -> vector<1x128xf32>
    %70 = math.sqrt %69 : vector<1x128xf32>
    %cst_35 = arith.constant 1.000000e+00 : f32
    %71 = vector.broadcast %cst_35 : f32 to vector<1x128xf32>
    %72 = arith.mulf %71, %70 : vector<1x128xf32>
    %73 = arith.addf %57, %72 : vector<1x128xf32>
    %c4 = arith.constant 4 : index
    %c0_36 = arith.constant 0 : index
    %c0_37 = arith.constant 0 : index
    %74 = vector.load %arg1[%c4, %c0_36, %c0_37] : memref<8x128x4xf32, #tpu.memory_space<vmem>>, vector<1x128x4xf32>
    %75 = vector.shape_cast %74 : vector<1x128x4xf32> to vector<128x4xf32>
    %76 = tpu.concatenate %65, %75, %7 in 1 : vector<128x8xf32>, vector<128x4xf32>, vector<128x1xf32> -> vector<128x13xf32>
    %cst_38 = arith.constant dense<0.000000e+00> : vector<128x128xf32>
    %77 = tpu.matmul %76, %0, %cst_38 {dimension_numbers = #tpu.dot_dimension_numbers<[1], [0], [0], [1], [0, 0, 1, 1], [], []>} : vector<128x13xf32>, vector<13x128xf32>, vector<128x128xf32> -> vector<128x128xf32>
    %78 = math.tanh %77 : vector<128x128xf32>
    %cst_39 = arith.constant dense<0.000000e+00> : vector<128x8xf32>
    %79 = tpu.matmul %78, %1, %cst_39 {dimension_numbers = #tpu.dot_dimension_numbers<[1], [0], [0], [1], [0, 0, 1, 1], [], []>} : vector<128x128xf32>, vector<128x8xf32>, vector<128x8xf32> -> vector<128x8xf32>
    %80 = vector.broadcast %2 : vector<1x8xf32> to vector<128x8xf32>
    %81 = arith.addf %79, %80 : vector<128x8xf32>
    %82 = vector.broadcast %3 : vector<1x8xf32> to vector<128x8xf32>
    %83 = arith.subf %81, %82 : vector<128x8xf32>
    %84 = arith.mulf %83, %83 : vector<128x8xf32>
    %cst_40 = arith.constant dense<0.000000e+00> : vector<1x128xf32>
    %85 = tpu.matmul %8, %84, %cst_40 {dimension_numbers = #tpu.dot_dimension_numbers<[1], [1], [0], [0], [0, 0, 1, 0], [], []>} : vector<1x8xf32>, vector<128x8xf32>, vector<1x128xf32> -> vector<1x128xf32>
    %86 = math.sqrt %85 : vector<1x128xf32>
    %cst_41 = arith.constant 1.000000e+00 : f32
    %87 = vector.broadcast %cst_41 : f32 to vector<1x128xf32>
    %88 = arith.mulf %87, %86 : vector<1x128xf32>
    %89 = arith.addf %73, %88 : vector<1x128xf32>
    %c5 = arith.constant 5 : index
    %c0_42 = arith.constant 0 : index
    %c0_43 = arith.constant 0 : index
    %90 = vector.load %arg1[%c5, %c0_42, %c0_43] : memref<8x128x4xf32, #tpu.memory_space<vmem>>, vector<1x128x4xf32>
    %91 = vector.shape_cast %90 : vector<1x128x4xf32> to vector<128x4xf32>
    %92 = tpu.concatenate %81, %91, %7 in 1 : vector<128x8xf32>, vector<128x4xf32>, vector<128x1xf32> -> vector<128x13xf32>
    %cst_44 = arith.constant dense<0.000000e+00> : vector<128x128xf32>
    %93 = tpu.matmul %92, %0, %cst_44 {dimension_numbers = #tpu.dot_dimension_numbers<[1], [0], [0], [1], [0, 0, 1, 1], [], []>} : vector<128x13xf32>, vector<13x128xf32>, vector<128x128xf32> -> vector<128x128xf32>
    %94 = math.tanh %93 : vector<128x128xf32>
    %cst_45 = arith.constant dense<0.000000e+00> : vector<128x8xf32>
    %95 = tpu.matmul %94, %1, %cst_45 {dimension_numbers = #tpu.dot_dimension_numbers<[1], [0], [0], [1], [0, 0, 1, 1], [], []>} : vector<128x128xf32>, vector<128x8xf32>, vector<128x8xf32> -> vector<128x8xf32>
    %96 = vector.broadcast %2 : vector<1x8xf32> to vector<128x8xf32>
    %97 = arith.addf %95, %96 : vector<128x8xf32>
    %98 = vector.broadcast %3 : vector<1x8xf32> to vector<128x8xf32>
    %99 = arith.subf %97, %98 : vector<128x8xf32>
    %100 = arith.mulf %99, %99 : vector<128x8xf32>
    %cst_46 = arith.constant dense<0.000000e+00> : vector<1x128xf32>
    %101 = tpu.matmul %8, %100, %cst_46 {dimension_numbers = #tpu.dot_dimension_numbers<[1], [1], [0], [0], [0, 0, 1, 0], [], []>} : vector<1x8xf32>, vector<128x8xf32>, vector<1x128xf32> -> vector<1x128xf32>
    %102 = math.sqrt %101 : vector<1x128xf32>
    %cst_47 = arith.constant 1.000000e+00 : f32
    %103 = vector.broadcast %cst_47 : f32 to vector<1x128xf32>
    %104 = arith.mulf %103, %102 : vector<1x128xf32>
    %105 = arith.addf %89, %104 : vector<1x128xf32>
    %c6 = arith.constant 6 : index
    %c0_48 = arith.constant 0 : index
    %c0_49 = arith.constant 0 : index
    %106 = vector.load %arg1[%c6, %c0_48, %c0_49] : memref<8x128x4xf32, #tpu.memory_space<vmem>>, vector<1x128x4xf32>
    %107 = vector.shape_cast %106 : vector<1x128x4xf32> to vector<128x4xf32>
    %108 = tpu.concatenate %97, %107, %7 in 1 : vector<128x8xf32>, vector<128x4xf32>, vector<128x1xf32> -> vector<128x13xf32>
    %cst_50 = arith.constant dense<0.000000e+00> : vector<128x128xf32>
    %109 = tpu.matmul %108, %0, %cst_50 {dimension_numbers = #tpu.dot_dimension_numbers<[1], [0], [0], [1], [0, 0, 1, 1], [], []>} : vector<128x13xf32>, vector<13x128xf32>, vector<128x128xf32> -> vector<128x128xf32>
    %110 = math.tanh %109 : vector<128x128xf32>
    %cst_51 = arith.constant dense<0.000000e+00> : vector<128x8xf32>
    %111 = tpu.matmul %110, %1, %cst_51 {dimension_numbers = #tpu.dot_dimension_numbers<[1], [0], [0], [1], [0, 0, 1, 1], [], []>} : vector<128x128xf32>, vector<128x8xf32>, vector<128x8xf32> -> vector<128x8xf32>
    %112 = vector.broadcast %2 : vector<1x8xf32> to vector<128x8xf32>
    %113 = arith.addf %111, %112 : vector<128x8xf32>
    %114 = vector.broadcast %3 : vector<1x8xf32> to vector<128x8xf32>
    %115 = arith.subf %113, %114 : vector<128x8xf32>
    %116 = arith.mulf %115, %115 : vector<128x8xf32>
    %cst_52 = arith.constant dense<0.000000e+00> : vector<1x128xf32>
    %117 = tpu.matmul %8, %116, %cst_52 {dimension_numbers = #tpu.dot_dimension_numbers<[1], [1], [0], [0], [0, 0, 1, 0], [], []>} : vector<1x8xf32>, vector<128x8xf32>, vector<1x128xf32> -> vector<1x128xf32>
    %118 = math.sqrt %117 : vector<1x128xf32>
    %cst_53 = arith.constant 1.000000e+00 : f32
    %119 = vector.broadcast %cst_53 : f32 to vector<1x128xf32>
    %120 = arith.mulf %119, %118 : vector<1x128xf32>
    %121 = arith.addf %105, %120 : vector<1x128xf32>
    %c7 = arith.constant 7 : index
    %c0_54 = arith.constant 0 : index
    %c0_55 = arith.constant 0 : index
    %122 = vector.load %arg1[%c7, %c0_54, %c0_55] : memref<8x128x4xf32, #tpu.memory_space<vmem>>, vector<1x128x4xf32>
    %123 = vector.shape_cast %122 : vector<1x128x4xf32> to vector<128x4xf32>
    %124 = tpu.concatenate %113, %123, %7 in 1 : vector<128x8xf32>, vector<128x4xf32>, vector<128x1xf32> -> vector<128x13xf32>
    %cst_56 = arith.constant dense<0.000000e+00> : vector<128x128xf32>
    %125 = tpu.matmul %124, %0, %cst_56 {dimension_numbers = #tpu.dot_dimension_numbers<[1], [0], [0], [1], [0, 0, 1, 1], [], []>} : vector<128x13xf32>, vector<13x128xf32>, vector<128x128xf32> -> vector<128x128xf32>
    %126 = math.tanh %125 : vector<128x128xf32>
    %cst_57 = arith.constant dense<0.000000e+00> : vector<128x8xf32>
    %127 = tpu.matmul %126, %1, %cst_57 {dimension_numbers = #tpu.dot_dimension_numbers<[1], [0], [0], [1], [0, 0, 1, 1], [], []>} : vector<128x128xf32>, vector<128x8xf32>, vector<128x8xf32> -> vector<128x8xf32>
    %128 = vector.broadcast %2 : vector<1x8xf32> to vector<128x8xf32>
    %129 = arith.addf %127, %128 : vector<128x8xf32>
    %130 = vector.broadcast %3 : vector<1x8xf32> to vector<128x8xf32>
    %131 = arith.subf %129, %130 : vector<128x8xf32>
    %132 = arith.mulf %131, %131 : vector<128x8xf32>
    %cst_58 = arith.constant dense<0.000000e+00> : vector<1x128xf32>
    %133 = tpu.matmul %8, %132, %cst_58 {dimension_numbers = #tpu.dot_dimension_numbers<[1], [1], [0], [0], [0, 0, 1, 0], [], []>} : vector<1x8xf32>, vector<128x8xf32>, vector<1x128xf32> -> vector<1x128xf32>
    %134 = math.sqrt %133 : vector<1x128xf32>
    %cst_59 = arith.constant 1.000000e+00 : f32
    %135 = vector.broadcast %cst_59 : f32 to vector<1x128xf32>
    %136 = arith.mulf %135, %134 : vector<1x128xf32>
    %137 = arith.addf %121, %136 : vector<1x128xf32>
    %cst_60 = arith.constant 1.250000e-01 : f32
    %138 = vector.broadcast %cst_60 : f32 to vector<1x128xf32>
    %139 = arith.mulf %137, %138 : vector<1x128xf32>
    %c0_61 = arith.constant 0 : index
    %c0_62 = arith.constant 0 : index
    %140 = vector.load %arg7[%c0_61, %c0_62] : memref<1x128xf32, #tpu.memory_space<vmem>>, vector<1x128xf32>
    tpu.vector_store %arg7[%c0_61, %c0_62], %139 {strides = array<i32>} : memref<1x128xf32, #tpu.memory_space<vmem>>, vector<1x128xf32>,
    return
  }
  func.func @transform_0(%arg0: i32) -> (i32, i32, i32) {
    %c0_i32 = arith.constant 0 : i32
    %c0_i32_0 = arith.constant 0 : i32
    %c0_i32_1 = arith.constant 0 : i32
    return %c0_i32, %arg0, %c0_i32_0 : i32, i32, i32
  }
  func.func @transform_1(%arg0: i32) -> (i32, i32) {
    %c0_i32 = arith.constant 0 : i32
    %c0_i32_0 = arith.constant 0 : i32
    %c0_i32_1 = arith.constant 0 : i32
    return %c0_i32, %c0_i32_0 : i32, i32
  }
  func.func @transform_2(%arg0: i32) -> (i32, i32) {
    %c0_i32 = arith.constant 0 : i32
    %c0_i32_0 = arith.constant 0 : i32
    %c0_i32_1 = arith.constant 0 : i32
    return %c0_i32, %c0_i32_0 : i32, i32
  }
  func.func @transform_3(%arg0: i32) -> (i32, i32) {
    %c0_i32 = arith.constant 0 : i32
    %c0_i32_0 = arith.constant 0 : i32
    %c0_i32_1 = arith.constant 0 : i32
    return %c0_i32, %c0_i32_0 : i32, i32
  }
  func.func @transform_4(%arg0: i32) -> (i32, i32) {
    %c0_i32 = arith.constant 0 : i32
    %c0_i32_0 = arith.constant 0 : i32
    %c0_i32_1 = arith.constant 0 : i32
    return %c0_i32, %c0_i32_0 : i32, i32
  }
  func.func @transform_5(%arg0: i32) -> (i32, i32) {
    %c0_i32 = arith.constant 0 : i32
    %c0_i32_0 = arith.constant 0 : i32
    %c0_i32_1 = arith.constant 0 : i32
    return %c0_i32, %c0_i32_0 : i32, i32
  }
  func.func @transform_6(%arg0: i32) -> (i32, i32) {
    %c0_i32 = arith.constant 0 : i32
    %c0_i32_0 = arith.constant 0 : i32
    return %c0_i32, %arg0 : i32, i32
  }
}

</mosaic_0001>

<bundles_post_ra>
// kernel: tpu_custom_call.1
= control target key start
LH: loop header
LB: loop body
LE: loop exit
PB: predicated region body
PF: predicated region fallthrough
CT: control target
= control target key end

     0   :  { %s7832_s25 = smov 8   ;;  %vm214_vm0 = vcmask 1044480   ;;  %vm7833_vm1 = vmmov 1   ;;  %s9713_s0 = inlined_call_operand.vmem [shape: f32[8,128,4], index: 0, kind: input, shape index: {}]   ;;  %s9714_s1 = inlined_call_operand.vmem [shape: f32[1,8], index: 1, kind: input, shape index: {}]   ;;  %s9715_s2 = inlined_call_operand.vmem [shape: f32[13,128], index: 2, kind: input, shape index: {}]   ;;  %s9716_s3 = inlined_call_operand.vmem [shape: f32[128,8], index: 3, kind: input, shape index: {}]   ;;  %s9717_s4 = inlined_call_operand.vmem [shape: f32[1,8], index: 4, kind: input, shape index: {}]   ;;  %s9718_s5 = inlined_call_operand.vmem [shape: f32[1,8], index: 5, kind: input, shape index: {}]   ;;  %s9719_s6 = inlined_call_operand.hbm [shape: f32[1,128], index: 6, kind: output, shape index: {}]  }
   0x1   :  { %v51_v0 = vld [vmem:[%s9713_s0] sm:$0xff]  ;;  %v53_v1 = vld [vmem:[%s9713_s0 + $0x10] sm:$0xff]  ;;  %v52_v2 = vld [vmem:[%s9713_s0 + $0x8] sm:$0xff] }
   0x2   :  { %83 = vrot.lane.b32.xlu0 %v51_v0, %s7832_s25  ;;  %87 = vrot.lane.b32.xlu1 %v53_v1, %s7832_s25  ;;  %v54_v3 = vld [vmem:[%s9713_s0 + $0x18] sm:$0xff]  ;;  %v55_v4 = vld [vmem:[%s9713_s0 + $0x20] sm:$0xff]  ;;  %vm7893_vm2 = vmpackc.low %vm214_vm0, %vm7833_vm1 }
   0x3   :  { %v56_v6 = vld [vmem:[%s9713_s0 + $0x28] sm:$0xff]  ;;  %v24_v7 = vld [vmem:[%s9715_s2] sm:$0xff] }
   0x4   :  { %v25_v8 = vld [vmem:[%s9715_s2 + $0x8] sm:$0x1f] }
   0x5   :  { %v7906_v9 = vpack.c.bf16 %v25_v8, %v24_v7 }
   0x6   :  { %85 = vrot.lane.b32.xlu0 %v52_v2, %s7832_s25  ;;  %89 = vrot.lane.b32.xlu1 %v54_v3, %s7832_s25 }
   0x7   :  { %11 = vsyncpa [#allocation3], 0  ;;  %v57_v10 = vld [vmem:[%s9713_s0 + $0x30] sm:$0xff]  ;;  %v58_v11 = vld [vmem:[%s9713_s0 + $0x38] sm:$0xff]  ;;  %6965 = vmatprep.subr.msk.bf16.mxu1 %vm7893_vm2, %v7906_v9  ;;  %vm131_vm3 = vcmask 64512   ;;  %vm148_vm4 = vcmask 97280  }
   0x8   :  { %6968 = vmatpush3.bf16.msk.msra.mxu1 %vm7893_vm2, %v7906_v9  ;;  %v59_v12 = vld [vmem:[%s9713_s0 + $0x40] sm:$0xff]  ;;  %v60_v13 = vld [vmem:[%s9713_s0 + $0x48] sm:$0xff]  ;;  %v61_v14 = vld [vmem:[%s9713_s0 + $0x50] sm:$0xff]  ;;  %vm165_vm5 = vcmask 105472   ;;  %vm7835_vm7 = vmmov 0  }
   0x9   :  { %v62_v15 = vld [vmem:[%s9713_s0 + $0x58] sm:$0xff]  ;;  %v63_v16 = vld [vmem:[%s9713_s0 + $0x60] sm:$0xff]  ;;  %v64_v17 = vld [vmem:[%s9713_s0 + $0x68] sm:$0xff] }
   0xa   :  { %91 = vrot.lane.b32.xlu0 %v55_v4, %s7832_s25  ;;  %93 = vrot.lane.b32.xlu1 %v56_v6, %s7832_s25  ;;  %v26_v18 = vld [vmem:[%s9716_s3] sm:$0xff]  ;;  %v27_v19 = vld [vmem:[%s9716_s3 + $0x8] sm:$0xff]  ;;  %vm8203_vm6 = vmpackc.low %vm131_vm3, %vm131_vm3 }
   0xb   :  { %v7952_v20 = vpack.c.bf16 %v27_v19, %v26_v18  ;;  %v65_v21 = vld [vmem:[%s9713_s0 + $0x70] sm:$0xff]  ;;  %v66_v22 = vld [vmem:[%s9713_s0 + $0x78] sm:$0xff]  ;;  %v7968_v23 = vld [vmem:[%s9714_s1] ss:$0 sm:$0xff] }
   0xc   :  { %v28_v29 = vld [vmem:[%s9716_s3 + $0x10] sm:$0xff]  ;;  %v29_v30 = vld [vmem:[%s9716_s3 + $0x18] sm:$0xff]  ;;  %v30_v38 = vld [vmem:[%s9716_s3 + $0x20] sm:$0xff] }
   0xd   :  { %6970 = vmatprep.subr.bf16.mxu1 %v7952_v20  ;;  %v7987_v36 = vpack.c.bf16 %v29_v30, %v28_v29  ;;  %v31_v39 = vld [vmem:[%s9716_s3 + $0x28] sm:$0xff]  ;;  %v32_v47 = vld [vmem:[%s9716_s3 + $0x30] sm:$0xff]  ;;  %v33_v48 = vld [vmem:[%s9716_s3 + $0x38] sm:$0xff] }
   0xe   :  { %95 = vrot.lane.b32.xlu0 %v57_v10, %s7832_s25  ;;  %97 = vrot.lane.b32.xlu1 %v58_v11, %s7832_s25  ;;  %v8005_v45 = vpack.c.bf16 %v31_v39, %v30_v38  ;;  %v8023_v54 = vpack.c.bf16 %v33_v48, %v32_v47  ;;  %v34_v56 = vld [vmem:[%s9716_s3 + $0x40] sm:$0xff]  ;;  %v35_v57 = vld [vmem:[%s9716_s3 + $0x48] sm:$0xff] }
   0xf   :  { %v8041_v63 = vpack.c.bf16 %v35_v57, %v34_v56  ;;  %v40_v29 = vld [vmem:[%s9716_s3 + $0x70] sm:$0xff]  ;;  %v41_v30 = vld [vmem:[%s9716_s3 + $0x78] sm:$0xff]  ;;  %v5130_v38 = vld [vmem:[%s9713_s0 + $0xa8] sm:$0xff] }
  0x10   :  { %v5131_v39 = vld [vmem:[%s9713_s0 + $0xb0] sm:$0xff]  ;;  %v5138_v47 = vld [vmem:[%s9713_s0 + $0xe8] sm:$0xff] }
  0x11   :  { %v5139_v48 = vld [vmem:[%s9713_s0 + $0xf0] sm:$0xff] }
  0x12   :  { %99 = vrot.lane.b32.xlu0 %v59_v12, %s7832_s25  ;;  %101 = vrot.lane.b32.xlu1 %v60_v13, %s7832_s25 }
  0x16   :  { %103 = vrot.lane.b32.xlu0 %v61_v14, %s7832_s25  ;;  %105 = vrot.lane.b32.xlu1 %v62_v15, %s7832_s25 }
  0x1a   :  { %107 = vrot.lane.b32.xlu0 %v63_v16, %s7832_s25  ;;  %109 = vrot.lane.b32.xlu1 %v64_v17, %s7832_s25 }
  0x1e   :  { %111 = vrot.lane.b32.xlu0 %v65_v21, %s7832_s25  ;;  %113 = vrot.lane.b32.xlu1 %v66_v22, %s7832_s25 }
  0x74   :  { %v84_v24 = vpop.permute.xlu0 %83  ;;  %v88_v25 = vpop.permute.xlu1 %87 }
  0x75   :  { %v132_v26 = vsel %vm131_vm3, %v7968_v23, %v84_v24  ;;  %v134_v28 = vsel %vm131_vm3, %v7968_v23, %v88_v25  ;;  %v36_v24 = vld [vmem:[%s9716_s3 + $0x50] sm:$0xff]  ;;  %v37_v25 = vld [vmem:[%s9716_s3 + $0x58] sm:$0xff] }
  0x76   :  { %v149_v27 = vsel %vm148_vm4, %v132_v26, 1.0  ;;  %v151_v33 = vsel %vm148_vm4, %v134_v28, 1.0  ;;  %v8081_v26 = vpack.c.bf16 %v37_v25, %v36_v24  ;;  %v7834_v24 = vmov 0.0|0.0  }
  0x77   :  { %6015 = vmatprep.mubr.msk.f32.mxu1 %vm165_vm5, %v149_v27  ;;  %v39_v27 = vld [vmem:[%s9716_s3 + $0x68] sm:$0xff]  ;;  %7001 = vmatprep.subr.bf16.mxu0 %v7834_v24 }
  0x78   :  { %v86_v31 = vpop.permute.xlu0 %85  ;;  %v90_v32 = vpop.permute.xlu1 %89 }
  0x79   :  { %v133_v34 = vsel %vm131_vm3, %v7968_v23, %v86_v31  ;;  %v135_v35 = vsel %vm131_vm3, %v7968_v23, %v90_v32  ;;  %v8101_v31 = vpack.c.bf16 %v41_v30, %v40_v29  ;;  %v5126_v32 = vld [vmem:[%s9713_s0 + $0x88] sm:$0xff]  ;;  %v8180_v30 = vld [vmem:[%s9717_s4] ss:$0 sm:$0xff] }
  0x7a   :  { %v150_v37 = vsel %vm148_vm4, %v133_v34, 1.0  ;;  %v152_v40 = vsel %vm148_vm4, %v135_v35, 1.0  ;;  %732 = vrot.lane.b32.xlu1 %v5126_v32, %s7832_s25  ;;  %v5127_v34 = vld [vmem:[%s9713_s0 + $0x90] sm:$0xff]  ;;  %v5128_v35 = vld [vmem:[%s9713_s0 + $0x98] sm:$0xff] }
  0x7b   :  { %6016 = vmatmul.mubr.msk.f32.vlgmr.msra.gmra.mrb[0].mxu1 %vm165_vm5, %v150_v37  ;;  %v5129_v37 = vld [vmem:[%s9713_s0 + $0xa0] sm:$0xff] }
  0x7c   :  { %6018 = vmatprep.mubr.msk.f32.mxu1 %vm165_vm5, %v151_v33  ;;  %v92_v41 = vpop.permute.xlu0 %91  ;;  %v94_v42 = vpop.permute.xlu1 %93  ;;  %6972 = vmatpush3.bf16.msra.mxu1 %v7952_v20  ;;  %v5125_v33 = vld [vmem:[%s9713_s0 + $0x80] sm:$0xff] }
  0x7d   :  { %v136_v43 = vsel %vm131_vm3, %v7968_v23, %v92_v41  ;;  %v137_v44 = vsel %vm131_vm3, %v7968_v23, %v94_v42  ;;  %6974 = vmatprep.subr.bf16.mxu1 %v7987_v36  ;;  %730 = vrot.lane.b32.xlu0 %v5125_v33, %s7832_s25  ;;  %v5133_v41 = vld [vmem:[%s9713_s0 + $0xc0] sm:$0xff]  ;;  %v5134_v42 = vld [vmem:[%s9713_s0 + $0xc8] sm:$0xff] }
  0x7e   :  { %v153_v46 = vsel %vm148_vm4, %v136_v43, 1.0  ;;  %v154_v49 = vsel %vm148_vm4, %v137_v44, 1.0  ;;  %736 = vrot.lane.b32.xlu1 %v5128_v35, %s7832_s25  ;;  %v5135_v43 = vld [vmem:[%s9713_s0 + $0xd0] sm:$0xff]  ;;  %v5136_v44 = vld [vmem:[%s9713_s0 + $0xd8] sm:$0xff] }
  0x7f   :  { %6019 = vmatmul.mubr.msk.f32.gmra.mrb[2].mxu1 %vm165_vm5, %v152_v40  ;;  %v5132_v40 = vld [vmem:[%s9713_s0 + $0xb8] sm:$0xff] }
  0x80   :  { %6021 = vmatprep.mubr.msk.f32.mxu1 %vm165_vm5, %v153_v46  ;;  %v96_v50 = vpop.permute.xlu0 %95  ;;  %v98_v51 = vpop.permute.xlu1 %97  ;;  %6976 = vmatpush3.bf16.msra.mxu1 %v7987_v36  ;;  %v5137_v46 = vld [vmem:[%s9713_s0 + $0xe0] sm:$0xff] }
  0x81   :  { %v138_v52 = vsel %vm131_vm3, %v7968_v23, %v96_v50  ;;  %v139_v53 = vsel %vm131_vm3, %v7968_v23, %v98_v51  ;;  %6978 = vmatprep.subr.bf16.mxu1 %v8005_v45  ;;  %734 = vrot.lane.b32.xlu0 %v5127_v34, %s7832_s25  ;;  %v8185_v34 = vld [vmem:[%s9718_s5] ss:$0 sm:$0xff] }
  0x82   :  { %v155_v55 = vsel %vm148_vm4, %v138_v52, 1.0  ;;  %v156_v58 = vsel %vm148_vm4, %v139_v53, 1.0  ;;  %740 = vrot.lane.b32.xlu1 %v5130_v38, %s7832_s25 }
  0x83   :  { %6022 = vmatmul.mubr.msk.f32.gmra.mrb[4].mxu1 %vm165_vm5, %v154_v49  ;;  %v5140_v49 = vld [vmem:[%s9713_s0 + $0xf8] sm:$0xff] }
  0x84   :  { %6024 = vmatprep.mubr.msk.f32.mxu1 %vm165_vm5, %v155_v55  ;;  %v100_v59 = vpop.permute.xlu0 %99  ;;  %v102_v60 = vpop.permute.xlu1 %101  ;;  %6980 = vmatpush3.bf16.msra.mxu1 %v8005_v45 }
  0x85   :  { %v140_v61 = vsel %vm131_vm3, %v7968_v23, %v100_v59  ;;  %v141_v62 = vsel %vm131_vm3, %v7968_v23, %v102_v60  ;;  %6982 = vmatprep.subr.bf16.mxu1 %v8023_v54  ;;  %738 = vrot.lane.b32.xlu0 %v5129_v37, %s7832_s25 }
  0x86   :  { %v157_v0 = vsel %vm148_vm4, %v140_v61, 1.0  ;;  %v158_v1 = vsel %vm148_vm4, %v141_v62, 1.0  ;;  %744 = vrot.lane.b32.xlu1 %v5132_v40, %s7832_s25 }
  0x87   :  { %6025 = vmatmul.mubr.msk.f32.gmra.mrb[6].mxu1 %vm165_vm5, %v156_v58 }
  0x88   :  { %6027 = vmatprep.mubr.msk.f32.mxu1 %vm165_vm5, %v157_v0  ;;  %v104_v2 = vpop.permute.xlu0 %103  ;;  %v106_v3 = vpop.permute.xlu1 %105  ;;  %6984 = vmatpush3.bf16.msra.mxu1 %v8023_v54 }
  0x89   :  { %v142_v4 = vsel %vm131_vm3, %v7968_v23, %v104_v2  ;;  %v143_v6 = vsel %vm131_vm3, %v7968_v23, %v106_v3  ;;  %6986 = vmatprep.subr.bf16.mxu1 %v8041_v63  ;;  %742 = vrot.lane.b32.xlu0 %v5131_v39, %s7832_s25 }
  0x8a   :  { %v159_v7 = vsel %vm148_vm4, %v142_v4, 1.0  ;;  %v160_v8 = vsel %vm148_vm4, %v143_v6, 1.0  ;;  %748 = vrot.lane.b32.xlu1 %v5134_v42, %s7832_s25 }
  0x8b   :  { %6028 = vmatmul.mubr.msk.f32.gmra.mrb[8].mxu1 %vm165_vm5, %v158_v1 }
  0x8c   :  { %6030 = vmatprep.mubr.msk.f32.mxu1 %vm165_vm5, %v159_v7  ;;  %v108_v10 = vpop.permute.xlu0 %107  ;;  %v110_v11 = vpop.permute.xlu1 %109  ;;  %6988 = vmatpush3.bf16.msra.mxu1 %v8041_v63 }
  0x8d   :  { %v144_v12 = vsel %vm131_vm3, %v7968_v23, %v108_v10  ;;  %v145_v13 = vsel %vm131_vm3, %v7968_v23, %v110_v11  ;;  %6990 = vmatprep.subr.bf16.mxu1 %v8081_v26  ;;  %746 = vrot.lane.b32.xlu0 %v5133_v41, %s7832_s25 }
  0x8e   :  { %v161_v14 = vsel %vm148_vm4, %v144_v12, 1.0  ;;  %v162_v15 = vsel %vm148_vm4, %v145_v13, 1.0  ;;  %752 = vrot.lane.b32.xlu1 %v5136_v44, %s7832_s25 }
  0x8f   :  { %6031 = vmatmul.mubr.msk.f32.gmra.mrb[10].mxu1 %vm165_vm5, %v160_v8 }
  0x90   :  { %6033 = vmatprep.mubr.msk.f32.mxu1 %vm165_vm5, %v161_v14  ;;  %v112_v16 = vpop.permute.xlu0 %111  ;;  %v114_v17 = vpop.permute.xlu1 %113  ;;  %6992 = vmatpush3.bf16.msra.mxu1 %v8081_v26 }
  0x91   :  { %v146_v18 = vsel %vm131_vm3, %v7968_v23, %v112_v16  ;;  %v147_v19 = vsel %vm131_vm3, %v7968_v23, %v114_v17  ;;  %v38_v23 = vld [vmem:[%s9716_s3 + $0x60] sm:$0xff]  ;;  %750 = vrot.lane.b32.xlu0 %v5135_v43, %s7832_s25 }
  0x92   :  { %v163_v21 = vsel %vm148_vm4, %v146_v18, 1.0  ;;  %v164_v22 = vsel %vm148_vm4, %v147_v19, 1.0  ;;  %v8091_v28 = vpack.c.bf16 %v39_v27, %v38_v23  ;;  %756 = vrot.lane.b32.xlu1 %v5138_v47, %s7832_s25 }
  0x93   :  { %6034 = vmatmul.mubr.msk.f32.gmra.mrb[12].mxu1 %vm165_vm5, %v162_v15 }
  0x94   :  { %6036 = vmatprep.mubr.msk.f32.mxu1 %vm165_vm5, %v163_v21  ;;  %6994 = vmatprep.subr.bf16.mxu1 %v8091_v28 }
  0x95   :  { %6996 = vmatpush3.bf16.msra.mxu1 %v8091_v28  ;;  %754 = vrot.lane.b32.xlu0 %v5137_v46, %s7832_s25 }
  0x96   :  { %6998 = vmatprep.subr.bf16.mxu1 %v8101_v31  ;;  %760 = vrot.lane.b32.xlu1 %v5140_v49, %s7832_s25 }
  0x97   :  { %6037 = vmatmul.mubr.msk.f32.gmra.mrb[14].mxu1 %vm165_vm5, %v164_v22 }
  0x99   :  { %7000 = vmatpush3.bf16.msra.mxu1 %v8101_v31  ;;  %758 = vrot.lane.b32.xlu0 %v5139_v48, %s7832_s25 }
  0x9a   :  { %7035 = vmatprep.subr.msk.bf16.mxu1 %vm7893_vm2, %v7906_v9 }
  0xec   :  { %v733_v23 = vpop.permute.xlu1 %732 }
  0xef   :  { %v731_v25 = vpop.permute.xlu0 %730 }
  0xf0   :  { %v737_v27 = vpop.permute.xlu1 %736 }
  0xf3   :  { %v735_v29 = vpop.permute.xlu0 %734 }
  0xf4   :  { %v741_v32 = vpop.permute.xlu1 %740 }
  0xf7   :  { %v739_v33 = vpop.permute.xlu0 %738 }
  0xf8   :  { %v745_v46 = vpop.permute.xlu1 %744 }
 0x14e   :  { %v6017_v50 = vpop.f32.mrb[0].mxu1 }
 0x14f   :  { %v284_v51 = vpop.f32.mrb[1].mxu1 }
 0x150   :  { %7530 = vtanh.f32 %v284_v51  ;;  %v743_v51 = vpop.permute.xlu0 %742 }
 0x151   :  { %7532 = vtanh.f32 %v6017_v50 }
 0x152   :  { %v6020_v52 = vpop.f32.mrb[2].mxu1 }
 0x153   :  { %7534 = vtanh.f32 %v6020_v52  ;;  %v294_v53 = vpop.f32.mrb[3].mxu1 }
 0x154   :  { %7536 = vtanh.f32 %v294_v53 }
 0x156   :  { %v6023_v55 = vpop.f32.mrb[4].mxu1 }
 0x157   :  { %7538 = vtanh.f32 %v6023_v55  ;;  %v304_v56 = vpop.f32.mrb[5].mxu1 }
 0x158   :  { %7540 = vtanh.f32 %v304_v56 }
 0x15a   :  { %v7531_v57 = vpop.eup %7530  ;;  %v6026_v58 = vpop.f32.mrb[6].mxu1 }
 0x15b   :  { %v7533_v59 = vpop.eup %7532  ;;  %7542 = vtanh.f32 %v6026_v58  ;;  %v314_v60 = vpop.f32.mrb[7].mxu1  ;;  %6071 = vmatprep.mubr.f32.mxu1 %v7531_v57 }
 0x15c   :  { %7544 = vtanh.f32 %v314_v60  ;;  %6072 = vmatmul.mubr.f32.vlgmr.msra.gmra.mrb[16].mxu1 %v7533_v59 }
 0x15d   :  { %v7535_v61 = vpop.eup %7534  ;;  %7038 = vmatpush3.bf16.msk.msra.mxu1 %vm7893_vm2, %v7906_v9 }
 0x15e   :  { %v7537_v62 = vpop.eup %7536  ;;  %v6029_v0 = vpop.f32.mrb[8].mxu1  ;;  %7040 = vmatprep.subr.bf16.mxu1 %v7952_v20 }
 0x15f   :  { %7546 = vtanh.f32 %v6029_v0  ;;  %v324_v1 = vpop.f32.mrb[9].mxu1  ;;  %6074 = vmatprep.mubr.f32.mxu1 %v7537_v62 }
 0x160   :  { %7548 = vtanh.f32 %v324_v1  ;;  %6075 = vmatmul.mubr.f32.gmra.mrb[18].mxu1 %v7535_v61 }
 0x161   :  { %v7539_v2 = vpop.eup %7538 }
 0x162   :  { %v7541_v3 = vpop.eup %7540  ;;  %v6032_v4 = vpop.f32.mrb[10].mxu1 }
 0x163   :  { %7550 = vtanh.f32 %v6032_v4  ;;  %v334_v6 = vpop.f32.mrb[11].mxu1  ;;  %6077 = vmatprep.mubr.f32.mxu1 %v7541_v3 }
 0x164   :  { %7552 = vtanh.f32 %v334_v6  ;;  %6078 = vmatmul.mubr.f32.gmra.mrb[20].mxu1 %v7539_v2 }
 0x165   :  { %v7543_v7 = vpop.eup %7542 }
 0x166   :  { %v7545_v8 = vpop.eup %7544  ;;  %v6035_v10 = vpop.f32.mrb[12].mxu1 }
 0x167   :  { %7554 = vtanh.f32 %v6035_v10  ;;  %v344_v11 = vpop.f32.mrb[13].mxu1  ;;  %6080 = vmatprep.mubr.f32.mxu1 %v7545_v8  ;;  %v749_v8 = vpop.permute.xlu1 %748 }
 0x168   :  { %7556 = vtanh.f32 %v344_v11  ;;  %6081 = vmatmul.mubr.f32.gmra.mrb[22].mxu1 %v7543_v7 }
 0x169   :  { %v7547_v12 = vpop.eup %7546 }
 0x16a   :  { %v7549_v13 = vpop.eup %7548  ;;  %v6038_v14 = vpop.f32.mrb[14].mxu1 }
 0x16b   :  { %7558 = vtanh.f32 %v6038_v14  ;;  %v354_v15 = vpop.f32.mrb[15].mxu1  ;;  %6083 = vmatprep.mubr.f32.mxu1 %v7549_v13 }
 0x16c   :  { %7560 = vtanh.f32 %v354_v15  ;;  %6084 = vmatmul.mubr.f32.gmra.mrb[24].mxu1 %v7547_v12  ;;  %v747_v12 = vpop.permute.xlu0 %746 }
 0x16d   :  { %v7551_v16 = vpop.eup %7550 }
 0x16e   :  { %v7553_v17 = vpop.eup %7552 }
 0x16f   :  { %6086 = vmatprep.mubr.f32.mxu1 %v7553_v17 }
 0x170   :  { %6087 = vmatmul.mubr.f32.gmra.mrb[26].mxu1 %v7551_v16 }
 0x171   :  { %v7555_v18 = vpop.eup %7554 }
 0x172   :  { %v7557_v19 = vpop.eup %7556 }
 0x173   :  { %6089 = vmatprep.mubr.f32.mxu1 %v7557_v19 }
 0x174   :  { %6090 = vmatmul.mubr.f32.gmra.mrb[28].mxu1 %v7555_v18 }
 0x175   :  { %v7559_v21 = vpop.eup %7558 }
 0x176   :  { %v7561_v22 = vpop.eup %7560 }
 0x177   :  { %6092 = vmatprep.mubr.f32.mxu1 %v7561_v22 }
 0x178   :  { %6093 = vmatmul.mubr.f32.gmra.mrb[30].mxu1 %v7559_v21 }
 0x22f   :  { %v6073_v35 = vpop.f32.mrb[16].mxu1 }
 0x230   :  { %v457_v37 = vadd.f32 %v6073_v35, %v8180_v30  ;;  %v451_v38 = vpop.f32.mrb[17].mxu1 }
 0x231   :  { %v452_v39 = vadd.f32 %v8180_v30, %v451_v38 }
 0x232   :  { %v537_v40 = vsub.f32 %v457_v37, %v8185_v34  ;;  %v779_v41 = vsel %vm131_vm3, %v457_v37, %v733_v23 }
 0x233   :  { %v536_v42 = vsub.f32 %v452_v39, %v8185_v34  ;;  %v778_v43 = vsel %vm131_vm3, %v452_v39, %v731_v25  ;;  %v6076_v44 = vpop.f32.mrb[18].mxu1  ;;  %v795_v53 = vsel %vm148_vm4, %v779_v41, 1.0  ;;  %v753_v39 = vpop.permute.xlu1 %752 }
 0x234   :  { %v553_v47 = vmul.f32 %v537_v40, %v537_v40  ;;  %v794_v48 = vsel %vm148_vm4, %v778_v43, 1.0  ;;  %v467_v49 = vadd.f32 %v6076_v44, %v8180_v30  ;;  %v461_v50 = vpop.f32.mrb[19].mxu1  ;;  %v751_v44 = vpop.permute.xlu0 %750 }
 0x235   :  { %v552_v52 = vmul.f32 %v536_v42, %v536_v42  ;;  %v462_v55 = vadd.f32 %v8180_v30, %v461_v50  ;;  %6134 = vmatprep.mubr.msk.f32.mxu1 %vm165_vm5, %v794_v48 }
 0x236   :  { %v539_v56 = vsub.f32 %v467_v49, %v8185_v34  ;;  %6135 = vmatmul.mubr.msk.f32.vlgmr.msra.gmra.mrb[32].mxu1 %vm165_vm5, %v795_v53  ;;  %v781_v57 = vsel %vm131_vm3, %v467_v49, %v737_v27 }
 0x237   :  { %v538_v59 = vsub.f32 %v462_v55, %v8185_v34  ;;  %v780_v60 = vsel %vm131_vm3, %v462_v55, %v735_v29  ;;  %v797_v61 = vsel %vm148_vm4, %v781_v57, 1.0  ;;  %v6079_v62 = vpop.f32.mrb[20].mxu1  ;;  %v7002_v0 = vpack.c.bf16 %v553_v47, %v552_v52  ;;  %7042 = vmatpush3.bf16.msra.mxu1 %v7952_v20 }
 0x238   :  { %v555_v1 = vmul.f32 %v539_v56, %v539_v56  ;;  %v796_v2 = vsel %vm148_vm4, %v780_v60, 1.0  ;;  %v477_v3 = vadd.f32 %v6079_v62, %v8180_v30  ;;  %v471_v4 = vpop.f32.mrb[21].mxu1  ;;  %7044 = vmatprep.subr.bf16.mxu1 %v7987_v36 }
 0x239   :  { %v554_v6 = vmul.f32 %v538_v59, %v538_v59  ;;  %v472_v7 = vadd.f32 %v8180_v30, %v471_v4  ;;  %7004 = vmatpush3.bf16.xpose.msk.msra.mxu0 %vm8203_vm6, %v7002_v0  ;;  %6137 = vmatprep.mubr.msk.f32.mxu1 %vm165_vm5, %v796_v2  ;;  %v757_v0 = vpop.permute.xlu1 %756 }
 0x23a   :  { %v541_v10 = vsub.f32 %v477_v3, %v8185_v34  ;;  %6138 = vmatmul.mubr.msk.f32.gmra.mrb[34].mxu1 %vm165_vm5, %v797_v61  ;;  %v783_v11 = vsel %vm131_vm3, %v477_v3, %v741_v32  ;;  %7005 = vmatprep.subr.bf16.mxu0 %v7834_v24  ;;  %v755_v3 = vpop.permute.xlu0 %754 }
 0x23b   :  { %v7006_v13 = vpack.c.bf16 %v555_v1, %v554_v6  ;;  %v540_v14 = vsub.f32 %v472_v7, %v8185_v34  ;;  %v782_v15 = vsel %vm131_vm3, %v472_v7, %v739_v33  ;;  %v799_v16 = vsel %vm148_vm4, %v783_v11, 1.0  ;;  %v6082_v17 = vpop.f32.mrb[22].mxu1  ;;  %7046 = vmatpush3.bf16.msra.mxu1 %v7987_v36 }
 0x23c   :  { %v8226_v18 = vmul.f32 %v541_v10, %v541_v10  ;;  %v798_v19 = vsel %vm148_vm4, %v782_v15, 1.0  ;;  %v487_v21 = vadd.f32 %v6082_v17, %v8180_v30  ;;  %v481_v22 = vpop.f32.mrb[23].mxu1  ;;  %7048 = vmatprep.subr.bf16.mxu1 %v8005_v45 }
 0x23d   :  { %v556_v25 = vmul.f32 %v540_v14, %v540_v14  ;;  %v482_v23 = vadd.f32 %v8180_v30, %v481_v22  ;;  %6140 = vmatprep.mubr.msk.f32.mxu1 %vm165_vm5, %v798_v19 }
 0x23e   :  { %v543_v27 = vsub.f32 %v487_v21, %v8185_v34  ;;  %6141 = vmatmul.mubr.msk.f32.gmra.mrb[36].mxu1 %vm165_vm5, %v799_v16  ;;  %v785_v29 = vsel %vm131_vm3, %v487_v21, %v745_v46 }
 0x23f   :  { %v7010_v32 = vpack.c.bf16 %v8226_v18, %v556_v25  ;;  %v542_v33 = vsub.f32 %v482_v23, %v8185_v34  ;;  %v784_v35 = vsel %vm131_vm3, %v482_v23, %v743_v51  ;;  %v801_v37 = vsel %vm148_vm4, %v785_v29, 1.0  ;;  %v6085_v38 = vpop.f32.mrb[24].mxu1  ;;  %7050 = vmatpush3.bf16.msra.mxu1 %v8005_v45 }
 0x240   :  { %v8241_v40 = vmul.f32 %v543_v27, %v543_v27  ;;  %v800_v41 = vsel %vm148_vm4, %v784_v35, 1.0  ;;  %v497_v42 = vadd.f32 %v6085_v38, %v8180_v30  ;;  %v491_v43 = vpop.f32.mrb[25].mxu1  ;;  %7052 = vmatprep.subr.bf16.mxu1 %v8023_v54  ;;  %v761_v27 = vpop.permute.xlu1 %760 }
 0x241   :  { %v8246_v46 = vmul.f32 %v542_v33, %v542_v33  ;;  %v492_v47 = vadd.f32 %v8180_v30, %v491_v43  ;;  %7008 = vmatpush3.bf16.xpose.msk.msra.mxu0 %vm8203_vm6, %v7006_v13  ;;  %6143 = vmatprep.mubr.msk.f32.mxu1 %vm165_vm5, %v800_v41 }
 0x242   :  { %v545_v48 = vsub.f32 %v497_v42, %v8185_v34  ;;  %6144 = vmatmul.mubr.msk.f32.gmra.mrb[38].mxu1 %vm165_vm5, %v801_v37  ;;  %v787_v49 = vsel %vm131_vm3, %v497_v42, %v749_v8  ;;  %7009 = vmatprep.subr.bf16.mxu0 %v7834_v24  ;;  %v759_v37 = vpop.permute.xlu0 %758 }
 0x243   :  { %v7014_v50 = vpack.c.bf16 %v8241_v40, %v8246_v46  ;;  %v544_v51 = vsub.f32 %v492_v47, %v8185_v34  ;;  %v786_v52 = vsel %vm131_vm3, %v492_v47, %v747_v12  ;;  %v803_v53 = vsel %vm148_vm4, %v787_v49, 1.0  ;;  %v6088_v55 = vpop.f32.mrb[26].mxu1  ;;  %7054 = vmatpush3.bf16.msra.mxu1 %v8023_v54  ;;  %v5176_v40 = vld [vmem:[%s9713_s0 + $0x108] sm:$0xff]  ;;  %v5175_v46 = vld [vmem:[%s9713_s0 + $0x100] sm:$0xff] }
 0x244   :  { %v8262_v56 = vmul.f32 %v545_v48, %v545_v48  ;;  %v802_v57 = vsel %vm148_vm4, %v786_v52, 1.0  ;;  %v507_v59 = vadd.f32 %v6088_v55, %v8180_v30  ;;  %v501_v60 = vpop.f32.mrb[27].mxu1  ;;  %7056 = vmatprep.subr.bf16.mxu1 %v8041_v63  ;;  %1357 = vrot.lane.b32.xlu1 %v5176_v40, %s7832_s25  ;;  %v5177_v55 = vld [vmem:[%s9713_s0 + $0x110] sm:$0xff] }
 0x245   :  { %v8267_v61 = vmul.f32 %v544_v51, %v544_v51  ;;  %v502_v62 = vadd.f32 %v8180_v30, %v501_v60  ;;  %6146 = vmatprep.mubr.msk.f32.mxu1 %vm165_vm5, %v802_v57  ;;  %1355 = vrot.lane.b32.xlu0 %v5175_v46, %s7832_s25  ;;  %v5180_v57 = vld [vmem:[%s9713_s0 + $0x128] sm:$0xff]  ;;  %v5182_v60 = vld [vmem:[%s9713_s0 + $0x138] sm:$0xff] }
 0x246   :  { %v547_v1 = vsub.f32 %v507_v59, %v8185_v34  ;;  %6147 = vmatmul.mubr.msk.f32.gmra.mrb[40].mxu1 %vm165_vm5, %v803_v53  ;;  %v789_v2 = vsel %vm131_vm3, %v507_v59, %v753_v39  ;;  %v5181_v59 = vld [vmem:[%s9713_s0 + $0x130] sm:$0xff] }
 0x247   :  { %v7018_v4 = vpack.c.bf16 %v8262_v56, %v8267_v61  ;;  %v546_v6 = vsub.f32 %v502_v62, %v8185_v34  ;;  %v788_v7 = vsel %vm131_vm3, %v502_v62, %v751_v44  ;;  %v805_v8 = vsel %vm148_vm4, %v789_v2, 1.0  ;;  %v6091_v10 = vpop.f32.mrb[28].mxu1  ;;  %7058 = vmatpush3.bf16.msra.mxu1 %v8041_v63  ;;  %v5179_v56 = vld [vmem:[%s9713_s0 + $0x120] sm:$0xff]  ;;  %v5184_v62 = vld [vmem:[%s9713_s0 + $0x148] sm:$0xff] }
 0x248   :  { %v563_v11 = vmul.f32 %v547_v1, %v547_v1  ;;  %v804_v12 = vsel %vm148_vm4, %v788_v7, 1.0  ;;  %v517_v13 = vadd.f32 %v6091_v10, %v8180_v30  ;;  %v511_v14 = vpop.f32.mrb[29].mxu1  ;;  %7060 = vmatprep.subr.bf16.mxu1 %v8081_v26  ;;  %v5183_v61 = vld [vmem:[%s9713_s0 + $0x140] sm:$0xff]  ;;  %v5186_v1 = vld [vmem:[%s9713_s0 + $0x158] sm:$0xff] }
 0x249   :  { %v562_v15 = vmul.f32 %v546_v6, %v546_v6  ;;  %v512_v16 = vadd.f32 %v8180_v30, %v511_v14  ;;  %7012 = vmatpush3.bf16.xpose.msk.msra.mxu0 %vm8203_vm6, %v7010_v32  ;;  %6149 = vmatprep.mubr.msk.f32.mxu1 %vm165_vm5, %v804_v12  ;;  %v5187_v2 = vld [vmem:[%s9713_s0 + $0x160] sm:$0xff]  ;;  %v5190_v6 = vld [vmem:[%s9713_s0 + $0x178] sm:$0xff] }
 0x24a   :  { %v549_v17 = vsub.f32 %v517_v13, %v8185_v34  ;;  %6150 = vmatmul.mubr.msk.f32.gmra.mrb[42].mxu1 %vm165_vm5, %v805_v8  ;;  %v791_v18 = vsel %vm131_vm3, %v517_v13, %v757_v0  ;;  %7013 = vmatprep.subr.bf16.mxu0 %v7834_v24  ;;  %v5185_v0 = vld [vmem:[%s9713_s0 + $0x150] sm:$0xff] }
 0x24b   :  { %v7022_v19 = vpack.c.bf16 %v563_v11, %v562_v15  ;;  %v548_v21 = vsub.f32 %v512_v16, %v8185_v34  ;;  %v790_v22 = vsel %vm131_vm3, %v512_v16, %v755_v3  ;;  %v807_v25 = vsel %vm148_vm4, %v791_v18, 1.0  ;;  %v6094_v23 = vpop.f32.mrb[30].mxu1  ;;  %7062 = vmatpush3.bf16.msra.mxu1 %v8081_v26  ;;  %1359 = vrot.lane.b32.xlu0 %v5177_v55, %s7832_s25  ;;  %v5188_v3 = vld [vmem:[%s9713_s0 + $0x168] sm:$0xff] }
 0x24c   :  { %v565_v29 = vmul.f32 %v549_v17, %v549_v17  ;;  %v806_v32 = vsel %vm148_vm4, %v790_v22, 1.0  ;;  %v527_v33 = vadd.f32 %v6094_v23, %v8180_v30  ;;  %v521_v35 = vpop.f32.mrb[31].mxu1  ;;  %7064 = vmatprep.subr.bf16.mxu1 %v8091_v28 }
 0x24d   :  { %v564_v38 = vmul.f32 %v548_v21, %v548_v21  ;;  %v522_v39 = vadd.f32 %v8180_v30, %v521_v35  ;;  %6152 = vmatprep.mubr.msk.f32.mxu1 %vm165_vm5, %v806_v32 }
 0x24e   :  { %v551_v41 = vsub.f32 %v527_v33, %v8185_v34  ;;  %6153 = vmatmul.mubr.msk.f32.gmra.mrb[44].mxu1 %vm165_vm5, %v807_v25  ;;  %v793_v42 = vsel %vm131_vm3, %v527_v33, %v761_v27 }
 0x24f   :  { %v7026_v43 = vpack.c.bf16 %v565_v29, %v564_v38  ;;  %v550_v44 = vsub.f32 %v522_v39, %v8185_v34  ;;  %v792_v47 = vsel %vm131_vm3, %v522_v39, %v759_v37  ;;  %v809_v48 = vsel %vm148_vm4, %v793_v42, 1.0  ;;  %7066 = vmatpush3.bf16.msra.mxu1 %v8091_v28  ;;  %1363 = vrot.lane.b32.xlu0 %v5179_v56, %s7832_s25 }
 0x250   :  { %v567_v49 = vmul.f32 %v551_v41, %v551_v41  ;;  %v808_v51 = vsel %vm148_vm4, %v792_v47, 1.0  ;;  %7068 = vmatprep.subr.bf16.mxu1 %v8101_v31 }
 0x251   :  { %v566_v52 = vmul.f32 %v550_v44, %v550_v44  ;;  %7016 = vmatpush3.bf16.xpose.msk.msra.mxu0 %vm8203_vm6, %v7014_v50  ;;  %6155 = vmatprep.mubr.msk.f32.mxu1 %vm165_vm5, %v808_v51  ;;  %v5178_v50 = vld [vmem:[%s9713_s0 + $0x118] sm:$0xff] }
 0x252   :  { %6156 = vmatmul.mubr.msk.f32.gmra.mrb[46].mxu1 %vm165_vm5, %v809_v48  ;;  %7017 = vmatprep.subr.bf16.mxu0 %v7834_v24 }
 0x253   :  { %v7030_v53 = vpack.c.bf16 %v567_v49, %v566_v52  ;;  %7070 = vmatpush3.bf16.msra.mxu1 %v8101_v31  ;;  %1361 = vrot.lane.b32.xlu1 %v5178_v50, %s7832_s25  ;;  %v7836_v52 = vmov 0.0  }
 0x254   :  { %7105 = vmatprep.subr.msk.bf16.mxu1 %vm7893_vm2, %v7906_v9  ;;  %1367 = vrot.lane.b32.xlu0 %v5181_v59, %s7832_s25 }
 0x255   :  { %6127 = vmatprep.mubr.msk.f32.mxu0 %vm7835_vm7, %v7836_v52 }
 0x257   :  { %1365 = vrot.lane.b32.xlu1 %v5180_v57, %s7832_s25 }
 0x258   :  { %1371 = vrot.lane.b32.xlu0 %v5183_v61, %s7832_s25 }
 0x259   :  { %7020 = vmatpush3.bf16.xpose.msk.msra.mxu0 %vm8203_vm6, %v7018_v4  ;;  %v5189_v4 = vld [vmem:[%s9713_s0 + $0x170] sm:$0xff] }
 0x25a   :  { %7021 = vmatprep.subr.bf16.mxu0 %v7834_v24 }
 0x25b   :  { %1369 = vrot.lane.b32.xlu1 %v5182_v60, %s7832_s25 }
 0x25c   :  { %1375 = vrot.lane.b32.xlu0 %v5185_v0, %s7832_s25 }
 0x25f   :  { %1373 = vrot.lane.b32.xlu1 %v5184_v62, %s7832_s25 }
 0x260   :  { %1379 = vrot.lane.b32.xlu0 %v5187_v2, %s7832_s25 }
 0x261   :  { %7024 = vmatpush3.bf16.xpose.msk.msra.mxu0 %vm8203_vm6, %v7022_v19 }
 0x262   :  { %7025 = vmatprep.subr.bf16.mxu0 %v7834_v24 }
 0x263   :  { %1377 = vrot.lane.b32.xlu1 %v5186_v1, %s7832_s25 }
 0x264   :  { %1383 = vrot.lane.b32.xlu0 %v5189_v4, %s7832_s25 }
 0x267   :  { %1381 = vrot.lane.b32.xlu1 %v5188_v3, %s7832_s25 }
 0x269   :  { %7028 = vmatpush3.bf16.xpose.msk.msra.mxu0 %vm8203_vm6, %v7026_v43 }
 0x26a   :  { %7029 = vmatprep.subr.bf16.mxu0 %v7834_v24 }
 0x26b   :  { %1385 = vrot.lane.b32.xlu1 %v5190_v6, %s7832_s25 }
 0x271   :  { %7032 = vmatpush3.bf16.xpose.msk.msra.mxu0 %vm8203_vm6, %v7030_v53  ;;  %v7837_v53 = vmov 1.0  }
 0x272   :  { %7071 = vmatprep.subr.bf16.mxu0 %v7834_v24 }
 0x278   :  { %6128 = vmatmul.mubr.msk.f32.vlgmr.msra.gmra.mrb[0].mxu0 %vm131_vm3, %v7837_v53 }
 0x279   :  { %6246 = vmatprep.mubr.msk.f32.mxu0 %vm7835_vm7, %v7836_v52 }
 0x2b6   :  { %v1358_v46 = vpop.permute.xlu1 %1357 }
 0x2b7   :  { %v1356_v40 = vpop.permute.xlu0 %1355 }
 0x2bd   :  { %v1360_v50 = vpop.permute.xlu0 %1359 }
 0x2c1   :  { %v1364_v57 = vpop.permute.xlu0 %1363 }
 0x2c5   :  { %v1362_v55 = vpop.permute.xlu1 %1361 }
 0x2c9   :  { %v1366_v56 = vpop.permute.xlu1 %1365 }
 0x2cd   :  { %v1370_v6 = vpop.permute.xlu1 %1369 }
 0x309   :  { %v6136_v7 = vpop.f32.mrb[32].mxu1 }
 0x30a   :  { %v924_v8 = vpop.f32.mrb[33].mxu1 }
 0x30b   :  { %7562 = vtanh.f32 %v924_v8 }
 0x30c   :  { %7564 = vtanh.f32 %v6136_v7 }
 0x30d   :  { %v6139_v10 = vpop.f32.mrb[34].mxu1 }
 0x30e   :  { %v934_v11 = vpop.f32.mrb[35].mxu1 }
 0x30f   :  { %7566 = vtanh.f32 %v934_v11 }
 0x310   :  { %7568 = vtanh.f32 %v6139_v10 }
 0x311   :  { %v6142_v12 = vpop.f32.mrb[36].mxu1 }
 0x312   :  { %7570 = vtanh.f32 %v6142_v12  ;;  %v944_v13 = vpop.f32.mrb[37].mxu1  ;;  %v1368_v12 = vpop.permute.xlu0 %1367 }
 0x313   :  { %7572 = vtanh.f32 %v944_v13 }
 0x315   :  { %v7563_v14 = vpop.eup %7562  ;;  %v6145_v15 = vpop.f32.mrb[38].mxu1 }
 0x316   :  { %v7565_v16 = vpop.eup %7564  ;;  %7574 = vtanh.f32 %v6145_v15  ;;  %v954_v17 = vpop.f32.mrb[39].mxu1  ;;  %6190 = vmatprep.mubr.f32.mxu1 %v7563_v14 }
 0x317   :  { %7576 = vtanh.f32 %v954_v17  ;;  %6191 = vmatmul.mubr.f32.vlgmr.msra.gmra.mrb[48].mxu1 %v7565_v16 }
 0x318   :  { %7108 = vmatpush3.bf16.msk.msra.mxu1 %vm7893_vm2, %v7906_v9 }
 0x319   :  { %v7567_v18 = vpop.eup %7566  ;;  %v6148_v19 = vpop.f32.mrb[40].mxu1  ;;  %7110 = vmatprep.subr.bf16.mxu1 %v7952_v20 }
 0x31a   :  { %v7569_v21 = vpop.eup %7568  ;;  %7578 = vtanh.f32 %v6148_v19  ;;  %v964_v22 = vpop.f32.mrb[41].mxu1  ;;  %6193 = vmatprep.mubr.f32.mxu1 %v7567_v18 }
 0x31b   :  { %7580 = vtanh.f32 %v964_v22  ;;  %6194 = vmatmul.mubr.f32.gmra.mrb[50].mxu1 %v7569_v21 }
 0x31c   :  { %v7571_v25 = vpop.eup %7570 }
 0x31d   :  { %v7573_v23 = vpop.eup %7572  ;;  %v6151_v27 = vpop.f32.mrb[42].mxu1 }
 0x31e   :  { %7582 = vtanh.f32 %v6151_v27  ;;  %v974_v29 = vpop.f32.mrb[43].mxu1  ;;  %6196 = vmatprep.mubr.f32.mxu1 %v7573_v23 }
 0x31f   :  { %7584 = vtanh.f32 %v974_v29  ;;  %6197 = vmatmul.mubr.f32.gmra.mrb[52].mxu1 %v7571_v25 }
 0x320   :  { %v7575_v32 = vpop.eup %7574 }
 0x321   :  { %v7577_v33 = vpop.eup %7576  ;;  %v6154_v35 = vpop.f32.mrb[44].mxu1 }
 0x322   :  { %7586 = vtanh.f32 %v6154_v35  ;;  %v984_v37 = vpop.f32.mrb[45].mxu1  ;;  %6199 = vmatprep.mubr.f32.mxu1 %v7577_v33 }
 0x323   :  { %7588 = vtanh.f32 %v984_v37  ;;  %6200 = vmatmul.mubr.f32.gmra.mrb[54].mxu1 %v7575_v32  ;;  %v1374_v37 = vpop.permute.xlu1 %1373 }
 0x324   :  { %v7579_v38 = vpop.eup %7578 }
 0x325   :  { %v7581_v39 = vpop.eup %7580  ;;  %v6157_v41 = vpop.f32.mrb[46].mxu1 }
 0x326   :  { %7590 = vtanh.f32 %v6157_v41  ;;  %v994_v42 = vpop.f32.mrb[47].mxu1  ;;  %6202 = vmatprep.mubr.f32.mxu1 %v7581_v39  ;;  %v1372_v41 = vpop.permute.xlu0 %1371 }
 0x327   :  { %7592 = vtanh.f32 %v994_v42  ;;  %6203 = vmatmul.mubr.f32.gmra.mrb[56].mxu1 %v7579_v38 }
 0x328   :  { %v7583_v43 = vpop.eup %7582 }
 0x329   :  { %v7585_v44 = vpop.eup %7584 }
 0x32a   :  { %6205 = vmatprep.mubr.f32.mxu1 %v7585_v44 }
 0x32b   :  { %6206 = vmatmul.mubr.f32.gmra.mrb[58].mxu1 %v7583_v43 }
 0x32c   :  { %v7587_v47 = vpop.eup %7586 }
 0x32d   :  { %v7589_v48 = vpop.eup %7588 }
 0x32e   :  { %6208 = vmatprep.mubr.f32.mxu1 %v7589_v48 }
 0x32f   :  { %6209 = vmatmul.mubr.f32.gmra.mrb[60].mxu1 %v7587_v47 }
 0x330   :  { %v7591_v49 = vpop.eup %7590 }
 0x331   :  { %v7593_v51 = vpop.eup %7592 }
 0x332   :  { %6211 = vmatprep.mubr.f32.mxu1 %v7593_v51 }
 0x333   :  { %6212 = vmatmul.mubr.f32.gmra.mrb[62].mxu1 %v7591_v49 }
 0x3ea   :  { %v6192_v59 = vpop.f32.mrb[48].mxu1 }
 0x3eb   :  { %v1091_v60 = vadd.f32 %v6192_v59, %v8180_v30  ;;  %v1085_v61 = vpop.f32.mrb[49].mxu1 }
 0x3ec   :  { %v1086_v62 = vadd.f32 %v8180_v30, %v1085_v61 }
 0x3ed   :  { %v1165_v0 = vsub.f32 %v1091_v60, %v8185_v34  ;;  %v1404_v1 = vsel %vm131_vm3, %v1091_v60, %v1358_v46 }
 0x3ee   :  { %v1164_v2 = vsub.f32 %v1086_v62, %v8185_v34  ;;  %v1403_v3 = vsel %vm131_vm3, %v1086_v62, %v1356_v40  ;;  %v6195_v4 = vpop.f32.mrb[50].mxu1  ;;  %v1420_v14 = vsel %vm148_vm4, %v1404_v1, 1.0  ;;  %v1378_v1 = vpop.permute.xlu1 %1377 }
 0x3ef   :  { %v1181_v7 = vmul.f32 %v1165_v0, %v1165_v0  ;;  %v1419_v8 = vsel %vm148_vm4, %v1403_v3, 1.0  ;;  %v1101_v10 = vadd.f32 %v6195_v4, %v8180_v30  ;;  %v1095_v11 = vpop.f32.mrb[51].mxu1 }
 0x3f0   :  { %v1180_v13 = vmul.f32 %v1164_v2, %v1164_v2  ;;  %v1096_v15 = vadd.f32 %v8180_v30, %v1095_v11  ;;  %6253 = vmatprep.mubr.msk.f32.mxu1 %vm165_vm5, %v1419_v8 }
 0x3f1   :  { %v1167_v16 = vsub.f32 %v1101_v10, %v8185_v34  ;;  %v1406_v17 = vsel %vm131_vm3, %v1101_v10, %v1362_v55  ;;  %6254 = vmatmul.mubr.msk.f32.vlgmr.msra.gmra.mrb[64].mxu1 %vm165_vm5, %v1420_v14 }
 0x3f2   :  { %v7072_v18 = vpack.c.bf16 %v1181_v7, %v1180_v13  ;;  %v1166_v19 = vsub.f32 %v1096_v15, %v8185_v34  ;;  %v1405_v21 = vsel %vm131_vm3, %v1096_v15, %v1360_v50  ;;  %v6198_v22 = vpop.f32.mrb[52].mxu1  ;;  %7112 = vmatpush3.bf16.msra.mxu1 %v7952_v20  ;;  %v1422_v33 = vsel %vm148_vm4, %v1406_v17, 1.0 }
 0x3f3   :  { %v1183_v25 = vmul.f32 %v1167_v16, %v1167_v16  ;;  %v1421_v23 = vsel %vm148_vm4, %v1405_v21, 1.0  ;;  %v1111_v27 = vadd.f32 %v6198_v22, %v8180_v30  ;;  %v1105_v29 = vpop.f32.mrb[53].mxu1  ;;  %7114 = vmatprep.subr.bf16.mxu1 %v7987_v36 }
 0x3f4   :  { %v1182_v32 = vmul.f32 %v1166_v19, %v1166_v19  ;;  %v1106_v35 = vadd.f32 %v8180_v30, %v1105_v29  ;;  %7074 = vmatpush3.bf16.xpose.msk.msra.mxu0 %vm8203_vm6, %v7072_v18  ;;  %6256 = vmatprep.mubr.msk.f32.mxu1 %vm165_vm5, %v1421_v23 }
 0x3f5   :  { %v1169_v38 = vsub.f32 %v1111_v27, %v8185_v34  ;;  %6257 = vmatmul.mubr.msk.f32.gmra.mrb[66].mxu1 %vm165_vm5, %v1422_v33  ;;  %v1408_v39 = vsel %vm131_vm3, %v1111_v27, %v1366_v56  ;;  %7075 = vmatprep.subr.bf16.mxu0 %v7834_v24  ;;  %v1382_v27 = vpop.permute.xlu1 %1381 }
 0x3f6   :  { %v7076_v42 = vpack.c.bf16 %v1183_v25, %v1182_v32  ;;  %v1168_v43 = vsub.f32 %v1106_v35, %v8185_v34  ;;  %v1407_v44 = vsel %vm131_vm3, %v1106_v35, %v1364_v57  ;;  %v1424_v47 = vsel %vm148_vm4, %v1408_v39, 1.0  ;;  %v6201_v48 = vpop.f32.mrb[54].mxu1  ;;  %7116 = vmatpush3.bf16.msra.mxu1 %v7987_v36 }
 0x3f7   :  { %v8440_v49 = vmul.f32 %v1169_v38, %v1169_v38  ;;  %v1423_v51 = vsel %vm148_vm4, %v1407_v44, 1.0  ;;  %v1121_v40 = vadd.f32 %v6201_v48, %v8180_v30  ;;  %v1115_v46 = vpop.f32.mrb[55].mxu1  ;;  %7118 = vmatprep.subr.bf16.mxu1 %v8005_v45 }
 0x3f8   :  { %v1184_v50 = vmul.f32 %v1168_v43, %v1168_v43  ;;  %v1116_v55 = vadd.f32 %v8180_v30, %v1115_v46  ;;  %6259 = vmatprep.mubr.msk.f32.mxu1 %vm165_vm5, %v1423_v51 }
 0x3f9   :  { %v1171_v56 = vsub.f32 %v1121_v40, %v8185_v34  ;;  %6260 = vmatmul.mubr.msk.f32.gmra.mrb[68].mxu1 %vm165_vm5, %v1424_v47  ;;  %v1410_v57 = vsel %vm131_vm3, %v1121_v40, %v1370_v6  ;;  %v1376_v6 = vpop.permute.xlu0 %1375 }
 0x3fa   :  { %v7080_v59 = vpack.c.bf16 %v8440_v49, %v1184_v50  ;;  %v1170_v60 = vsub.f32 %v1116_v55, %v8185_v34  ;;  %v1409_v61 = vsel %vm131_vm3, %v1116_v55, %v1368_v12  ;;  %v1426_v62 = vsel %vm148_vm4, %v1410_v57, 1.0  ;;  %v6204_v0 = vpop.f32.mrb[56].mxu1  ;;  %7120 = vmatpush3.bf16.msra.mxu1 %v8005_v45 }
 0x3fb   :  { %v8455_v2 = vmul.f32 %v1171_v56, %v1171_v56  ;;  %v1425_v3 = vsel %vm148_vm4, %v1409_v61, 1.0  ;;  %v1131_v4 = vadd.f32 %v6204_v0, %v8180_v30  ;;  %v1125_v7 = vpop.f32.mrb[57].mxu1  ;;  %7122 = vmatprep.subr.bf16.mxu1 %v8023_v54 }
 0x3fc   :  { %v8460_v8 = vmul.f32 %v1170_v60, %v1170_v60  ;;  %v1126_v10 = vadd.f32 %v8180_v30, %v1125_v7  ;;  %7078 = vmatpush3.bf16.xpose.msk.msra.mxu0 %vm8203_vm6, %v7076_v42  ;;  %6262 = vmatprep.mubr.msk.f32.mxu1 %vm165_vm5, %v1425_v3  ;;  %v1386_v60 = vpop.permute.xlu1 %1385 }
 0x3fd   :  { %v1173_v11 = vsub.f32 %v1131_v4, %v8185_v34  ;;  %6263 = vmatmul.mubr.msk.f32.gmra.mrb[70].mxu1 %vm165_vm5, %v1426_v62  ;;  %v1412_v12 = vsel %vm131_vm3, %v1131_v4, %v1374_v37  ;;  %7079 = vmatprep.subr.bf16.mxu0 %v7834_v24  ;;  %v1380_v33 = vpop.permute.xlu0 %1379 }
 0x3fe   :  { %v7084_v13 = vpack.c.bf16 %v8455_v2, %v8460_v8  ;;  %v1172_v14 = vsub.f32 %v1126_v10, %v8185_v34  ;;  %v1411_v15 = vsel %vm131_vm3, %v1126_v10, %v1372_v41  ;;  %v1428_v16 = vsel %vm148_vm4, %v1412_v12, 1.0  ;;  %v6207_v17 = vpop.f32.mrb[58].mxu1  ;;  %7124 = vmatpush3.bf16.msra.mxu1 %v8023_v54  ;;  %v5226_v2 = vld [vmem:[%s9713_s0 + $0x188] sm:$0xff]  ;;  %v5225_v8 = vld [vmem:[%s9713_s0 + $0x180] sm:$0xff] }
 0x3ff   :  { %v8476_v18 = vmul.f32 %v1173_v11, %v1173_v11  ;;  %v1427_v19 = vsel %vm148_vm4, %v1411_v15, 1.0  ;;  %v1141_v21 = vadd.f32 %v6207_v17, %v8180_v30  ;;  %v1135_v22 = vpop.f32.mrb[59].mxu1  ;;  %7126 = vmatprep.subr.bf16.mxu1 %v8041_v63  ;;  %1982 = vrot.lane.b32.xlu1 %v5226_v2, %s7832_s25  ;;  %v5227_v17 = vld [vmem:[%s9713_s0 + $0x190] sm:$0xff] }
 0x400   :  { %v8481_v25 = vmul.f32 %v1172_v14, %v1172_v14  ;;  %v1136_v23 = vadd.f32 %v8180_v30, %v1135_v22  ;;  %6265 = vmatprep.mubr.msk.f32.mxu1 %vm165_vm5, %v1427_v19  ;;  %1980 = vrot.lane.b32.xlu0 %v5225_v8, %s7832_s25  ;;  %v5229_v19 = vld [vmem:[%s9713_s0 + $0x1a0] sm:$0xff]  ;;  %v5232_v22 = vld [vmem:[%s9713_s0 + $0x1b8] sm:$0xff] }
 0x401   :  { %v1175_v29 = vsub.f32 %v1141_v21, %v8185_v34  ;;  %6266 = vmatmul.mubr.msk.f32.gmra.mrb[72].mxu1 %vm165_vm5, %v1428_v16  ;;  %v1414_v32 = vsel %vm131_vm3, %v1141_v21, %v1378_v1  ;;  %v1384_v1 = vpop.permute.xlu0 %1383  ;;  %v5231_v21 = vld [vmem:[%s9713_s0 + $0x1b0] sm:$0xff] }
 0x402   :  { %v7088_v35 = vpack.c.bf16 %v8476_v18, %v8481_v25  ;;  %v1174_v37 = vsub.f32 %v1136_v23, %v8185_v34  ;;  %v1413_v38 = vsel %vm131_vm3, %v1136_v23, %v1376_v6  ;;  %v1430_v39 = vsel %vm148_vm4, %v1414_v32, 1.0  ;;  %v6210_v41 = vpop.f32.mrb[60].mxu1  ;;  %7128 = vmatpush3.bf16.msra.mxu1 %v8041_v63  ;;  %v5230_v18 = vld [vmem:[%s9713_s0 + $0x1a8] sm:$0xff]  ;;  %v5233_v25 = vld [vmem:[%s9713_s0 + $0x1c0] sm:$0xff] }
 0x403   :  { %v1191_v42 = vmul.f32 %v1175_v29, %v1175_v29  ;;  %v1429_v43 = vsel %vm148_vm4, %v1413_v38, 1.0  ;;  %v1151_v44 = vadd.f32 %v6210_v41, %v8180_v30  ;;  %v1145_v47 = vpop.f32.mrb[61].mxu1  ;;  %7130 = vmatprep.subr.bf16.mxu1 %v8081_v26  ;;  %v5234_v23 = vld [vmem:[%s9713_s0 + $0x1c8] sm:$0xff]  ;;  %v5236_v29 = vld [vmem:[%s9713_s0 + $0x1d8] sm:$0xff]  ;;  %v5237_v32 = vld [vmem:[%s9713_s0 + $0x1e0] sm:$0xff] }
 0x404   :  { %v1190_v48 = vmul.f32 %v1174_v37, %v1174_v37  ;;  %v1146_v49 = vadd.f32 %v8180_v30, %v1145_v47  ;;  %7082 = vmatpush3.bf16.xpose.msk.msra.mxu0 %vm8203_vm6, %v7080_v59  ;;  %6268 = vmatprep.mubr.msk.f32.mxu1 %vm165_vm5, %v1429_v43  ;;  %v5240_v37 = vld [vmem:[%s9713_s0 + $0x1f8] sm:$0xff] }
 0x405   :  { %v1177_v51 = vsub.f32 %v1151_v44, %v8185_v34  ;;  %6269 = vmatmul.mubr.msk.f32.gmra.mrb[74].mxu1 %vm165_vm5, %v1430_v39  ;;  %v1416_v40 = vsel %vm131_vm3, %v1151_v44, %v1382_v27  ;;  %7083 = vmatprep.subr.bf16.mxu0 %v7834_v24  ;;  %v5235_v27 = vld [vmem:[%s9713_s0 + $0x1d0] sm:$0xff] }
 0x406   :  { %v7092_v46 = vpack.c.bf16 %v1191_v42, %v1190_v48  ;;  %v1176_v50 = vsub.f32 %v1146_v49, %v8185_v34  ;;  %v1415_v55 = vsel %vm131_vm3, %v1146_v49, %v1380_v33  ;;  %v1432_v56 = vsel %vm148_vm4, %v1416_v40, 1.0  ;;  %v6213_v57 = vpop.f32.mrb[62].mxu1  ;;  %7132 = vmatpush3.bf16.msra.mxu1 %v8081_v26  ;;  %1984 = vrot.lane.b32.xlu0 %v5227_v17, %s7832_s25  ;;  %v5238_v33 = vld [vmem:[%s9713_s0 + $0x1e8] sm:$0xff] }
 0x407   :  { %v1193_v59 = vmul.f32 %v1177_v51, %v1177_v51  ;;  %v1431_v61 = vsel %vm148_vm4, %v1415_v55, 1.0  ;;  %v1161_v62 = vadd.f32 %v6213_v57, %v8180_v30  ;;  %v1155_v0 = vpop.f32.mrb[63].mxu1  ;;  %7134 = vmatprep.subr.bf16.mxu1 %v8091_v28 }
 0x408   :  { %v1192_v3 = vmul.f32 %v1176_v50, %v1176_v50  ;;  %v1156_v4 = vadd.f32 %v8180_v30, %v1155_v0  ;;  %6271 = vmatprep.mubr.msk.f32.mxu1 %vm165_vm5, %v1431_v61 }
 0x409   :  { %v1179_v7 = vsub.f32 %v1161_v62, %v8185_v34  ;;  %6272 = vmatmul.mubr.msk.f32.gmra.mrb[76].mxu1 %vm165_vm5, %v1432_v56  ;;  %v1418_v6 = vsel %vm131_vm3, %v1161_v62, %v1386_v60 }
 0x40a   :  { %v7096_v10 = vpack.c.bf16 %v1193_v59, %v1192_v3  ;;  %v1178_v11 = vsub.f32 %v1156_v4, %v8185_v34  ;;  %v1417_v12 = vsel %vm131_vm3, %v1156_v4, %v1384_v1  ;;  %v1434_v14 = vsel %vm148_vm4, %v1418_v6, 1.0  ;;  %7136 = vmatpush3.bf16.msra.mxu1 %v8091_v28  ;;  %1988 = vrot.lane.b32.xlu0 %v5229_v19, %s7832_s25  ;;  %v8622_v19 = vld [vmem:[%s9717_s4] ss:$0 sm:$0xff] }
 0x40b   :  { %v1195_v15 = vmul.f32 %v1179_v7, %v1179_v7  ;;  %v1433_v30 = vsel %vm148_vm4, %v1417_v12, 1.0  ;;  %7138 = vmatprep.subr.bf16.mxu1 %v8101_v31 }
 0x40c   :  { %v1194_v16 = vmul.f32 %v1178_v11, %v1178_v11  ;;  %7086 = vmatpush3.bf16.xpose.msk.msra.mxu0 %vm8203_vm6, %v7084_v13  ;;  %6274 = vmatprep.mubr.msk.f32.mxu1 %vm165_vm5, %v1433_v30  ;;  %v5228_v13 = vld [vmem:[%s9713_s0 + $0x198] sm:$0xff] }
 0x40d   :  { %6275 = vmatmul.mubr.msk.f32.gmra.mrb[78].mxu1 %vm165_vm5, %v1434_v14  ;;  %7087 = vmatprep.subr.bf16.mxu0 %v7834_v24 }
 0x40e   :  { %v7100_v34 = vpack.c.bf16 %v1195_v15, %v1194_v16  ;;  %7140 = vmatpush3.bf16.msra.mxu1 %v8101_v31  ;;  %1986 = vrot.lane.b32.xlu1 %v5228_v13, %s7832_s25 }
 0x40f   :  { %7175 = vmatprep.subr.msk.bf16.mxu1 %vm7893_vm2, %v7906_v9  ;;  %1992 = vrot.lane.b32.xlu0 %v5231_v21, %s7832_s25 }
 0x412   :  { %1990 = vrot.lane.b32.xlu1 %v5230_v18, %s7832_s25 }
 0x413   :  { %1996 = vrot.lane.b32.xlu0 %v5233_v25, %s7832_s25 }
 0x414   :  { %7090 = vmatpush3.bf16.xpose.msk.msra.mxu0 %vm8203_vm6, %v7088_v35  ;;  %v5239_v35 = vld [vmem:[%s9713_s0 + $0x1f0] sm:$0xff] }
 0x415   :  { %7091 = vmatprep.subr.bf16.mxu0 %v7834_v24 }
 0x416   :  { %1994 = vrot.lane.b32.xlu1 %v5232_v22, %s7832_s25 }
 0x417   :  { %2000 = vrot.lane.b32.xlu0 %v5235_v27, %s7832_s25 }
 0x41a   :  { %1998 = vrot.lane.b32.xlu1 %v5234_v23, %s7832_s25  ;;  %v8629_v23 = vld [vmem:[%s9718_s5] ss:$0 sm:$0xff] }
 0x41b   :  { %2004 = vrot.lane.b32.xlu0 %v5237_v32, %s7832_s25 }
 0x41c   :  { %7094 = vmatpush3.bf16.xpose.msk.msra.mxu0 %vm8203_vm6, %v7092_v46 }
 0x41d   :  { %7095 = vmatprep.subr.bf16.mxu0 %v7834_v24 }
 0x41e   :  { %2002 = vrot.lane.b32.xlu1 %v5236_v29, %s7832_s25 }
 0x41f   :  { %2008 = vrot.lane.b32.xlu0 %v5239_v35, %s7832_s25 }
 0x422   :  { %2006 = vrot.lane.b32.xlu1 %v5238_v33, %s7832_s25 }
 0x424   :  { %7098 = vmatpush3.bf16.xpose.msk.msra.mxu0 %vm8203_vm6, %v7096_v10 }
 0x425   :  { %7099 = vmatprep.subr.bf16.mxu0 %v7834_v24 }
 0x426   :  { %2010 = vrot.lane.b32.xlu1 %v5240_v37, %s7832_s25 }
 0x42c   :  { %7102 = vmatpush3.bf16.xpose.msk.msra.mxu0 %vm8203_vm6, %v7100_v34 }
 0x42d   :  { %7141 = vmatprep.subr.bf16.mxu0 %v7834_v24 }
 0x433   :  { %6247 = vmatmul.mubr.msk.f32.vlgmr.msra.gmra.mrb[2].mxu0 %vm131_vm3, %v7837_v53 }
 0x434   :  { %6365 = vmatprep.mubr.msk.f32.mxu0 %vm7835_vm7, %v7836_v52 }
 0x471   :  { %v1983_v34 = vpop.permute.xlu1 %1982 }
 0x472   :  { %v1981_v16 = vpop.permute.xlu0 %1980 }
 0x478   :  { %v1985_v2 = vpop.permute.xlu0 %1984 }
 0x47c   :  { %v1989_v13 = vpop.permute.xlu0 %1988 }
 0x480   :  { %v1987_v8 = vpop.permute.xlu1 %1986 }
 0x484   :  { %v1991_v18 = vpop.permute.xlu1 %1990 }
 0x488   :  { %v1995_v37 = vpop.permute.xlu1 %1994 }
 0x4c4   :  { %v6255_v38 = vpop.f32.mrb[64].mxu1 }
 0x4c5   :  { %v1549_v39 = vpop.f32.mrb[65].mxu1 }
 0x4c6   :  { %7594 = vtanh.f32 %v1549_v39 }
 0x4c7   :  { %7596 = vtanh.f32 %v6255_v38 }
 0x4c8   :  { %v6258_v41 = vpop.f32.mrb[66].mxu1 }
 0x4c9   :  { %v1559_v42 = vpop.f32.mrb[67].mxu1 }
 0x4ca   :  { %7598 = vtanh.f32 %v1559_v42 }
 0x4cb   :  { %7600 = vtanh.f32 %v6258_v41 }
 0x4cc   :  { %v6261_v43 = vpop.f32.mrb[68].mxu1 }
 0x4cd   :  { %v1569_v44 = vpop.f32.mrb[69].mxu1 }
 0x4ce   :  { %7602 = vtanh.f32 %v1569_v44 }
 0x4cf   :  { %7604 = vtanh.f32 %v6261_v43  ;;  %v1993_v43 = vpop.permute.xlu0 %1992 }
 0x4d0   :  { %v7595_v47 = vpop.eup %7594  ;;  %v6264_v48 = vpop.f32.mrb[70].mxu1 }
 0x4d1   :  { %v7597_v49 = vpop.eup %7596  ;;  %7606 = vtanh.f32 %v6264_v48  ;;  %v1579_v51 = vpop.f32.mrb[71].mxu1  ;;  %6309 = vmatprep.mubr.f32.mxu1 %v7595_v47 }
 0x4d2   :  { %7608 = vtanh.f32 %v1579_v51  ;;  %6310 = vmatmul.mubr.f32.vlgmr.msra.gmra.mrb[80].mxu1 %v7597_v49 }
 0x4d3   :  { %7178 = vmatpush3.bf16.msk.msra.mxu1 %vm7893_vm2, %v7906_v9 }
 0x4d4   :  { %v7599_v40 = vpop.eup %7598  ;;  %v6267_v46 = vpop.f32.mrb[72].mxu1  ;;  %7180 = vmatprep.subr.bf16.mxu1 %v7952_v20 }
 0x4d5   :  { %v7601_v50 = vpop.eup %7600  ;;  %7610 = vtanh.f32 %v6267_v46  ;;  %v1589_v55 = vpop.f32.mrb[73].mxu1  ;;  %6312 = vmatprep.mubr.f32.mxu1 %v7599_v40 }
 0x4d6   :  { %7612 = vtanh.f32 %v1589_v55  ;;  %6313 = vmatmul.mubr.f32.gmra.mrb[82].mxu1 %v7601_v50 }
 0x4d8   :  { %v7603_v56 = vpop.eup %7602  ;;  %v6270_v57 = vpop.f32.mrb[74].mxu1 }
 0x4d9   :  { %v7605_v60 = vpop.eup %7604  ;;  %7614 = vtanh.f32 %v6270_v57  ;;  %v1599_v59 = vpop.f32.mrb[75].mxu1  ;;  %6315 = vmatprep.mubr.f32.mxu1 %v7603_v56 }
 0x4da   :  { %7616 = vtanh.f32 %v1599_v59  ;;  %6316 = vmatmul.mubr.f32.gmra.mrb[84].mxu1 %v7605_v60 }
 0x4db   :  { %v7607_v61 = vpop.eup %7606 }
 0x4dc   :  { %v7609_v62 = vpop.eup %7608  ;;  %v6273_v0 = vpop.f32.mrb[76].mxu1 }
 0x4dd   :  { %7618 = vtanh.f32 %v6273_v0  ;;  %v1609_v1 = vpop.f32.mrb[77].mxu1  ;;  %6318 = vmatprep.mubr.f32.mxu1 %v7609_v62 }
 0x4de   :  { %7620 = vtanh.f32 %v1609_v1  ;;  %6319 = vmatmul.mubr.f32.gmra.mrb[86].mxu1 %v7607_v61  ;;  %v1999_v1 = vpop.permute.xlu1 %1998 }
 0x4df   :  { %v7611_v3 = vpop.eup %7610 }
 0x4e0   :  { %v7613_v4 = vpop.eup %7612  ;;  %v6276_v7 = vpop.f32.mrb[78].mxu1 }
 0x4e1   :  { %7622 = vtanh.f32 %v6276_v7  ;;  %v1619_v6 = vpop.f32.mrb[79].mxu1  ;;  %6321 = vmatprep.mubr.f32.mxu1 %v7613_v4  ;;  %v1997_v7 = vpop.permute.xlu0 %1996 }
 0x4e2   :  { %7624 = vtanh.f32 %v1619_v6  ;;  %6322 = vmatmul.mubr.f32.gmra.mrb[88].mxu1 %v7611_v3 }
 0x4e3   :  { %v7615_v10 = vpop.eup %7614 }
 0x4e4   :  { %v7617_v11 = vpop.eup %7616 }
 0x4e5   :  { %6324 = vmatprep.mubr.f32.mxu1 %v7617_v11 }
 0x4e6   :  { %6325 = vmatmul.mubr.f32.gmra.mrb[90].mxu1 %v7615_v10 }
 0x4e7   :  { %v7619_v12 = vpop.eup %7618 }
 0x4e8   :  { %v7621_v14 = vpop.eup %7620 }
 0x4e9   :  { %6327 = vmatprep.mubr.f32.mxu1 %v7621_v14 }
 0x4ea   :  { %6328 = vmatmul.mubr.f32.gmra.mrb[92].mxu1 %v7619_v12 }
 0x4eb   :  { %v7623_v15 = vpop.eup %7622 }
 0x4ec   :  { %v7625_v30 = vpop.eup %7624 }
 0x4ed   :  { %6330 = vmatprep.mubr.f32.mxu1 %v7625_v30 }
 0x4ee   :  { %6331 = vmatmul.mubr.f32.gmra.mrb[94].mxu1 %v7623_v15 }
 0x5a5   :  { %v6311_v17 = vpop.f32.mrb[80].mxu1 }
 0x5a6   :  { %v1716_v21 = vadd.f32 %v8622_v19, %v6311_v17  ;;  %v1710_v22 = vpop.f32.mrb[81].mxu1 }
 0x5a7   :  { %v1711_v25 = vadd.f32 %v8622_v19, %v1710_v22 }
 0x5a8   :  { %v1790_v27 = vsub.f32 %v1716_v21, %v8629_v23  ;;  %v2029_v29 = vsel %vm131_vm3, %v1716_v21, %v1983_v34 }
 0x5a9   :  { %v1789_v32 = vsub.f32 %v1711_v25, %v8629_v23  ;;  %v2028_v33 = vsel %vm131_vm3, %v1711_v25, %v1981_v16  ;;  %v6314_v35 = vpop.f32.mrb[82].mxu1  ;;  %v2045_v47 = vsel %vm148_vm4, %v2029_v29, 1.0  ;;  %v2003_v29 = vpop.permute.xlu1 %2002 }
 0x5aa   :  { %v1806_v38 = vmul.f32 %v1790_v27, %v1790_v27  ;;  %v2044_v39 = vsel %vm148_vm4, %v2028_v33, 1.0  ;;  %v1726_v41 = vadd.f32 %v8622_v19, %v6314_v35  ;;  %v1720_v42 = vpop.f32.mrb[83].mxu1 }
 0x5ab   :  { %v1805_v44 = vmul.f32 %v1789_v32, %v1789_v32  ;;  %v1721_v48 = vadd.f32 %v8622_v19, %v1720_v42  ;;  %6372 = vmatprep.mubr.msk.f32.mxu1 %vm165_vm5, %v2044_v39 }
 0x5ac   :  { %v1792_v49 = vsub.f32 %v1726_v41, %v8629_v23  ;;  %v2031_v51 = vsel %vm131_vm3, %v1726_v41, %v1987_v8  ;;  %6373 = vmatmul.mubr.msk.f32.vlgmr.msra.gmra.mrb[96].mxu1 %vm165_vm5, %v2045_v47 }
 0x5ad   :  { %v7142_v40 = vpack.c.bf16 %v1806_v38, %v1805_v44  ;;  %v1791_v46 = vsub.f32 %v1721_v48, %v8629_v23  ;;  %v2030_v50 = vsel %vm131_vm3, %v1721_v48, %v1985_v2  ;;  %v6317_v55 = vpop.f32.mrb[84].mxu1  ;;  %7182 = vmatpush3.bf16.msra.mxu1 %v7952_v20  ;;  %v2047_v62 = vsel %vm148_vm4, %v2031_v51, 1.0 }
 0x5ae   :  { %v1808_v56 = vmul.f32 %v1792_v49, %v1792_v49  ;;  %v2046_v57 = vsel %vm148_vm4, %v2030_v50, 1.0  ;;  %v1736_v60 = vadd.f32 %v8622_v19, %v6317_v55  ;;  %v1730_v59 = vpop.f32.mrb[85].mxu1  ;;  %7184 = vmatprep.subr.bf16.mxu1 %v7987_v36 }
 0x5af   :  { %v1807_v61 = vmul.f32 %v1791_v46, %v1791_v46  ;;  %v1731_v0 = vadd.f32 %v8622_v19, %v1730_v59  ;;  %7144 = vmatpush3.bf16.xpose.msk.msra.mxu0 %vm8203_vm6, %v7142_v40  ;;  %6375 = vmatprep.mubr.msk.f32.mxu1 %vm165_vm5, %v2046_v57 }
 0x5b0   :  { %v1794_v3 = vsub.f32 %v1736_v60, %v8629_v23  ;;  %v2033_v4 = vsel %vm131_vm3, %v1736_v60, %v1991_v18  ;;  %6376 = vmatmul.mubr.msk.f32.gmra.mrb[98].mxu1 %vm165_vm5, %v2047_v62  ;;  %7145 = vmatprep.subr.bf16.mxu0 %v7834_v24  ;;  %v2007_v60 = vpop.permute.xlu1 %2006 }
 0x5b1   :  { %v7146_v6 = vpack.c.bf16 %v1808_v56, %v1807_v61  ;;  %v1793_v10 = vsub.f32 %v1731_v0, %v8629_v23  ;;  %v2032_v11 = vsel %vm131_vm3, %v1731_v0, %v1989_v13  ;;  %v6320_v12 = vpop.f32.mrb[86].mxu1  ;;  %7186 = vmatpush3.bf16.msra.mxu1 %v7987_v36  ;;  %v2049_v2 = vsel %vm148_vm4, %v2033_v4, 1.0 }
 0x5b2   :  { %v8661_v14 = vmul.f32 %v1794_v3, %v1794_v3  ;;  %v2048_v15 = vsel %vm148_vm4, %v2032_v11, 1.0  ;;  %v1746_v30 = vadd.f32 %v8622_v19, %v6320_v12  ;;  %v1740_v16 = vpop.f32.mrb[87].mxu1  ;;  %7188 = vmatprep.subr.bf16.mxu1 %v8005_v45 }
 0x5b3   :  { %v1809_v34 = vmul.f32 %v1793_v10, %v1793_v10  ;;  %v1741_v8 = vadd.f32 %v8622_v19, %v1740_v16  ;;  %6378 = vmatprep.mubr.msk.f32.mxu1 %vm165_vm5, %v2048_v15 }
 0x5b4   :  { %v1796_v13 = vsub.f32 %v1746_v30, %v8629_v23  ;;  %6379 = vmatmul.mubr.msk.f32.gmra.mrb[100].mxu1 %vm165_vm5, %v2049_v2  ;;  %v2035_v17 = vsel %vm131_vm3, %v1746_v30, %v1995_v37  ;;  %v2001_v37 = vpop.permute.xlu0 %2000 }
 0x5b5   :  { %v7150_v18 = vpack.c.bf16 %v8661_v14, %v1809_v34  ;;  %v1795_v21 = vsub.f32 %v1741_v8, %v8629_v23  ;;  %v2034_v22 = vsel %vm131_vm3, %v1741_v8, %v1993_v43  ;;  %v2051_v25 = vsel %vm148_vm4, %v2035_v17, 1.0  ;;  %v6323_v27 = vpop.f32.mrb[88].mxu1  ;;  %7190 = vmatpush3.bf16.msra.mxu1 %v8005_v45 }
 0x5b6   :  { %v8677_v32 = vmul.f32 %v1796_v13, %v1796_v13  ;;  %v2050_v33 = vsel %vm148_vm4, %v2034_v22, 1.0  ;;  %v1756_v35 = vadd.f32 %v8622_v19, %v6323_v27  ;;  %v1750_v38 = vpop.f32.mrb[89].mxu1  ;;  %7192 = vmatprep.subr.bf16.mxu1 %v8023_v54 }
 0x5b7   :  { %v8682_v39 = vmul.f32 %v1795_v21, %v1795_v21  ;;  %v1751_v41 = vadd.f32 %v8622_v19, %v1750_v38  ;;  %7148 = vmatpush3.bf16.xpose.msk.msra.mxu0 %vm8203_vm6, %v7146_v6  ;;  %6381 = vmatprep.mubr.msk.f32.mxu1 %vm165_vm5, %v2050_v33  ;;  %v2011_v21 = vpop.permute.xlu1 %2010 }
 0x5b8   :  { %v1798_v42 = vsub.f32 %v1756_v35, %v8629_v23  ;;  %6382 = vmatmul.mubr.msk.f32.gmra.mrb[102].mxu1 %vm165_vm5, %v2051_v25  ;;  %v2037_v43 = vsel %vm131_vm3, %v1756_v35, %v1999_v1  ;;  %7149 = vmatprep.subr.bf16.mxu0 %v7834_v24  ;;  %v2005_v62 = vpop.permute.xlu0 %2004 }
 0x5b9   :  { %v7154_v44 = vpack.c.bf16 %v8677_v32, %v8682_v39  ;;  %v1797_v47 = vsub.f32 %v1751_v41, %v8629_v23  ;;  %v2036_v48 = vsel %vm131_vm3, %v1751_v41, %v1997_v7  ;;  %v2053_v49 = vsel %vm148_vm4, %v2037_v43, 1.0  ;;  %v6326_v51 = vpop.f32.mrb[90].mxu1  ;;  %7194 = vmatpush3.bf16.msra.mxu1 %v8023_v54  ;;  %v5276_v32 = vld [vmem:[%s9713_s0 + $0x208] sm:$0xff]  ;;  %v5275_v39 = vld [vmem:[%s9713_s0 + $0x200] sm:$0xff] }
 0x5ba   :  { %v8698_v40 = vmul.f32 %v1798_v42, %v1798_v42  ;;  %v2052_v46 = vsel %vm148_vm4, %v2036_v48, 1.0  ;;  %v1766_v50 = vadd.f32 %v8622_v19, %v6326_v51  ;;  %v1760_v55 = vpop.f32.mrb[91].mxu1  ;;  %7196 = vmatprep.subr.bf16.mxu1 %v8041_v63  ;;  %2607 = vrot.lane.b32.xlu1 %v5276_v32, %s7832_s25 }
 0x5bb   :  { %v8703_v56 = vmul.f32 %v1797_v47, %v1797_v47  ;;  %v1761_v57 = vadd.f32 %v8622_v19, %v1760_v55  ;;  %6384 = vmatprep.mubr.msk.f32.mxu1 %vm165_vm5, %v2052_v46  ;;  %2605 = vrot.lane.b32.xlu0 %v5275_v39, %s7832_s25  ;;  %v5277_v46 = vld [vmem:[%s9713_s0 + $0x210] sm:$0xff]  ;;  %v5279_v55 = vld [vmem:[%s9713_s0 + $0x220] sm:$0xff] }
 0x5bc   :  { %v1800_v59 = vsub.f32 %v1766_v50, %v8629_v23  ;;  %6385 = vmatmul.mubr.msk.f32.gmra.mrb[104].mxu1 %vm165_vm5, %v2053_v49  ;;  %v2039_v61 = vsel %vm131_vm3, %v1766_v50, %v2003_v29  ;;  %v2009_v29 = vpop.permute.xlu0 %2008  ;;  %v5280_v50 = vld [vmem:[%s9713_s0 + $0x228] sm:$0xff] }
 0x5bd   :  { %v7158_v0 = vpack.c.bf16 %v8698_v40, %v8703_v56  ;;  %v1799_v1 = vsub.f32 %v1761_v57, %v8629_v23  ;;  %v2038_v3 = vsel %vm131_vm3, %v1761_v57, %v2001_v37  ;;  %v2055_v4 = vsel %vm148_vm4, %v2039_v61, 1.0  ;;  %v6329_v7 = vpop.f32.mrb[92].mxu1  ;;  %7198 = vmatpush3.bf16.msra.mxu1 %v8041_v63  ;;  %v5282_v56 = vld [vmem:[%s9713_s0 + $0x238] sm:$0xff]  ;;  %v5281_v57 = vld [vmem:[%s9713_s0 + $0x230] sm:$0xff] }
 0x5be   :  { %v1816_v6 = vmul.f32 %v1800_v59, %v1800_v59  ;;  %v2054_v10 = vsel %vm148_vm4, %v2038_v3, 1.0  ;;  %v1776_v11 = vadd.f32 %v8622_v19, %v6329_v7  ;;  %v1770_v12 = vpop.f32.mrb[93].mxu1  ;;  %7200 = vmatprep.subr.bf16.mxu1 %v8081_v26  ;;  %v5284_v59 = vld [vmem:[%s9713_s0 + $0x248] sm:$0xff]  ;;  %v5285_v61 = vld [vmem:[%s9713_s0 + $0x250] sm:$0xff] }
 0x5bf   :  { %v1815_v14 = vmul.f32 %v1799_v1, %v1799_v1  ;;  %v1771_v15 = vadd.f32 %v8622_v19, %v1770_v12  ;;  %7152 = vmatpush3.bf16.xpose.msk.msra.mxu0 %vm8203_vm6, %v7150_v18  ;;  %6387 = vmatprep.mubr.msk.f32.mxu1 %vm165_vm5, %v2054_v10  ;;  %v5288_v1 = vld [vmem:[%s9713_s0 + $0x268] sm:$0xff]  ;;  %v5289_v3 = vld [vmem:[%s9713_s0 + $0x270] sm:$0xff] }
 0x5c0   :  { %v1802_v30 = vsub.f32 %v1776_v11, %v8629_v23  ;;  %6388 = vmatmul.mubr.msk.f32.gmra.mrb[106].mxu1 %vm165_vm5, %v2055_v4  ;;  %v2041_v16 = vsel %vm131_vm3, %v1776_v11, %v2007_v60  ;;  %7153 = vmatprep.subr.bf16.mxu0 %v7834_v24  ;;  %v5283_v60 = vld [vmem:[%s9713_s0 + $0x240] sm:$0xff]  ;;  %v5290_v4 = vld [vmem:[%s9713_s0 + $0x278] sm:$0xff] }
 0x5c1   :  { %v7162_v34 = vpack.c.bf16 %v1816_v6, %v1815_v14  ;;  %v1801_v2 = vsub.f32 %v1771_v15, %v8629_v23  ;;  %v2040_v8 = vsel %vm131_vm3, %v1771_v15, %v2005_v62  ;;  %v2057_v13 = vsel %vm148_vm4, %v2041_v16, 1.0  ;;  %v6332_v17 = vpop.f32.mrb[94].mxu1  ;;  %7202 = vmatpush3.bf16.msra.mxu1 %v8081_v26  ;;  %2609 = vrot.lane.b32.xlu0 %v5277_v46, %s7832_s25  ;;  %v5286_v62 = vld [vmem:[%s9713_s0 + $0x258] sm:$0xff] }
 0x5c2   :  { %v1818_v18 = vmul.f32 %v1802_v30, %v1802_v30  ;;  %v2056_v22 = vsel %vm148_vm4, %v2040_v8, 1.0  ;;  %v1786_v25 = vadd.f32 %v8622_v19, %v6332_v17  ;;  %v1780_v27 = vpop.f32.mrb[95].mxu1  ;;  %7204 = vmatprep.subr.bf16.mxu1 %v8091_v28 }
 0x5c3   :  { %v1817_v33 = vmul.f32 %v1801_v2, %v1801_v2  ;;  %v1781_v35 = vadd.f32 %v8622_v19, %v1780_v27  ;;  %6390 = vmatprep.mubr.msk.f32.mxu1 %vm165_vm5, %v2056_v22 }
 0x5c4   :  { %v1804_v38 = vsub.f32 %v1786_v25, %v8629_v23  ;;  %6391 = vmatmul.mubr.msk.f32.gmra.mrb[108].mxu1 %vm165_vm5, %v2057_v13  ;;  %v2043_v37 = vsel %vm131_vm3, %v1786_v25, %v2011_v21 }
 0x5c5   :  { %v7166_v41 = vpack.c.bf16 %v1818_v18, %v1817_v33  ;;  %v1803_v42 = vsub.f32 %v1781_v35, %v8629_v23  ;;  %v2042_v43 = vsel %vm131_vm3, %v1781_v35, %v2009_v29  ;;  %v2059_v47 = vsel %vm148_vm4, %v2043_v37, 1.0  ;;  %7206 = vmatpush3.bf16.msra.mxu1 %v8091_v28  ;;  %2613 = vrot.lane.b32.xlu0 %v5279_v55, %s7832_s25 }
 0x5c6   :  { %v1820_v48 = vmul.f32 %v1804_v38, %v1804_v38  ;;  %v2058_v49 = vsel %vm148_vm4, %v2042_v43, 1.0  ;;  %7208 = vmatprep.subr.bf16.mxu1 %v8101_v31 }
 0x5c7   :  { %v1819_v51 = vmul.f32 %v1803_v42, %v1803_v42  ;;  %7156 = vmatpush3.bf16.xpose.msk.msra.mxu0 %vm8203_vm6, %v7154_v44  ;;  %6393 = vmatprep.mubr.msk.f32.mxu1 %vm165_vm5, %v2058_v49  ;;  %v5278_v44 = vld [vmem:[%s9713_s0 + $0x218] sm:$0xff] }
 0x5c8   :  { %6394 = vmatmul.mubr.msk.f32.gmra.mrb[110].mxu1 %vm165_vm5, %v2059_v47  ;;  %7157 = vmatprep.subr.bf16.mxu0 %v7834_v24 }
 0x5c9   :  { %v7170_v40 = vpack.c.bf16 %v1820_v48, %v1819_v51  ;;  %7210 = vmatpush3.bf16.msra.mxu1 %v8101_v31  ;;  %2611 = vrot.lane.b32.xlu1 %v5278_v44, %s7832_s25 }
 0x5ca   :  { %7245 = vmatprep.subr.msk.bf16.mxu1 %vm7893_vm2, %v7906_v9  ;;  %2617 = vrot.lane.b32.xlu0 %v5281_v57, %s7832_s25 }
 0x5cd   :  { %2615 = vrot.lane.b32.xlu1 %v5280_v50, %s7832_s25 }
 0x5ce   :  { %2621 = vrot.lane.b32.xlu0 %v5283_v60, %s7832_s25 }
 0x5cf   :  { %7160 = vmatpush3.bf16.xpose.msk.msra.mxu0 %vm8203_vm6, %v7158_v0  ;;  %v5287_v0 = vld [vmem:[%s9713_s0 + $0x260] sm:$0xff] }
 0x5d0   :  { %7161 = vmatprep.subr.bf16.mxu0 %v7834_v24 }
 0x5d1   :  { %2619 = vrot.lane.b32.xlu1 %v5282_v56, %s7832_s25 }
 0x5d2   :  { %2625 = vrot.lane.b32.xlu0 %v5285_v61, %s7832_s25 }
 0x5d5   :  { %2623 = vrot.lane.b32.xlu1 %v5284_v59, %s7832_s25 }
 0x5d6   :  { %2629 = vrot.lane.b32.xlu0 %v5287_v0, %s7832_s25 }
 0x5d7   :  { %7164 = vmatpush3.bf16.xpose.msk.msra.mxu0 %vm8203_vm6, %v7162_v34 }
 0x5d8   :  { %7165 = vmatprep.subr.bf16.mxu0 %v7834_v24 }
 0x5d9   :  { %2627 = vrot.lane.b32.xlu1 %v5286_v62, %s7832_s25 }
 0x5da   :  { %2633 = vrot.lane.b32.xlu0 %v5289_v3, %s7832_s25 }
 0x5dd   :  { %2631 = vrot.lane.b32.xlu1 %v5288_v1, %s7832_s25 }
 0x5df   :  { %7168 = vmatpush3.bf16.xpose.msk.msra.mxu0 %vm8203_vm6, %v7166_v41 }
 0x5e0   :  { %7169 = vmatprep.subr.bf16.mxu0 %v7834_v24 }
 0x5e1   :  { %2635 = vrot.lane.b32.xlu1 %v5290_v4, %s7832_s25 }
 0x5e7   :  { %7172 = vmatpush3.bf16.xpose.msk.msra.mxu0 %vm8203_vm6, %v7170_v40 }
 0x5e8   :  { %7211 = vmatprep.subr.bf16.mxu0 %v7834_v24 }
 0x5ee   :  { %6366 = vmatmul.mubr.msk.f32.vlgmr.msra.gmra.mrb[4].mxu0 %vm131_vm3, %v7837_v53 }
 0x5ef   :  { %6484 = vmatprep.mubr.msk.f32.mxu0 %vm7835_vm7, %v7836_v52 }
 0x62c   :  { %v2608_v39 = vpop.permute.xlu1 %2607 }
 0x62d   :  { %v2606_v32 = vpop.permute.xlu0 %2605 }
 0x633   :  { %v2610_v44 = vpop.permute.xlu0 %2609 }
 0x637   :  { %v2614_v50 = vpop.permute.xlu0 %2613 }
 0x63b   :  { %v2612_v46 = vpop.permute.xlu1 %2611 }
 0x63f   :  { %v2616_v56 = vpop.permute.xlu1 %2615 }
 0x67f   :  { %v6374_v7 = vpop.f32.mrb[96].mxu1 }
 0x680   :  { %v2174_v6 = vpop.f32.mrb[97].mxu1 }
 0x681   :  { %7626 = vtanh.f32 %v2174_v6 }
 0x682   :  { %7628 = vtanh.f32 %v6374_v7 }
 0x683   :  { %v6377_v10 = vpop.f32.mrb[98].mxu1 }
 0x684   :  { %v2184_v11 = vpop.f32.mrb[99].mxu1 }
 0x685   :  { %7630 = vtanh.f32 %v2184_v11  ;;  %v2618_v11 = vpop.permute.xlu0 %2617 }
 0x686   :  { %7632 = vtanh.f32 %v6377_v10 }
 0x687   :  { %v6380_v12 = vpop.f32.mrb[100].mxu1 }
 0x688   :  { %v2194_v14 = vpop.f32.mrb[101].mxu1 }
 0x689   :  { %7634 = vtanh.f32 %v2194_v14 }
 0x68a   :  { %7636 = vtanh.f32 %v6380_v12 }
 0x68b   :  { %v7627_v15 = vpop.eup %7626  ;;  %v6383_v30 = vpop.f32.mrb[102].mxu1 }
 0x68c   :  { %v7629_v16 = vpop.eup %7628  ;;  %v2204_v34 = vpop.f32.mrb[103].mxu1  ;;  %6428 = vmatprep.mubr.f32.mxu1 %v7627_v15 }
 0x68d   :  { %7638 = vtanh.f32 %v2204_v34  ;;  %6429 = vmatmul.mubr.f32.vlgmr.msra.gmra.mrb[112].mxu1 %v7629_v16 }
 0x68e   :  { %7640 = vtanh.f32 %v6383_v30  ;;  %7248 = vmatpush3.bf16.msk.msra.mxu1 %vm7893_vm2, %v7906_v9  ;;  %v2620_v30 = vpop.permute.xlu1 %2619 }
 0x68f   :  { %v7631_v2 = vpop.eup %7630  ;;  %v6386_v8 = vpop.f32.mrb[104].mxu1  ;;  %7250 = vmatprep.subr.bf16.mxu1 %v7952_v20 }
 0x690   :  { %v7633_v13 = vpop.eup %7632  ;;  %7642 = vtanh.f32 %v6386_v8  ;;  %v2214_v17 = vpop.f32.mrb[105].mxu1  ;;  %6431 = vmatprep.mubr.f32.mxu1 %v7631_v2 }
 0x691   :  { %7644 = vtanh.f32 %v2214_v17  ;;  %6432 = vmatmul.mubr.f32.gmra.mrb[114].mxu1 %v7633_v13 }
 0x693   :  { %v7635_v21 = vpop.eup %7634  ;;  %v6389_v18 = vpop.f32.mrb[106].mxu1 }
 0x694   :  { %v7637_v22 = vpop.eup %7636  ;;  %7646 = vtanh.f32 %v6389_v18  ;;  %v2224_v25 = vpop.f32.mrb[107].mxu1  ;;  %6434 = vmatprep.mubr.f32.mxu1 %v7635_v21 }
 0x695   :  { %7648 = vtanh.f32 %v2224_v25  ;;  %6435 = vmatmul.mubr.f32.gmra.mrb[116].mxu1 %v7637_v22 }
 0x697   :  { %v7639_v27 = vpop.eup %7638  ;;  %v6392_v29 = vpop.f32.mrb[108].mxu1 }
 0x698   :  { %v7641_v33 = vpop.eup %7640  ;;  %7650 = vtanh.f32 %v6392_v29  ;;  %v2234_v35 = vpop.f32.mrb[109].mxu1  ;;  %6437 = vmatprep.mubr.f32.mxu1 %v7639_v27 }
 0x699   :  { %7652 = vtanh.f32 %v2234_v35  ;;  %6438 = vmatmul.mubr.f32.gmra.mrb[118].mxu1 %v7641_v33  ;;  %v2624_v35 = vpop.permute.xlu1 %2623 }
 0x69a   :  { %v7643_v38 = vpop.eup %7642 }
 0x69b   :  { %v7645_v37 = vpop.eup %7644  ;;  %v6395_v41 = vpop.f32.mrb[110].mxu1 }
 0x69c   :  { %7654 = vtanh.f32 %v6395_v41  ;;  %v2244_v42 = vpop.f32.mrb[111].mxu1  ;;  %6440 = vmatprep.mubr.f32.mxu1 %v7645_v37  ;;  %v2622_v41 = vpop.permute.xlu0 %2621 }
 0x69d   :  { %7656 = vtanh.f32 %v2244_v42  ;;  %6441 = vmatmul.mubr.f32.gmra.mrb[120].mxu1 %v7643_v38 }
 0x69e   :  { %v7647_v43 = vpop.eup %7646 }
 0x69f   :  { %v7649_v47 = vpop.eup %7648 }
 0x6a0   :  { %6443 = vmatprep.mubr.f32.mxu1 %v7649_v47 }
 0x6a1   :  { %6444 = vmatmul.mubr.f32.gmra.mrb[122].mxu1 %v7647_v43 }
 0x6a2   :  { %v7651_v48 = vpop.eup %7650 }
 0x6a3   :  { %v7653_v49 = vpop.eup %7652 }
 0x6a4   :  { %6446 = vmatprep.mubr.f32.mxu1 %v7653_v49 }
 0x6a5   :  { %6447 = vmatmul.mubr.f32.gmra.mrb[124].mxu1 %v7651_v48 }
 0x6a6   :  { %v7655_v51 = vpop.eup %7654 }
 0x6a7   :  { %v7657_v40 = vpop.eup %7656 }
 0x6a8   :  { %6449 = vmatprep.mubr.f32.mxu1 %v7657_v40 }
 0x6a9   :  { %6450 = vmatmul.mubr.f32.gmra.mrb[126].mxu1 %v7655_v51 }
 0x760   :  { %v6430_v55 = vpop.f32.mrb[112].mxu1 }
 0x761   :  { %v2341_v57 = vadd.f32 %v8622_v19, %v6430_v55  ;;  %v2335_v60 = vpop.f32.mrb[113].mxu1 }
 0x762   :  { %v2336_v59 = vadd.f32 %v8622_v19, %v2335_v60 }
 0x763   :  { %v2415_v61 = vsub.f32 %v2341_v57, %v8629_v23  ;;  %v2654_v62 = vsel %vm131_vm3, %v2341_v57, %v2608_v39 }
 0x764   :  { %v2414_v0 = vsub.f32 %v2336_v59, %v8629_v23  ;;  %v2653_v1 = vsel %vm131_vm3, %v2336_v59, %v2606_v32  ;;  %v6433_v3 = vpop.f32.mrb[114].mxu1  ;;  %v2670_v14 = vsel %vm148_vm4, %v2654_v62, 1.0 }
 0x765   :  { %v2431_v4 = vmul.f32 %v2415_v61, %v2415_v61  ;;  %v2669_v7 = vsel %vm148_vm4, %v2653_v1, 1.0  ;;  %v2351_v6 = vadd.f32 %v8622_v19, %v6433_v3  ;;  %v2345_v10 = vpop.f32.mrb[115].mxu1  ;;  %v2628_v61 = vpop.permute.xlu1 %2627 }
 0x766   :  { %v2430_v12 = vmul.f32 %v2414_v0, %v2414_v0  ;;  %v2346_v15 = vadd.f32 %v8622_v19, %v2345_v10  ;;  %6491 = vmatprep.mubr.msk.f32.mxu1 %vm165_vm5, %v2669_v7 }
 0x767   :  { %v2417_v16 = vsub.f32 %v2351_v6, %v8629_v23  ;;  %v2656_v34 = vsel %vm131_vm3, %v2351_v6, %v2612_v46  ;;  %6492 = vmatmul.mubr.msk.f32.vlgmr.msra.gmra.mrb[128].mxu1 %vm165_vm5, %v2670_v14 }
 0x768   :  { %v7212_v2 = vpack.c.bf16 %v2431_v4, %v2430_v12  ;;  %v2416_v8 = vsub.f32 %v2346_v15, %v8629_v23  ;;  %v2655_v13 = vsel %vm131_vm3, %v2346_v15, %v2610_v44  ;;  %v6436_v17 = vpop.f32.mrb[116].mxu1  ;;  %7252 = vmatpush3.bf16.msra.mxu1 %v7952_v20  ;;  %v2672_v29 = vsel %vm148_vm4, %v2656_v34, 1.0  ;;  %v2626_v4 = vpop.permute.xlu0 %2625 }
 0x769   :  { %v2433_v21 = vmul.f32 %v2417_v16, %v2417_v16  ;;  %v2671_v18 = vsel %vm148_vm4, %v2655_v13, 1.0  ;;  %v2361_v22 = vadd.f32 %v8622_v19, %v6436_v17  ;;  %v2355_v25 = vpop.f32.mrb[117].mxu1  ;;  %7254 = vmatprep.subr.bf16.mxu1 %v7987_v36 }
 0x76a   :  { %v2432_v27 = vmul.f32 %v2416_v8, %v2416_v8  ;;  %v2356_v33 = vadd.f32 %v8622_v19, %v2355_v25  ;;  %7214 = vmatpush3.bf16.xpose.msk.msra.mxu0 %vm8203_vm6, %v7212_v2  ;;  %6494 = vmatprep.mubr.msk.f32.mxu1 %vm165_vm5, %v2671_v18 }
 0x76b   :  { %v2419_v38 = vsub.f32 %v2361_v22, %v8629_v23  ;;  %v2658_v37 = vsel %vm131_vm3, %v2361_v22, %v2616_v56  ;;  %6495 = vmatmul.mubr.msk.f32.gmra.mrb[130].mxu1 %vm165_vm5, %v2672_v29  ;;  %7215 = vmatprep.subr.bf16.mxu0 %v7834_v24  ;;  %v2632_v22 = vpop.permute.xlu1 %2631 }
 0x76c   :  { %v7216_v42 = vpack.c.bf16 %v2433_v21, %v2432_v27  ;;  %v2418_v43 = vsub.f32 %v2356_v33, %v8629_v23  ;;  %v2657_v47 = vsel %vm131_vm3, %v2356_v33, %v2614_v50  ;;  %v6439_v48 = vpop.f32.mrb[118].mxu1  ;;  %7256 = vmatpush3.bf16.msra.mxu1 %v7987_v36  ;;  %v2674_v44 = vsel %vm148_vm4, %v2658_v37, 1.0  ;;  %v2630_v29 = vpop.permute.xlu0 %2629 }
 0x76d   :  { %v8873_v49 = vmul.f32 %v2419_v38, %v2419_v38  ;;  %v2673_v51 = vsel %vm148_vm4, %v2657_v47, 1.0  ;;  %v2371_v40 = vadd.f32 %v8622_v19, %v6439_v48  ;;  %v2365_v32 = vpop.f32.mrb[119].mxu1  ;;  %7258 = vmatprep.subr.bf16.mxu1 %v8005_v45 }
 0x76e   :  { %v2434_v39 = vmul.f32 %v2418_v43, %v2418_v43  ;;  %v2366_v46 = vadd.f32 %v8622_v19, %v2365_v32  ;;  %6497 = vmatprep.mubr.msk.f32.mxu1 %vm165_vm5, %v2673_v51 }
 0x76f   :  { %v2421_v50 = vsub.f32 %v2371_v40, %v8629_v23  ;;  %v2660_v55 = vsel %vm131_vm3, %v2371_v40, %v2620_v30  ;;  %6498 = vmatmul.mubr.msk.f32.gmra.mrb[132].mxu1 %vm165_vm5, %v2674_v44 }
 0x770   :  { %v7220_v56 = vpack.c.bf16 %v8873_v49, %v2434_v39  ;;  %v2420_v57 = vsub.f32 %v2366_v46, %v8629_v23  ;;  %v2659_v60 = vsel %vm131_vm3, %v2366_v46, %v2618_v11  ;;  %v6442_v59 = vpop.f32.mrb[120].mxu1  ;;  %7260 = vmatpush3.bf16.msra.mxu1 %v8005_v45  ;;  %v2676_v6 = vsel %vm148_vm4, %v2660_v55, 1.0 }
 0x771   :  { %v8888_v62 = vmul.f32 %v2421_v50, %v2421_v50  ;;  %v2675_v0 = vsel %vm148_vm4, %v2659_v60, 1.0  ;;  %v2381_v1 = vadd.f32 %v8622_v19, %v6442_v59  ;;  %v2375_v3 = vpop.f32.mrb[121].mxu1  ;;  %7262 = vmatprep.subr.bf16.mxu1 %v8023_v54 }
 0x772   :  { %v8893_v7 = vmul.f32 %v2420_v57, %v2420_v57  ;;  %v2376_v10 = vadd.f32 %v8622_v19, %v2375_v3  ;;  %7218 = vmatpush3.bf16.xpose.msk.msra.mxu0 %vm8203_vm6, %v7216_v42  ;;  %6500 = vmatprep.mubr.msk.f32.mxu1 %vm165_vm5, %v2675_v0  ;;  %v2636_v57 = vpop.permute.xlu1 %2635  ;;  %v2634_v0 = vpop.permute.xlu0 %2633 }
 0x773   :  { %v2423_v11 = vsub.f32 %v2381_v1, %v8629_v23  ;;  %6501 = vmatmul.mubr.msk.f32.gmra.mrb[134].mxu1 %vm165_vm5, %v2676_v6  ;;  %v2662_v12 = vsel %vm131_vm3, %v2381_v1, %v2624_v35  ;;  %7219 = vmatprep.subr.bf16.mxu0 %v7834_v24 }
 0x774   :  { %v7224_v14 = vpack.c.bf16 %v8888_v62, %v8893_v7  ;;  %v2422_v15 = vsub.f32 %v2376_v10, %v8629_v23  ;;  %v2661_v30 = vsel %vm131_vm3, %v2376_v10, %v2622_v41  ;;  %v2678_v16 = vsel %vm148_vm4, %v2662_v12, 1.0  ;;  %v6445_v34 = vpop.f32.mrb[122].mxu1  ;;  %7264 = vmatpush3.bf16.msra.mxu1 %v8023_v54  ;;  %v5326_v62 = vld [vmem:[%s9713_s0 + $0x288] sm:$0xff]  ;;  %v5325_v7 = vld [vmem:[%s9713_s0 + $0x280] sm:$0xff] }
 0x775   :  { %v8910_v2 = vmul.f32 %v2423_v11, %v2423_v11  ;;  %v2677_v8 = vsel %vm148_vm4, %v2661_v30, 1.0  ;;  %v2391_v13 = vadd.f32 %v8622_v19, %v6445_v34  ;;  %v2385_v17 = vpop.f32.mrb[123].mxu1  ;;  %7266 = vmatprep.subr.bf16.mxu1 %v8041_v63  ;;  %3232 = vrot.lane.b32.xlu1 %v5326_v62, %s7832_s25  ;;  %v5327_v34 = vld [vmem:[%s9713_s0 + $0x290] sm:$0xff] }
 0x776   :  { %v8915_v21 = vmul.f32 %v2422_v15, %v2422_v15  ;;  %v2386_v18 = vadd.f32 %v8622_v19, %v2385_v17  ;;  %6503 = vmatprep.mubr.msk.f32.mxu1 %vm165_vm5, %v2677_v8  ;;  %3230 = vrot.lane.b32.xlu0 %v5325_v7, %s7832_s25  ;;  %v5329_v8 = vld [vmem:[%s9713_s0 + $0x2a0] sm:$0xff]  ;;  %v5331_v17 = vld [vmem:[%s9713_s0 + $0x2b0] sm:$0xff] }
 0x777   :  { %v2425_v25 = vsub.f32 %v2391_v13, %v8629_v23  ;;  %6504 = vmatmul.mubr.msk.f32.gmra.mrb[136].mxu1 %vm165_vm5, %v2678_v16  ;;  %v2664_v27 = vsel %vm131_vm3, %v2391_v13, %v2628_v61  ;;  %v5332_v13 = vld [vmem:[%s9713_s0 + $0x2b8] sm:$0xff] }
 0x778   :  { %v7228_v33 = vpack.c.bf16 %v8910_v2, %v8915_v21  ;;  %v2424_v35 = vsub.f32 %v2386_v18, %v8629_v23  ;;  %v2663_v38 = vsel %vm131_vm3, %v2386_v18, %v2626_v4  ;;  %v2680_v37 = vsel %vm148_vm4, %v2664_v27, 1.0  ;;  %v6448_v41 = vpop.f32.mrb[124].mxu1  ;;  %7268 = vmatpush3.bf16.msra.mxu1 %v8041_v63  ;;  %v5330_v2 = vld [vmem:[%s9713_s0 + $0x2a8] sm:$0xff]  ;;  %v5333_v18 = vld [vmem:[%s9713_s0 + $0x2c0] sm:$0xff] }
 0x779   :  { %v2441_v42 = vmul.f32 %v2425_v25, %v2425_v25  ;;  %v2679_v43 = vsel %vm148_vm4, %v2663_v38, 1.0  ;;  %v2401_v47 = vadd.f32 %v8622_v19, %v6448_v41  ;;  %v2395_v48 = vpop.f32.mrb[125].mxu1  ;;  %7270 = vmatprep.subr.bf16.mxu1 %v8081_v26  ;;  %v5334_v21 = vld [vmem:[%s9713_s0 + $0x2c8] sm:$0xff]  ;;  %v5336_v25 = vld [vmem:[%s9713_s0 + $0x2d8] sm:$0xff]  ;;  %v5337_v27 = vld [vmem:[%s9713_s0 + $0x2e0] sm:$0xff] }
 0x77a   :  { %v2440_v49 = vmul.f32 %v2424_v35, %v2424_v35  ;;  %v2396_v51 = vadd.f32 %v8622_v19, %v2395_v48  ;;  %7222 = vmatpush3.bf16.xpose.msk.msra.mxu0 %vm8203_vm6, %v7220_v56  ;;  %6506 = vmatprep.mubr.msk.f32.mxu1 %vm165_vm5, %v2679_v43  ;;  %v5340_v35 = vld [vmem:[%s9713_s0 + $0x2f8] sm:$0xff] }
 0x77b   :  { %v2427_v40 = vsub.f32 %v2401_v47, %v8629_v23  ;;  %6507 = vmatmul.mubr.msk.f32.gmra.mrb[138].mxu1 %vm165_vm5, %v2680_v37  ;;  %v2666_v32 = vsel %vm131_vm3, %v2401_v47, %v2632_v22  ;;  %7223 = vmatprep.subr.bf16.mxu0 %v7834_v24  ;;  %v5335_v22 = vld [vmem:[%s9713_s0 + $0x2d0] sm:$0xff] }
 0x77c   :  { %v7232_v39 = vpack.c.bf16 %v2441_v42, %v2440_v49  ;;  %v2426_v44 = vsub.f32 %v2396_v51, %v8629_v23  ;;  %v2665_v46 = vsel %vm131_vm3, %v2396_v51, %v2630_v29  ;;  %v2682_v50 = vsel %vm148_vm4, %v2666_v32, 1.0  ;;  %v6451_v55 = vpop.f32.mrb[126].mxu1  ;;  %7272 = vmatpush3.bf16.msra.mxu1 %v8081_v26  ;;  %3234 = vrot.lane.b32.xlu0 %v5327_v34, %s7832_s25  ;;  %v5338_v29 = vld [vmem:[%s9713_s0 + $0x2e8] sm:$0xff] }
 0x77d   :  { %v2443_v56 = vmul.f32 %v2427_v40, %v2427_v40  ;;  %v2681_v60 = vsel %vm148_vm4, %v2665_v46, 1.0  ;;  %v2411_v59 = vadd.f32 %v8622_v19, %v6451_v55  ;;  %v2405_v61 = vpop.f32.mrb[127].mxu1  ;;  %7274 = vmatprep.subr.bf16.mxu1 %v8091_v28 }
 0x77e   :  { %v2442_v1 = vmul.f32 %v2426_v44, %v2426_v44  ;;  %v2406_v3 = vadd.f32 %v8622_v19, %v2405_v61  ;;  %6509 = vmatprep.mubr.msk.f32.mxu1 %vm165_vm5, %v2681_v60 }
 0x77f   :  { %v2429_v4 = vsub.f32 %v2411_v59, %v8629_v23  ;;  %6510 = vmatmul.mubr.msk.f32.gmra.mrb[140].mxu1 %vm165_vm5, %v2682_v50  ;;  %v2668_v6 = vsel %vm131_vm3, %v2411_v59, %v2636_v57 }
 0x780   :  { %v7236_v10 = vpack.c.bf16 %v2443_v56, %v2442_v1  ;;  %v2428_v11 = vsub.f32 %v2406_v3, %v8629_v23  ;;  %v2667_v12 = vsel %vm131_vm3, %v2406_v3, %v2634_v0  ;;  %v2684_v15 = vsel %vm148_vm4, %v2668_v6, 1.0  ;;  %7276 = vmatpush3.bf16.msra.mxu1 %v8091_v28  ;;  %3238 = vrot.lane.b32.xlu0 %v5329_v8, %s7832_s25  ;;  %v9056_v8 = vld [vmem:[%s9717_s4] ss:$0 sm:$0xff] }
 0x781   :  { %v2445_v30 = vmul.f32 %v2429_v4, %v2429_v4  ;;  %v2683_v19 = vsel %vm148_vm4, %v2667_v12, 1.0  ;;  %7278 = vmatprep.subr.bf16.mxu1 %v8101_v31 }
 0x782   :  { %v2444_v16 = vmul.f32 %v2428_v11, %v2428_v11  ;;  %7226 = vmatpush3.bf16.xpose.msk.msra.mxu0 %vm8203_vm6, %v7224_v14  ;;  %6512 = vmatprep.mubr.msk.f32.mxu1 %vm165_vm5, %v2683_v19  ;;  %v5328_v14 = vld [vmem:[%s9713_s0 + $0x298] sm:$0xff] }
 0x783   :  { %6513 = vmatmul.mubr.msk.f32.gmra.mrb[142].mxu1 %vm165_vm5, %v2684_v15  ;;  %7227 = vmatprep.subr.bf16.mxu0 %v7834_v24 }
 0x784   :  { %v7240_v23 = vpack.c.bf16 %v2445_v30, %v2444_v16  ;;  %7280 = vmatpush3.bf16.msra.mxu1 %v8101_v31  ;;  %3236 = vrot.lane.b32.xlu1 %v5328_v14, %s7832_s25 }
 0x785   :  { %7315 = vmatprep.subr.msk.bf16.mxu1 %vm7893_vm2, %v7906_v9  ;;  %3242 = vrot.lane.b32.xlu0 %v5331_v17, %s7832_s25 }
 0x788   :  { %3240 = vrot.lane.b32.xlu1 %v5330_v2, %s7832_s25 }
 0x789   :  { %3246 = vrot.lane.b32.xlu0 %v5333_v18, %s7832_s25  ;;  %v9063_v18 = vld [vmem:[%s9718_s5] ss:$0 sm:$0xff] }
 0x78a   :  { %7230 = vmatpush3.bf16.xpose.msk.msra.mxu0 %vm8203_vm6, %v7228_v33  ;;  %v5339_v33 = vld [vmem:[%s9713_s0 + $0x2f0] sm:$0xff] }
 0x78b   :  { %7231 = vmatprep.subr.bf16.mxu0 %v7834_v24 }
 0x78c   :  { %3244 = vrot.lane.b32.xlu1 %v5332_v13, %s7832_s25 }
 0x78d   :  { %3250 = vrot.lane.b32.xlu0 %v5335_v22, %s7832_s25 }
 0x790   :  { %3248 = vrot.lane.b32.xlu1 %v5334_v21, %s7832_s25 }
 0x791   :  { %3254 = vrot.lane.b32.xlu0 %v5337_v27, %s7832_s25 }
 0x792   :  { %7234 = vmatpush3.bf16.xpose.msk.msra.mxu0 %vm8203_vm6, %v7232_v39 }
 0x793   :  { %7235 = vmatprep.subr.bf16.mxu0 %v7834_v24 }
 0x794   :  { %3252 = vrot.lane.b32.xlu1 %v5336_v25, %s7832_s25 }
 0x795   :  { %3258 = vrot.lane.b32.xlu0 %v5339_v33, %s7832_s25 }
 0x798   :  { %3256 = vrot.lane.b32.xlu1 %v5338_v29, %s7832_s25 }
 0x79a   :  { %7238 = vmatpush3.bf16.xpose.msk.msra.mxu0 %vm8203_vm6, %v7236_v10 }
 0x79b   :  { %7239 = vmatprep.subr.bf16.mxu0 %v7834_v24 }
 0x79c   :  { %3260 = vrot.lane.b32.xlu1 %v5340_v35, %s7832_s25 }
 0x7a2   :  { %7242 = vmatpush3.bf16.xpose.msk.msra.mxu0 %vm8203_vm6, %v7240_v23 }
 0x7a3   :  { %7281 = vmatprep.subr.bf16.mxu0 %v7834_v24 }
 0x7a9   :  { %6485 = vmatmul.mubr.msk.f32.vlgmr.msra.gmra.mrb[6].mxu0 %vm131_vm3, %v7837_v53 }
 0x7aa   :  { %6603 = vmatprep.mubr.msk.f32.mxu0 %vm7835_vm7, %v7836_v52 }
 0x7e7   :  { %v3233_v23 = vpop.permute.xlu1 %3232 }
 0x7e8   :  { %v3231_v16 = vpop.permute.xlu0 %3230 }
 0x7ee   :  { %v3235_v62 = vpop.permute.xlu0 %3234 }
 0x7f2   :  { %v3239_v14 = vpop.permute.xlu0 %3238 }
 0x7f6   :  { %v3237_v7 = vpop.permute.xlu1 %3236 }
 0x7fa   :  { %v3241_v2 = vpop.permute.xlu1 %3240 }
 0x83a   :  { %v6493_v38 = vpop.f32.mrb[128].mxu1 }
 0x83b   :  { %v2799_v37 = vpop.f32.mrb[129].mxu1 }
 0x83c   :  { %7658 = vtanh.f32 %v2799_v37 }
 0x83d   :  { %7660 = vtanh.f32 %v6493_v38 }
 0x83e   :  { %v6496_v41 = vpop.f32.mrb[130].mxu1 }
 0x83f   :  { %v2809_v42 = vpop.f32.mrb[131].mxu1 }
 0x840   :  { %7662 = vtanh.f32 %v2809_v42  ;;  %v3243_v42 = vpop.permute.xlu0 %3242 }
 0x841   :  { %7664 = vtanh.f32 %v6496_v41 }
 0x842   :  { %v6499_v43 = vpop.f32.mrb[132].mxu1 }
 0x843   :  { %v2819_v47 = vpop.f32.mrb[133].mxu1 }
 0x844   :  { %7666 = vtanh.f32 %v2819_v47 }
 0x845   :  { %7668 = vtanh.f32 %v6499_v43 }
 0x846   :  { %v7659_v48 = vpop.eup %7658  ;;  %v6502_v49 = vpop.f32.mrb[134].mxu1 }
 0x847   :  { %v7661_v51 = vpop.eup %7660  ;;  %v2829_v40 = vpop.f32.mrb[135].mxu1  ;;  %6547 = vmatprep.mubr.f32.mxu1 %v7659_v48 }
 0x848   :  { %7670 = vtanh.f32 %v2829_v40  ;;  %6548 = vmatmul.mubr.f32.vlgmr.msra.gmra.mrb[144].mxu1 %v7661_v51 }
 0x849   :  { %7672 = vtanh.f32 %v6502_v49  ;;  %7318 = vmatpush3.bf16.msk.msra.mxu1 %vm7893_vm2, %v7906_v9  ;;  %v3245_v49 = vpop.permute.xlu1 %3244 }
 0x84a   :  { %v7663_v32 = vpop.eup %7662  ;;  %v6505_v39 = vpop.f32.mrb[136].mxu1  ;;  %7320 = vmatprep.subr.bf16.mxu1 %v7952_v20 }
 0x84b   :  { %v7665_v44 = vpop.eup %7664  ;;  %v2839_v46 = vpop.f32.mrb[137].mxu1  ;;  %6550 = vmatprep.mubr.f32.mxu1 %v7663_v32 }
 0x84c   :  { %7674 = vtanh.f32 %v2839_v46  ;;  %6551 = vmatmul.mubr.f32.gmra.mrb[146].mxu1 %v7665_v44 }
 0x84d   :  { %7676 = vtanh.f32 %v6505_v39 }
 0x84e   :  { %v7667_v50 = vpop.eup %7666  ;;  %v6508_v55 = vpop.f32.mrb[138].mxu1 }
 0x84f   :  { %v7669_v57 = vpop.eup %7668  ;;  %7678 = vtanh.f32 %v6508_v55  ;;  %v2849_v56 = vpop.f32.mrb[139].mxu1  ;;  %6553 = vmatprep.mubr.f32.mxu1 %v7667_v50 }
 0x850   :  { %7680 = vtanh.f32 %v2849_v56  ;;  %6554 = vmatmul.mubr.f32.gmra.mrb[148].mxu1 %v7669_v57 }
 0x852   :  { %v7671_v60 = vpop.eup %7670  ;;  %v6511_v59 = vpop.f32.mrb[140].mxu1 }
 0x853   :  { %v7673_v61 = vpop.eup %7672  ;;  %7682 = vtanh.f32 %v6511_v59  ;;  %v2859_v0 = vpop.f32.mrb[141].mxu1  ;;  %6556 = vmatprep.mubr.f32.mxu1 %v7671_v60 }
 0x854   :  { %7684 = vtanh.f32 %v2859_v0  ;;  %6557 = vmatmul.mubr.f32.gmra.mrb[150].mxu1 %v7673_v61 }
 0x856   :  { %v7675_v1 = vpop.eup %7674  ;;  %v6514_v3 = vpop.f32.mrb[142].mxu1 }
 0x857   :  { %v7677_v4 = vpop.eup %7676  ;;  %7686 = vtanh.f32 %v6514_v3  ;;  %v2869_v6 = vpop.f32.mrb[143].mxu1  ;;  %6559 = vmatprep.mubr.f32.mxu1 %v7675_v1 }
 0x858   :  { %7688 = vtanh.f32 %v2869_v6  ;;  %6560 = vmatmul.mubr.f32.gmra.mrb[152].mxu1 %v7677_v4  ;;  %v3247_v3 = vpop.permute.xlu0 %3246 }
 0x859   :  { %v7679_v10 = vpop.eup %7678 }
 0x85a   :  { %v7681_v11 = vpop.eup %7680 }
 0x85b   :  { %6562 = vmatprep.mubr.f32.mxu1 %v7681_v11 }
 0x85c   :  { %6563 = vmatmul.mubr.f32.gmra.mrb[154].mxu1 %v7679_v10 }
 0x85d   :  { %v7683_v12 = vpop.eup %7682 }
 0x85e   :  { %v7685_v15 = vpop.eup %7684 }
 0x85f   :  { %6565 = vmatprep.mubr.f32.mxu1 %v7685_v15 }
 0x860   :  { %6566 = vmatmul.mubr.f32.gmra.mrb[156].mxu1 %v7683_v12  ;;  %v3249_v12 = vpop.permute.xlu1 %3248 }
 0x861   :  { %v7687_v30 = vpop.eup %7686 }
 0x862   :  { %v7689_v19 = vpop.eup %7688 }
 0x863   :  { %6568 = vmatprep.mubr.f32.mxu1 %v7689_v19 }
 0x864   :  { %6569 = vmatmul.mubr.f32.gmra.mrb[158].mxu1 %v7687_v30 }
 0x91b   :  { %v6549_v34 = vpop.f32.mrb[144].mxu1 }
 0x91c   :  { %v2966_v13 = vadd.f32 %v9056_v8, %v6549_v34  ;;  %v2960_v17 = vpop.f32.mrb[145].mxu1 }
 0x91d   :  { %v2961_v21 = vadd.f32 %v9056_v8, %v2960_v17 }
 0x91e   :  { %v3040_v22 = vsub.f32 %v2966_v13, %v9063_v18  ;;  %v3279_v25 = vsel %vm131_vm3, %v2966_v13, %v3233_v23 }
 0x91f   :  { %v3039_v27 = vsub.f32 %v2961_v21, %v9063_v18  ;;  %v3278_v29 = vsel %vm131_vm3, %v2961_v21, %v3231_v16  ;;  %v6552_v33 = vpop.f32.mrb[146].mxu1  ;;  %v3295_v47 = vsel %vm148_vm4, %v3279_v25, 1.0 }
 0x920   :  { %v3056_v35 = vmul.f32 %v3040_v22, %v3040_v22  ;;  %v3294_v38 = vsel %vm148_vm4, %v3278_v29, 1.0  ;;  %v2976_v37 = vadd.f32 %v9056_v8, %v6552_v33  ;;  %v2970_v41 = vpop.f32.mrb[147].mxu1  ;;  %v3253_v22 = vpop.permute.xlu1 %3252 }
 0x921   :  { %v3055_v43 = vmul.f32 %v3039_v27, %v3039_v27  ;;  %v2971_v48 = vadd.f32 %v9056_v8, %v2970_v41  ;;  %6610 = vmatprep.mubr.msk.f32.mxu1 %vm165_vm5, %v3294_v38 }
 0x922   :  { %v3042_v51 = vsub.f32 %v2976_v37, %v9063_v18  ;;  %v3281_v40 = vsel %vm131_vm3, %v2976_v37, %v3237_v7  ;;  %6611 = vmatmul.mubr.msk.f32.vlgmr.msra.gmra.mrb[160].mxu1 %vm165_vm5, %v3295_v47 }
 0x923   :  { %v7282_v32 = vpack.c.bf16 %v3056_v35, %v3055_v43  ;;  %v3041_v39 = vsub.f32 %v2971_v48, %v9063_v18  ;;  %v3280_v44 = vsel %vm131_vm3, %v2971_v48, %v3235_v62  ;;  %v6555_v46 = vpop.f32.mrb[148].mxu1  ;;  %7322 = vmatpush3.bf16.msra.mxu1 %v7952_v20  ;;  %v3297_v59 = vsel %vm148_vm4, %v3281_v40, 1.0  ;;  %v3251_v35 = vpop.permute.xlu0 %3250 }
 0x924   :  { %v3058_v50 = vmul.f32 %v3042_v51, %v3042_v51  ;;  %v3296_v55 = vsel %vm148_vm4, %v3280_v44, 1.0  ;;  %v2986_v57 = vadd.f32 %v9056_v8, %v6555_v46  ;;  %v2980_v56 = vpop.f32.mrb[149].mxu1  ;;  %7324 = vmatprep.subr.bf16.mxu1 %v7987_v36 }
 0x925   :  { %v3057_v60 = vmul.f32 %v3041_v39, %v3041_v39  ;;  %v2981_v61 = vadd.f32 %v9056_v8, %v2980_v56  ;;  %7284 = vmatpush3.bf16.xpose.msk.msra.mxu0 %vm8203_vm6, %v7282_v32  ;;  %6613 = vmatprep.mubr.msk.f32.mxu1 %vm165_vm5, %v3296_v55 }
 0x926   :  { %v3044_v0 = vsub.f32 %v2986_v57, %v9063_v18  ;;  %v3283_v1 = vsel %vm131_vm3, %v2986_v57, %v3241_v2  ;;  %6614 = vmatmul.mubr.msk.f32.gmra.mrb[162].mxu1 %vm165_vm5, %v3297_v59  ;;  %7285 = vmatprep.subr.bf16.mxu0 %v7834_v24  ;;  %v3257_v57 = vpop.permute.xlu1 %3256 }
 0x927   :  { %v7286_v4 = vpack.c.bf16 %v3058_v50, %v3057_v60  ;;  %v3043_v6 = vsub.f32 %v2981_v61, %v9063_v18  ;;  %v3282_v10 = vsel %vm131_vm3, %v2981_v61, %v3239_v14  ;;  %v6558_v11 = vpop.f32.mrb[150].mxu1  ;;  %7326 = vmatpush3.bf16.msra.mxu1 %v7987_v36  ;;  %v3299_v62 = vsel %vm148_vm4, %v3283_v1, 1.0  ;;  %v3255_v59 = vpop.permute.xlu0 %3254 }
 0x928   :  { %v9095_v15 = vmul.f32 %v3044_v0, %v3044_v0  ;;  %v3298_v30 = vsel %vm148_vm4, %v3282_v10, 1.0  ;;  %v2996_v19 = vadd.f32 %v9056_v8, %v6558_v11  ;;  %v2990_v16 = vpop.f32.mrb[151].mxu1  ;;  %7328 = vmatprep.subr.bf16.mxu1 %v8005_v45 }
 0x929   :  { %v3059_v23 = vmul.f32 %v3043_v6, %v3043_v6  ;;  %v2991_v7 = vadd.f32 %v9056_v8, %v2990_v16  ;;  %6616 = vmatprep.mubr.msk.f32.mxu1 %vm165_vm5, %v3298_v30 }
 0x92a   :  { %v3046_v14 = vsub.f32 %v2996_v19, %v9063_v18  ;;  %v3285_v34 = vsel %vm131_vm3, %v2996_v19, %v3245_v49  ;;  %6617 = vmatmul.mubr.msk.f32.gmra.mrb[164].mxu1 %vm165_vm5, %v3299_v62 }
 0x92b   :  { %v7290_v2 = vpack.c.bf16 %v9095_v15, %v3059_v23  ;;  %v3045_v13 = vsub.f32 %v2991_v7, %v9063_v18  ;;  %v3284_v17 = vsel %vm131_vm3, %v2991_v7, %v3243_v42  ;;  %v6561_v21 = vpop.f32.mrb[152].mxu1  ;;  %7330 = vmatpush3.bf16.msra.mxu1 %v8005_v45  ;;  %v3301_v37 = vsel %vm148_vm4, %v3285_v34, 1.0 }
 0x92c   :  { %v9110_v25 = vmul.f32 %v3046_v14, %v3046_v14  ;;  %v3300_v27 = vsel %vm148_vm4, %v3284_v17, 1.0  ;;  %v3006_v29 = vadd.f32 %v9056_v8, %v6561_v21  ;;  %v3000_v33 = vpop.f32.mrb[153].mxu1  ;;  %7332 = vmatprep.subr.bf16.mxu1 %v8023_v54 }
 0x92d   :  { %v9115_v38 = vmul.f32 %v3045_v13, %v3045_v13  ;;  %v3001_v41 = vadd.f32 %v9056_v8, %v3000_v33  ;;  %7288 = vmatpush3.bf16.xpose.msk.msra.mxu0 %vm8203_vm6, %v7286_v4  ;;  %6619 = vmatprep.mubr.msk.f32.mxu1 %vm165_vm5, %v3300_v27  ;;  %v3261_v13 = vpop.permute.xlu1 %3260  ;;  %v3259_v27 = vpop.permute.xlu0 %3258 }
 0x92e   :  { %v3048_v42 = vsub.f32 %v3006_v29, %v9063_v18  ;;  %v3287_v43 = vsel %vm131_vm3, %v3006_v29, %v3249_v12  ;;  %6620 = vmatmul.mubr.msk.f32.gmra.mrb[166].mxu1 %vm165_vm5, %v3301_v37  ;;  %7289 = vmatprep.subr.bf16.mxu0 %v7834_v24 }
 0x92f   :  { %v7294_v47 = vpack.c.bf16 %v9110_v25, %v9115_v38  ;;  %v3047_v48 = vsub.f32 %v3001_v41, %v9063_v18  ;;  %v3286_v49 = vsel %vm131_vm3, %v3001_v41, %v3247_v3  ;;  %v6564_v51 = vpop.f32.mrb[154].mxu1  ;;  %7334 = vmatpush3.bf16.msra.mxu1 %v8023_v54  ;;  %v3303_v50 = vsel %vm148_vm4, %v3287_v43, 1.0  ;;  %v5376_v25 = vld [vmem:[%s9713_s0 + $0x308] sm:$0xff]  ;;  %v5375_v38 = vld [vmem:[%s9713_s0 + $0x300] sm:$0xff] }
 0x930   :  { %v9131_v40 = vmul.f32 %v3048_v42, %v3048_v42  ;;  %v3302_v32 = vsel %vm148_vm4, %v3286_v49, 1.0  ;;  %v3016_v39 = vadd.f32 %v9056_v8, %v6564_v51  ;;  %v3010_v44 = vpop.f32.mrb[155].mxu1  ;;  %7336 = vmatprep.subr.bf16.mxu1 %v8041_v63  ;;  %3857 = vrot.lane.b32.xlu1 %v5376_v25, %s7832_s25 }
 0x931   :  { %v9136_v46 = vmul.f32 %v3047_v48, %v3047_v48  ;;  %v3011_v55 = vadd.f32 %v9056_v8, %v3010_v44  ;;  %6622 = vmatprep.mubr.msk.f32.mxu1 %vm165_vm5, %v3302_v32  ;;  %3855 = vrot.lane.b32.xlu0 %v5375_v38, %s7832_s25  ;;  %v5380_v44 = vld [vmem:[%s9713_s0 + $0x328] sm:$0xff] }
 0x932   :  { %v3050_v56 = vsub.f32 %v3016_v39, %v9063_v18  ;;  %6623 = vmatmul.mubr.msk.f32.gmra.mrb[168].mxu1 %vm165_vm5, %v3303_v50  ;;  %v3289_v60 = vsel %vm131_vm3, %v3016_v39, %v3253_v22  ;;  %v5377_v39 = vld [vmem:[%s9713_s0 + $0x310] sm:$0xff]  ;;  %v5382_v50 = vld [vmem:[%s9713_s0 + $0x338] sm:$0xff] }
 0x933   :  { %v7298_v61 = vpack.c.bf16 %v9131_v40, %v9136_v46  ;;  %v3049_v0 = vsub.f32 %v3011_v55, %v9063_v18  ;;  %v3288_v1 = vsel %vm131_vm3, %v3011_v55, %v3251_v35  ;;  %v3305_v3 = vsel %vm148_vm4, %v3289_v60, 1.0  ;;  %v6567_v4 = vpop.f32.mrb[156].mxu1  ;;  %7338 = vmatpush3.bf16.msra.mxu1 %v8041_v63  ;;  %v5379_v46 = vld [vmem:[%s9713_s0 + $0x320] sm:$0xff]  ;;  %v5381_v55 = vld [vmem:[%s9713_s0 + $0x330] sm:$0xff]  ;;  %v5386_v60 = vld [vmem:[%s9713_s0 + $0x358] sm:$0xff] }
 0x934   :  { %v3066_v6 = vmul.f32 %v3050_v56, %v3050_v56  ;;  %v3304_v10 = vsel %vm148_vm4, %v3288_v1, 1.0  ;;  %v3026_v11 = vadd.f32 %v9056_v8, %v6567_v4  ;;  %v3020_v12 = vpop.f32.mrb[157].mxu1  ;;  %7340 = vmatprep.subr.bf16.mxu1 %v8081_v26  ;;  %v5383_v56 = vld [vmem:[%s9713_s0 + $0x340] sm:$0xff]  ;;  %v5389_v1 = vld [vmem:[%s9713_s0 + $0x370] sm:$0xff] }
 0x935   :  { %v3065_v15 = vmul.f32 %v3049_v0, %v3049_v0  ;;  %v3021_v30 = vadd.f32 %v9056_v8, %v3020_v12  ;;  %7292 = vmatpush3.bf16.xpose.msk.msra.mxu0 %vm8203_vm6, %v7290_v2  ;;  %6625 = vmatprep.mubr.msk.f32.mxu1 %vm165_vm5, %v3304_v10  ;;  %v5388_v0 = vld [vmem:[%s9713_s0 + $0x368] sm:$0xff] }
 0x936   :  { %v3052_v19 = vsub.f32 %v3026_v11, %v9063_v18  ;;  %6626 = vmatmul.mubr.msk.f32.gmra.mrb[170].mxu1 %vm165_vm5, %v3305_v3  ;;  %v3291_v16 = vsel %vm131_vm3, %v3026_v11, %v3257_v57  ;;  %7293 = vmatprep.subr.bf16.mxu0 %v7834_v24  ;;  %v5384_v57 = vld [vmem:[%s9713_s0 + $0x348] sm:$0xff]  ;;  %v5390_v3 = vld [vmem:[%s9713_s0 + $0x378] sm:$0xff] }
 0x937   :  { %v7302_v23 = vpack.c.bf16 %v3066_v6, %v3065_v15  ;;  %v3051_v62 = vsub.f32 %v3021_v30, %v9063_v18  ;;  %v3290_v7 = vsel %vm131_vm3, %v3021_v30, %v3255_v59  ;;  %v3307_v14 = vsel %vm148_vm4, %v3291_v16, 1.0  ;;  %v6570_v34 = vpop.f32.mrb[158].mxu1  ;;  %7342 = vmatpush3.bf16.msra.mxu1 %v8081_v26  ;;  %3859 = vrot.lane.b32.xlu0 %v5377_v39, %s7832_s25  ;;  %v5385_v59 = vld [vmem:[%s9713_s0 + $0x350] sm:$0xff] }
 0x938   :  { %v3068_v2 = vmul.f32 %v3052_v19, %v3052_v19  ;;  %v3306_v17 = vsel %vm148_vm4, %v3290_v7, 1.0  ;;  %v3036_v21 = vadd.f32 %v9056_v8, %v6570_v34  ;;  %v3030_v22 = vpop.f32.mrb[159].mxu1  ;;  %7344 = vmatprep.subr.bf16.mxu1 %v8091_v28 }
 0x939   :  { %v3067_v29 = vmul.f32 %v3051_v62, %v3051_v62  ;;  %v3031_v33 = vadd.f32 %v9056_v8, %v3030_v22  ;;  %6628 = vmatprep.mubr.msk.f32.mxu1 %vm165_vm5, %v3306_v17 }
 0x93a   :  { %v3054_v35 = vsub.f32 %v3036_v21, %v9063_v18  ;;  %6629 = vmatmul.mubr.msk.f32.gmra.mrb[172].mxu1 %vm165_vm5, %v3307_v14  ;;  %v3293_v37 = vsel %vm131_vm3, %v3036_v21, %v3261_v13 }
 0x93b   :  { %v7306_v41 = vpack.c.bf16 %v3068_v2, %v3067_v29  ;;  %v3053_v42 = vsub.f32 %v3031_v33, %v9063_v18  ;;  %v3292_v43 = vsel %vm131_vm3, %v3031_v33, %v3259_v27  ;;  %v3309_v48 = vsel %vm148_vm4, %v3293_v37, 1.0  ;;  %7346 = vmatpush3.bf16.msra.mxu1 %v8091_v28  ;;  %3863 = vrot.lane.b32.xlu0 %v5379_v46, %s7832_s25 }
 0x93c   :  { %v3070_v49 = vmul.f32 %v3054_v35, %v3054_v35  ;;  %v3308_v51 = vsel %vm148_vm4, %v3292_v43, 1.0  ;;  %7348 = vmatprep.subr.bf16.mxu1 %v8101_v31 }
 0x93d   :  { %v3069_v40 = vmul.f32 %v3053_v42, %v3053_v42  ;;  %7296 = vmatpush3.bf16.xpose.msk.msra.mxu0 %vm8203_vm6, %v7294_v47  ;;  %6631 = vmatprep.mubr.msk.f32.mxu1 %vm165_vm5, %v3308_v51  ;;  %v5378_v47 = vld [vmem:[%s9713_s0 + $0x318] sm:$0xff] }
 0x93e   :  { %6632 = vmatmul.mubr.msk.f32.gmra.mrb[174].mxu1 %vm165_vm5, %v3309_v48  ;;  %7297 = vmatprep.subr.bf16.mxu0 %v7834_v24 }
 0x93f   :  { %v7310_v32 = vpack.c.bf16 %v3070_v49, %v3069_v40  ;;  %7350 = vmatpush3.bf16.msra.mxu1 %v8101_v31  ;;  %3861 = vrot.lane.b32.xlu1 %v5378_v47, %s7832_s25 }
 0x940   :  { %7385 = vmatprep.subr.msk.bf16.mxu1 %vm7893_vm2, %v7906_v9  ;;  %3867 = vrot.lane.b32.xlu0 %v5381_v55, %s7832_s25 }
 0x943   :  { %3865 = vrot.lane.b32.xlu1 %v5380_v44, %s7832_s25 }
 0x944   :  { %3871 = vrot.lane.b32.xlu0 %v5383_v56, %s7832_s25 }
 0x945   :  { %7300 = vmatpush3.bf16.xpose.msk.msra.mxu0 %vm8203_vm6, %v7298_v61  ;;  %v5387_v61 = vld [vmem:[%s9713_s0 + $0x360] sm:$0xff] }
 0x946   :  { %7301 = vmatprep.subr.bf16.mxu0 %v7834_v24 }
 0x947   :  { %3869 = vrot.lane.b32.xlu1 %v5382_v50, %s7832_s25 }
 0x948   :  { %3875 = vrot.lane.b32.xlu0 %v5385_v59, %s7832_s25 }
 0x94b   :  { %3873 = vrot.lane.b32.xlu1 %v5384_v57, %s7832_s25 }
 0x94c   :  { %3879 = vrot.lane.b32.xlu0 %v5387_v61, %s7832_s25 }
 0x94d   :  { %7304 = vmatpush3.bf16.xpose.msk.msra.mxu0 %vm8203_vm6, %v7302_v23 }
 0x94e   :  { %7305 = vmatprep.subr.bf16.mxu0 %v7834_v24 }
 0x94f   :  { %3877 = vrot.lane.b32.xlu1 %v5386_v60, %s7832_s25 }
 0x950   :  { %3883 = vrot.lane.b32.xlu0 %v5389_v1, %s7832_s25 }
 0x953   :  { %3881 = vrot.lane.b32.xlu1 %v5388_v0, %s7832_s25 }
 0x955   :  { %7308 = vmatpush3.bf16.xpose.msk.msra.mxu0 %vm8203_vm6, %v7306_v41 }
 0x956   :  { %7309 = vmatprep.subr.bf16.mxu0 %v7834_v24 }
 0x957   :  { %3885 = vrot.lane.b32.xlu1 %v5390_v3, %s7832_s25 }
 0x95d   :  { %7312 = vmatpush3.bf16.xpose.msk.msra.mxu0 %vm8203_vm6, %v7310_v32 }
 0x95e   :  { %7351 = vmatprep.subr.bf16.mxu0 %v7834_v24 }
 0x964   :  { %6604 = vmatmul.mubr.msk.f32.vlgmr.msra.gmra.mrb[8].mxu0 %vm131_vm3, %v7837_v53 }
 0x965   :  { %6722 = vmatprep.mubr.msk.f32.mxu0 %vm7835_vm7, %v7836_v52 }
 0x9a2   :  { %v3858_v38 = vpop.permute.xlu1 %3857 }
 0x9a3   :  { %v3856_v25 = vpop.permute.xlu0 %3855 }
 0x9a9   :  { %v3860_v47 = vpop.permute.xlu0 %3859 }
 0x9ad   :  { %v3864_v44 = vpop.permute.xlu0 %3863 }
 0x9b1   :  { %v3862_v39 = vpop.permute.xlu1 %3861 }
 0x9b5   :  { %v3866_v50 = vpop.permute.xlu1 %3865 }
 0x9f5   :  { %v6612_v4 = vpop.f32.mrb[160].mxu1 }
 0x9f6   :  { %v3424_v6 = vpop.f32.mrb[161].mxu1 }
 0x9f7   :  { %7690 = vtanh.f32 %v3424_v6 }
 0x9f8   :  { %7692 = vtanh.f32 %v6612_v4 }
 0x9f9   :  { %v6615_v10 = vpop.f32.mrb[162].mxu1 }
 0x9fa   :  { %v3434_v11 = vpop.f32.mrb[163].mxu1 }
 0x9fb   :  { %7694 = vtanh.f32 %v3434_v11  ;;  %v3868_v11 = vpop.permute.xlu0 %3867 }
 0x9fc   :  { %7696 = vtanh.f32 %v6615_v10 }
 0x9fd   :  { %v6618_v12 = vpop.f32.mrb[164].mxu1 }
 0x9fe   :  { %v3444_v15 = vpop.f32.mrb[165].mxu1 }
 0x9ff   :  { %7698 = vtanh.f32 %v3444_v15 }
 0xa00   :  { %7700 = vtanh.f32 %v6618_v12 }
 0xa01   :  { %v7691_v30 = vpop.eup %7690  ;;  %v6621_v19 = vpop.f32.mrb[166].mxu1 }
 0xa02   :  { %v7693_v16 = vpop.eup %7692  ;;  %v3454_v23 = vpop.f32.mrb[167].mxu1  ;;  %6666 = vmatprep.mubr.f32.mxu1 %v7691_v30 }
 0xa03   :  { %7702 = vtanh.f32 %v3454_v23  ;;  %6667 = vmatmul.mubr.f32.vlgmr.msra.gmra.mrb[176].mxu1 %v7693_v16 }
 0xa04   :  { %7704 = vtanh.f32 %v6621_v19  ;;  %7388 = vmatpush3.bf16.msk.msra.mxu1 %vm7893_vm2, %v7906_v9  ;;  %v3870_v19 = vpop.permute.xlu1 %3869 }
 0xa05   :  { %v7695_v62 = vpop.eup %7694  ;;  %v6624_v7 = vpop.f32.mrb[168].mxu1  ;;  %7390 = vmatprep.subr.bf16.mxu1 %v7952_v20 }
 0xa06   :  { %v7697_v14 = vpop.eup %7696  ;;  %v3464_v34 = vpop.f32.mrb[169].mxu1  ;;  %6669 = vmatprep.mubr.f32.mxu1 %v7695_v62 }
 0xa07   :  { %7706 = vtanh.f32 %v3464_v34  ;;  %6670 = vmatmul.mubr.f32.gmra.mrb[178].mxu1 %v7697_v14 }
 0xa08   :  { %7708 = vtanh.f32 %v6624_v7 }
 0xa09   :  { %v7699_v13 = vpop.eup %7698  ;;  %v6627_v2 = vpop.f32.mrb[170].mxu1 }
 0xa0a   :  { %v7701_v17 = vpop.eup %7700  ;;  %v3474_v21 = vpop.f32.mrb[171].mxu1  ;;  %6672 = vmatprep.mubr.f32.mxu1 %v7699_v13 }
 0xa0b   :  { %7710 = vtanh.f32 %v3474_v21  ;;  %6673 = vmatmul.mubr.f32.gmra.mrb[180].mxu1 %v7701_v17 }
 0xa0c   :  { %7712 = vtanh.f32 %v6627_v2 }
 0xa0d   :  { %v7703_v22 = vpop.eup %7702  ;;  %v6630_v27 = vpop.f32.mrb[172].mxu1 }
 0xa0e   :  { %v7705_v29 = vpop.eup %7704  ;;  %7714 = vtanh.f32 %v6630_v27  ;;  %v3484_v33 = vpop.f32.mrb[173].mxu1  ;;  %6675 = vmatprep.mubr.f32.mxu1 %v7703_v22 }
 0xa0f   :  { %7716 = vtanh.f32 %v3484_v33  ;;  %6676 = vmatmul.mubr.f32.gmra.mrb[182].mxu1 %v7705_v29 }
 0xa11   :  { %v7707_v35 = vpop.eup %7706  ;;  %v6633_v37 = vpop.f32.mrb[174].mxu1 }
 0xa12   :  { %v7709_v41 = vpop.eup %7708  ;;  %7718 = vtanh.f32 %v6633_v37  ;;  %v3494_v42 = vpop.f32.mrb[175].mxu1  ;;  %6678 = vmatprep.mubr.f32.mxu1 %v7707_v35 }
 0xa13   :  { %7720 = vtanh.f32 %v3494_v42  ;;  %6679 = vmatmul.mubr.f32.gmra.mrb[184].mxu1 %v7709_v41  ;;  %v3872_v37 = vpop.permute.xlu0 %3871 }
 0xa15   :  { %v7711_v43 = vpop.eup %7710 }
 0xa16   :  { %v7713_v48 = vpop.eup %7712  ;;  %6681 = vmatprep.mubr.f32.mxu1 %v7711_v43 }
 0xa17   :  { %6682 = vmatmul.mubr.f32.gmra.mrb[186].mxu1 %v7713_v48 }
 0xa18   :  { %v7715_v49 = vpop.eup %7714 }
 0xa19   :  { %v7717_v51 = vpop.eup %7716 }
 0xa1a   :  { %6684 = vmatprep.mubr.f32.mxu1 %v7717_v51 }
 0xa1b   :  { %6685 = vmatmul.mubr.f32.gmra.mrb[188].mxu1 %v7715_v49  ;;  %v3874_v49 = vpop.permute.xlu1 %3873 }
 0xa1c   :  { %v7719_v40 = vpop.eup %7718 }
 0xa1d   :  { %v7721_v32 = vpop.eup %7720 }
 0xa1e   :  { %6687 = vmatprep.mubr.f32.mxu1 %v7721_v32 }
 0xa1f   :  { %6688 = vmatmul.mubr.f32.gmra.mrb[190].mxu1 %v7719_v40 }
 0xad6   :  { %v6668_v46 = vpop.f32.mrb[176].mxu1 }
 0xad7   :  { %v3591_v55 = vadd.f32 %v9056_v8, %v6668_v46  ;;  %v3585_v57 = vpop.f32.mrb[177].mxu1 }
 0xad8   :  { %v3586_v56 = vadd.f32 %v9056_v8, %v3585_v57 }
 0xad9   :  { %v3665_v60 = vsub.f32 %v3591_v55, %v9063_v18  ;;  %v3904_v59 = vsel %vm131_vm3, %v3591_v55, %v3858_v38 }
 0xada   :  { %v3664_v61 = vsub.f32 %v3586_v56, %v9063_v18  ;;  %v3903_v0 = vsel %vm131_vm3, %v3586_v56, %v3856_v25  ;;  %v6671_v1 = vpop.f32.mrb[178].mxu1  ;;  %v3920_v15 = vsel %vm148_vm4, %v3904_v59, 1.0 }
 0xadb   :  { %v3681_v3 = vmul.f32 %v3665_v60, %v3665_v60  ;;  %v3919_v4 = vsel %vm148_vm4, %v3903_v0, 1.0  ;;  %v3601_v6 = vadd.f32 %v9056_v8, %v6671_v1  ;;  %v3595_v10 = vpop.f32.mrb[179].mxu1  ;;  %v3876_v1 = vpop.permute.xlu0 %3875 }
 0xadc   :  { %v3680_v12 = vmul.f32 %v3664_v61, %v3664_v61  ;;  %v3596_v30 = vadd.f32 %v9056_v8, %v3595_v10  ;;  %6729 = vmatprep.mubr.msk.f32.mxu1 %vm165_vm5, %v3919_v4  ;;  %v3878_v10 = vpop.permute.xlu1 %3877 }
 0xadd   :  { %v3667_v16 = vsub.f32 %v3601_v6, %v9063_v18  ;;  %v3906_v23 = vsel %vm131_vm3, %v3601_v6, %v3862_v39  ;;  %6730 = vmatmul.mubr.msk.f32.vlgmr.msra.gmra.mrb[192].mxu1 %vm165_vm5, %v3920_v15 }
 0xade   :  { %v7352_v62 = vpack.c.bf16 %v3681_v3, %v3680_v12  ;;  %v3666_v7 = vsub.f32 %v3596_v30, %v9063_v18  ;;  %v3905_v14 = vsel %vm131_vm3, %v3596_v30, %v3860_v47  ;;  %v6674_v34 = vpop.f32.mrb[180].mxu1  ;;  %7392 = vmatpush3.bf16.msra.mxu1 %v7952_v20  ;;  %v3922_v27 = vsel %vm148_vm4, %v3906_v23, 1.0 }
 0xadf   :  { %v3683_v13 = vmul.f32 %v3667_v16, %v3667_v16  ;;  %v3921_v2 = vsel %vm148_vm4, %v3905_v14, 1.0  ;;  %v3611_v17 = vadd.f32 %v9056_v8, %v6674_v34  ;;  %v3605_v21 = vpop.f32.mrb[181].mxu1  ;;  %7394 = vmatprep.subr.bf16.mxu1 %v7987_v36 }
 0xae0   :  { %v3682_v22 = vmul.f32 %v3666_v7, %v3666_v7  ;;  %v3606_v29 = vadd.f32 %v9056_v8, %v3605_v21  ;;  %7354 = vmatpush3.bf16.xpose.msk.msra.mxu0 %vm8203_vm6, %v7352_v62  ;;  %6732 = vmatprep.mubr.msk.f32.mxu1 %vm165_vm5, %v3921_v2 }
 0xae1   :  { %v3669_v33 = vsub.f32 %v3611_v17, %v9063_v18  ;;  %v3908_v35 = vsel %vm131_vm3, %v3611_v17, %v3866_v50  ;;  %6733 = vmatmul.mubr.msk.f32.gmra.mrb[194].mxu1 %vm165_vm5, %v3922_v27  ;;  %7355 = vmatprep.subr.bf16.mxu0 %v7834_v24  ;;  %v3882_v17 = vpop.permute.xlu1 %3881  ;;  %v3880_v27 = vpop.permute.xlu0 %3879 }
 0xae2   :  { %v7356_v41 = vpack.c.bf16 %v3683_v13, %v3682_v22  ;;  %v3668_v42 = vsub.f32 %v3606_v29, %v9063_v18  ;;  %v3907_v43 = vsel %vm131_vm3, %v3606_v29, %v3864_v44  ;;  %v6677_v48 = vpop.f32.mrb[182].mxu1  ;;  %7396 = vmatpush3.bf16.msra.mxu1 %v7987_v36  ;;  %v3924_v47 = vsel %vm148_vm4, %v3908_v35, 1.0 }
 0xae3   :  { %v9307_v51 = vmul.f32 %v3669_v33, %v3669_v33  ;;  %v3923_v40 = vsel %vm148_vm4, %v3907_v43, 1.0  ;;  %v3621_v32 = vadd.f32 %v9056_v8, %v6677_v48  ;;  %v3615_v25 = vpop.f32.mrb[183].mxu1  ;;  %7398 = vmatprep.subr.bf16.mxu1 %v8005_v45 }
 0xae4   :  { %v3684_v38 = vmul.f32 %v3668_v42, %v3668_v42  ;;  %v3616_v39 = vadd.f32 %v9056_v8, %v3615_v25  ;;  %6735 = vmatprep.mubr.msk.f32.mxu1 %vm165_vm5, %v3923_v40 }
 0xae5   :  { %v3671_v44 = vsub.f32 %v3621_v32, %v9063_v18  ;;  %v3910_v46 = vsel %vm131_vm3, %v3621_v32, %v3870_v19  ;;  %6736 = vmatmul.mubr.msk.f32.gmra.mrb[196].mxu1 %vm165_vm5, %v3924_v47 }
 0xae6   :  { %v7360_v50 = vpack.c.bf16 %v9307_v51, %v3684_v38  ;;  %v3670_v55 = vsub.f32 %v3616_v39, %v9063_v18  ;;  %v3909_v57 = vsel %vm131_vm3, %v3616_v39, %v3868_v11  ;;  %v6680_v56 = vpop.f32.mrb[184].mxu1  ;;  %7400 = vmatpush3.bf16.msra.mxu1 %v8005_v45  ;;  %v3926_v4 = vsel %vm148_vm4, %v3910_v46, 1.0 }
 0xae7   :  { %v9322_v60 = vmul.f32 %v3671_v44, %v3671_v44  ;;  %v3925_v59 = vsel %vm148_vm4, %v3909_v57, 1.0  ;;  %v3631_v61 = vadd.f32 %v9056_v8, %v6680_v56  ;;  %v3625_v0 = vpop.f32.mrb[185].mxu1  ;;  %7402 = vmatprep.subr.bf16.mxu1 %v8023_v54 }
 0xae8   :  { %v9327_v3 = vmul.f32 %v3670_v55, %v3670_v55  ;;  %v3626_v6 = vadd.f32 %v9056_v8, %v3625_v0  ;;  %7358 = vmatpush3.bf16.xpose.msk.msra.mxu0 %vm8203_vm6, %v7356_v41  ;;  %6738 = vmatprep.mubr.msk.f32.mxu1 %vm165_vm5, %v3925_v59  ;;  %v3886_v55 = vpop.permute.xlu1 %3885 }
 0xae9   :  { %v3673_v11 = vsub.f32 %v3631_v61, %v9063_v18  ;;  %v3912_v12 = vsel %vm131_vm3, %v3631_v61, %v3874_v49  ;;  %6739 = vmatmul.mubr.msk.f32.gmra.mrb[198].mxu1 %vm165_vm5, %v3926_v4  ;;  %7359 = vmatprep.subr.bf16.mxu0 %v7834_v24  ;;  %v3884_v61 = vpop.permute.xlu0 %3883 }
 0xaea   :  { %v7364_v15 = vpack.c.bf16 %v9322_v60, %v9327_v3  ;;  %v3672_v30 = vsub.f32 %v3626_v6, %v9063_v18  ;;  %v3911_v19 = vsel %vm131_vm3, %v3626_v6, %v3872_v37  ;;  %v6683_v16 = vpop.f32.mrb[186].mxu1  ;;  %7404 = vmatpush3.bf16.msra.mxu1 %v8023_v54  ;;  %v3928_v13 = vsel %vm148_vm4, %v3912_v12, 1.0  ;;  %v5426_v60 = vld [vmem:[%s9713_s0 + $0x388] sm:$0xff]  ;;  %v5425_v3 = vld [vmem:[%s9713_s0 + $0x380] sm:$0xff] }
 0xaeb   :  { %v9343_v23 = vmul.f32 %v3673_v11, %v3673_v11  ;;  %v3927_v62 = vsel %vm148_vm4, %v3911_v19, 1.0  ;;  %v3641_v7 = vadd.f32 %v9056_v8, %v6683_v16  ;;  %v3635_v14 = vpop.f32.mrb[187].mxu1  ;;  %7406 = vmatprep.subr.bf16.mxu1 %v8041_v63  ;;  %4482 = vrot.lane.b32.xlu1 %v5426_v60, %s7832_s25 }
 0xaec   :  { %v9348_v34 = vmul.f32 %v3672_v30, %v3672_v30  ;;  %v3636_v2 = vadd.f32 %v9056_v8, %v3635_v14  ;;  %6741 = vmatprep.mubr.msk.f32.mxu1 %vm165_vm5, %v3927_v62  ;;  %4480 = vrot.lane.b32.xlu0 %v5425_v3, %s7832_s25  ;;  %v5430_v62 = vld [vmem:[%s9713_s0 + $0x3a8] sm:$0xff]  ;;  %v5432_v14 = vld [vmem:[%s9713_s0 + $0x3b8] sm:$0xff] }
 0xaed   :  { %v3675_v21 = vsub.f32 %v3641_v7, %v9063_v18  ;;  %v3914_v22 = vsel %vm131_vm3, %v3641_v7, %v3878_v10  ;;  %6742 = vmatmul.mubr.msk.f32.gmra.mrb[200].mxu1 %vm165_vm5, %v3928_v13  ;;  %v5429_v7 = vld [vmem:[%s9713_s0 + $0x3a0] sm:$0xff]  ;;  %v5434_v13 = vld [vmem:[%s9713_s0 + $0x3c8] sm:$0xff] }
 0xaee   :  { %v7368_v29 = vpack.c.bf16 %v9343_v23, %v9348_v34  ;;  %v3674_v33 = vsub.f32 %v3636_v2, %v9063_v18  ;;  %v3913_v35 = vsel %vm131_vm3, %v3636_v2, %v3876_v1  ;;  %v6686_v37 = vpop.f32.mrb[188].mxu1  ;;  %7408 = vmatpush3.bf16.msra.mxu1 %v8041_v63  ;;  %v3930_v51 = vsel %vm148_vm4, %v3914_v22, 1.0  ;;  %v5427_v23 = vld [vmem:[%s9713_s0 + $0x390] sm:$0xff]  ;;  %v5433_v2 = vld [vmem:[%s9713_s0 + $0x3c0] sm:$0xff]  ;;  %v5438_v22 = vld [vmem:[%s9713_s0 + $0x3e8] sm:$0xff] }
 0xaef   :  { %v3691_v41 = vmul.f32 %v3675_v21, %v3675_v21  ;;  %v3929_v42 = vsel %vm148_vm4, %v3913_v35, 1.0  ;;  %v3651_v43 = vadd.f32 %v9056_v8, %v6686_v37  ;;  %v3645_v48 = vpop.f32.mrb[189].mxu1  ;;  %7410 = vmatprep.subr.bf16.mxu1 %v8081_v26  ;;  %v5431_v34 = vld [vmem:[%s9713_s0 + $0x3b0] sm:$0xff] }
 0xaf0   :  { %v3690_v49 = vmul.f32 %v3674_v33, %v3674_v33  ;;  %v3646_v40 = vadd.f32 %v9056_v8, %v3645_v48  ;;  %7362 = vmatpush3.bf16.xpose.msk.msra.mxu0 %vm8203_vm6, %v7360_v50  ;;  %6744 = vmatprep.mubr.msk.f32.mxu1 %vm165_vm5, %v3929_v42  ;;  %v5435_v21 = vld [vmem:[%s9713_s0 + $0x3d0] sm:$0xff]  ;;  %v5440_v33 = vld [vmem:[%s9713_s0 + $0x3f8] sm:$0xff] }
 0xaf1   :  { %v3677_v32 = vsub.f32 %v3651_v43, %v9063_v18  ;;  %6745 = vmatmul.mubr.msk.f32.gmra.mrb[202].mxu1 %vm165_vm5, %v3930_v51  ;;  %v3916_v25 = vsel %vm131_vm3, %v3651_v43, %v3882_v17  ;;  %7363 = vmatprep.subr.bf16.mxu0 %v7834_v24  ;;  %v5436_v17 = vld [vmem:[%s9713_s0 + $0x3d8] sm:$0xff] }
 0xaf2   :  { %v7372_v38 = vpack.c.bf16 %v3691_v41, %v3690_v49  ;;  %v3676_v47 = vsub.f32 %v3646_v40, %v9063_v18  ;;  %v3915_v39 = vsel %vm131_vm3, %v3646_v40, %v3880_v27  ;;  %v3932_v44 = vsel %vm148_vm4, %v3916_v25, 1.0  ;;  %v6689_v46 = vpop.f32.mrb[190].mxu1  ;;  %7412 = vmatpush3.bf16.msra.mxu1 %v8081_v26  ;;  %4484 = vrot.lane.b32.xlu0 %v5427_v23, %s7832_s25  ;;  %v5437_v27 = vld [vmem:[%s9713_s0 + $0x3e0] sm:$0xff] }
 0xaf3   :  { %v3693_v50 = vmul.f32 %v3677_v32, %v3677_v32  ;;  %v3931_v57 = vsel %vm148_vm4, %v3915_v39, 1.0  ;;  %v3661_v56 = vadd.f32 %v9056_v8, %v6689_v46  ;;  %v3655_v59 = vpop.f32.mrb[191].mxu1  ;;  %7414 = vmatprep.subr.bf16.mxu1 %v8091_v28  ;;  %v9490_v23 = vld [vmem:[%s9717_s4] ss:$0 sm:$0xff]  ;;  %s7838_s4 = smov [#allocation2]  }
 0xaf4   :  { %v3692_v0 = vmul.f32 %v3676_v47, %v3676_v47  ;;  %v3656_v1 = vadd.f32 %v9056_v8, %v3655_v59  ;;  %6747 = vmatprep.mubr.msk.f32.mxu1 %vm165_vm5, %v3931_v57 }
 0xaf5   :  { %v3679_v4 = vsub.f32 %v3661_v56, %v9063_v18  ;;  %6748 = vmatmul.mubr.msk.f32.gmra.mrb[204].mxu1 %vm165_vm5, %v3932_v44  ;;  %v3918_v6 = vsel %vm131_vm3, %v3661_v56, %v3886_v55 }
 0xaf6   :  { %v7376_v10 = vpack.c.bf16 %v3693_v50, %v3692_v0  ;;  %v3678_v11 = vsub.f32 %v3656_v1, %v9063_v18  ;;  %v3917_v12 = vsel %vm131_vm3, %v3656_v1, %v3884_v61  ;;  %v3934_v30 = vsel %vm148_vm4, %v3918_v6, 1.0  ;;  %7416 = vmatpush3.bf16.msra.mxu1 %v8091_v28  ;;  %4488 = vrot.lane.b32.xlu0 %v5429_v7, %s7832_s25 }
 0xaf7   :  { %v3695_v19 = vmul.f32 %v3679_v4, %v3679_v4  ;;  %v3933_v8 = vsel %vm148_vm4, %v3917_v12, 1.0  ;;  %7418 = vmatprep.subr.bf16.mxu1 %v8101_v31 }
 0xaf8   :  { %v3694_v16 = vmul.f32 %v3678_v11, %v3678_v11  ;;  %7366 = vmatpush3.bf16.xpose.msk.msra.mxu0 %vm8203_vm6, %v7364_v15  ;;  %6750 = vmatprep.mubr.msk.f32.mxu1 %vm165_vm5, %v3933_v8  ;;  %v5428_v15 = vld [vmem:[%s9713_s0 + $0x398] sm:$0xff] }
 0xaf9   :  { %6751 = vmatmul.mubr.msk.f32.gmra.mrb[206].mxu1 %vm165_vm5, %v3934_v30  ;;  %7367 = vmatprep.subr.bf16.mxu0 %v7834_v24 }
 0xafa   :  { %v7380_v18 = vpack.c.bf16 %v3695_v19, %v3694_v16  ;;  %7420 = vmatpush3.bf16.msra.mxu1 %v8101_v31  ;;  %4486 = vrot.lane.b32.xlu1 %v5428_v15, %s7832_s25 }
 0xafb   :  { %7455 = vmatprep.subr.msk.bf16.mxu1 %vm7893_vm2, %v7906_v9  ;;  %4492 = vrot.lane.b32.xlu0 %v5431_v34, %s7832_s25  ;;  %v9497_v34 = vld [vmem:[%s9718_s5] ss:$0 sm:$0xff]  ;;  %s5080_s5 = sshll.u32 %s7838_s4, 4  ;;  %s5081_s5 = int_to_ptr.vmem [resolvable:$true] %s5080_s5 }
 0xafc   :  { %s7808_s3 = scalar_lea.vmem %s5081_s5, 16  ;;  %s7812_s21 = scalar_lea.vmem %s5081_s5, 32 }
 0xafd   :  { %p7809_p0 = scmp.ne.s32.totalorder %s5081_s5, %s7808_s3  ;;  %p7813_p1 = scmp.lt.s32.totalorder %s5081_s5, %s5081_s5 }
 0xafe   :  { %4490 = vrot.lane.b32.xlu1 %v5430_v62, %s7832_s25  ;;  %p7814_p2 = scmp.lt.s32.totalorder %s7812_s21, %s7808_s3 }
 0xaff   :  { %4496 = vrot.lane.b32.xlu0 %v5433_v2, %s7832_s25 }
 0xb00   :  { %7370 = vmatpush3.bf16.xpose.msk.msra.mxu0 %vm8203_vm6, %v7368_v29  ;;  %v5439_v29 = vld [vmem:[%s9713_s0 + $0x3f0] sm:$0xff]  ;;  %p7815_p3 = por %p7814_p2, %p7813_p1 }
 0xb01   :  { %7371 = vmatprep.subr.bf16.mxu0 %v7834_v24 }
 0xb02   :  { %4494 = vrot.lane.b32.xlu1 %v5432_v14, %s7832_s25  ;;  %p7816_p4 = pnand %p7815_p3, %p7809_p0 }
 0xb03   :  { %4500 = vrot.lane.b32.xlu0 %v5435_v21, %s7832_s25 }
 0xb06   :  { %4498 = vrot.lane.b32.xlu1 %v5434_v13, %s7832_s25 }
 0xb07   :  { %4504 = vrot.lane.b32.xlu0 %v5437_v27, %s7832_s25 }
 0xb08   :  { %7374 = vmatpush3.bf16.xpose.msk.msra.mxu0 %vm8203_vm6, %v7372_v38 }
 0xb09   :  { %7375 = vmatprep.subr.bf16.mxu0 %v7834_v24 }
 0xb0a   :  { %4502 = vrot.lane.b32.xlu1 %v5436_v17, %s7832_s25 }
 0xb0b   :  { %4508 = vrot.lane.b32.xlu0 %v5439_v29, %s7832_s25 }
 0xb0e   :  { %4506 = vrot.lane.b32.xlu1 %v5438_v22, %s7832_s25 }
 0xb10   :  { %7378 = vmatpush3.bf16.xpose.msk.msra.mxu0 %vm8203_vm6, %v7376_v10 }
 0xb11   :  { %7379 = vmatprep.subr.bf16.mxu0 %v7834_v24 }
 0xb12   :  { %4510 = vrot.lane.b32.xlu1 %v5440_v33, %s7832_s25 }
 0xb18   :  { %7382 = vmatpush3.bf16.xpose.msk.msra.mxu0 %vm8203_vm6, %v7380_v18 }
 0xb19   :  { %7421 = vmatprep.subr.bf16.mxu0 %v7834_v24 }
 0xb1f   :  { %6723 = vmatmul.mubr.msk.f32.vlgmr.msra.gmra.mrb[10].mxu0 %vm131_vm3, %v7837_v53 }
 0xb20   :  { %6841 = vmatprep.mubr.msk.f32.mxu0 %vm7835_vm7, %v7836_v52 }
 0xb5d   :  { %v4483_v8 = vpop.permute.xlu1 %4482 }
 0xb5e   :  { %v4481_v19 = vpop.permute.xlu0 %4480 }
 0xb64   :  { %v4485_v16 = vpop.permute.xlu0 %4484 }
 0xb68   :  { %v4489_v60 = vpop.permute.xlu0 %4488 }
 0xb6c   :  { %v4487_v18 = vpop.permute.xlu1 %4486 }
 0xb70   :  { %v4491_v15 = vpop.permute.xlu1 %4490 }
 0xbb0   :  { %v6731_v35 = vpop.f32.mrb[192].mxu1 }
 0xbb1   :  { %v4049_v37 = vpop.f32.mrb[193].mxu1 }
 0xbb2   :  { %7722 = vtanh.f32 %v4049_v37  ;;  %v4493_v37 = vpop.permute.xlu0 %4492 }
 0xbb3   :  { %7724 = vtanh.f32 %v6731_v35 }
 0xbb4   :  { %v6734_v41 = vpop.f32.mrb[194].mxu1 }
 0xbb5   :  { %v4059_v42 = vpop.f32.mrb[195].mxu1 }
 0xbb6   :  { %7726 = vtanh.f32 %v4059_v42 }
 0xbb7   :  { %7728 = vtanh.f32 %v6734_v41 }
 0xbb8   :  { %v6737_v43 = vpop.f32.mrb[196].mxu1 }
 0xbb9   :  { %v4069_v48 = vpop.f32.mrb[197].mxu1 }
 0xbba   :  { %7730 = vtanh.f32 %v4069_v48  ;;  %v4495_v48 = vpop.permute.xlu1 %4494 }
 0xbbb   :  { %7732 = vtanh.f32 %v6737_v43 }
 0xbbc   :  { %v7723_v49 = vpop.eup %7722  ;;  %v6740_v51 = vpop.f32.mrb[198].mxu1 }
 0xbbd   :  { %v7725_v40 = vpop.eup %7724  ;;  %v4079_v32 = vpop.f32.mrb[199].mxu1  ;;  %6785 = vmatprep.mubr.f32.mxu1 %v7723_v49 }
 0xbbe   :  { %7734 = vtanh.f32 %v4079_v32  ;;  %6786 = vmatmul.mubr.f32.vlgmr.msra.gmra.mrb[208].mxu1 %v7725_v40 }
 0xbbf   :  { %7736 = vtanh.f32 %v6740_v51  ;;  %7458 = vmatpush3.bf16.msk.msra.mxu1 %vm7893_vm2, %v7906_v9 }
 0xbc0   :  { %v7727_v25 = vpop.eup %7726  ;;  %v6743_v38 = vpop.f32.mrb[200].mxu1  ;;  %7460 = vmatprep.subr.bf16.mxu1 %v7952_v20 }
 0xbc1   :  { %v7729_v47 = vpop.eup %7728  ;;  %v4089_v39 = vpop.f32.mrb[201].mxu1  ;;  %6788 = vmatprep.mubr.f32.mxu1 %v7727_v25 }
 0xbc2   :  { %7738 = vtanh.f32 %v4089_v39  ;;  %6789 = vmatmul.mubr.f32.gmra.mrb[210].mxu1 %v7729_v47 }
 0xbc3   :  { %7740 = vtanh.f32 %v6743_v38 }
 0xbc4   :  { %v7731_v44 = vpop.eup %7730  ;;  %v6746_v46 = vpop.f32.mrb[202].mxu1 }
 0xbc5   :  { %v7733_v55 = vpop.eup %7732  ;;  %v4099_v50 = vpop.f32.mrb[203].mxu1  ;;  %6791 = vmatprep.mubr.f32.mxu1 %v7731_v44 }
 0xbc6   :  { %7742 = vtanh.f32 %v4099_v50  ;;  %6792 = vmatmul.mubr.f32.gmra.mrb[212].mxu1 %v7733_v55 }
 0xbc7   :  { %7744 = vtanh.f32 %v6746_v46 }
 0xbc8   :  { %v7735_v5 = vpop.eup %7734  ;;  %v6749_v9 = vpop.f32.mrb[204].mxu1 }
 0xbc9   :  { %v7737_v57 = vpop.eup %7736  ;;  %v4109_v56 = vpop.f32.mrb[205].mxu1  ;;  %6794 = vmatprep.mubr.f32.mxu1 %v7735_v5 }
 0xbca   :  { %7746 = vtanh.f32 %v4109_v56  ;;  %6795 = vmatmul.mubr.f32.gmra.mrb[214].mxu1 %v7737_v57  ;;  %v4497_v57 = vpop.permute.xlu0 %4496 }
 0xbcb   :  { %7748 = vtanh.f32 %v6749_v9 }
 0xbcc   :  { %v7739_v59 = vpop.eup %7738  ;;  %v6752_v61 = vpop.f32.mrb[206].mxu1 }
 0xbcd   :  { %v7741_v0 = vpop.eup %7740  ;;  %7750 = vtanh.f32 %v6752_v61  ;;  %v4119_v1 = vpop.f32.mrb[207].mxu1  ;;  %6797 = vmatprep.mubr.f32.mxu1 %v7739_v59 }
 0xbce   :  { %7752 = vtanh.f32 %v4119_v1  ;;  %6798 = vmatmul.mubr.f32.gmra.mrb[216].mxu1 %v7741_v0  ;;  %v4499_v1 = vpop.permute.xlu1 %4498 }
 0xbd0   :  { %v7743_v4 = vpop.eup %7742 }
 0xbd1   :  { %v7745_v6 = vpop.eup %7744  ;;  %6800 = vmatprep.mubr.f32.mxu1 %v7743_v4 }
 0xbd2   :  { %6801 = vmatmul.mubr.f32.gmra.mrb[218].mxu1 %v7745_v6 }
 0xbd4   :  { %v7747_v10 = vpop.eup %7746 }
 0xbd5   :  { %v7749_v11 = vpop.eup %7748  ;;  %6803 = vmatprep.mubr.f32.mxu1 %v7747_v10 }
 0xbd6   :  { %6804 = vmatmul.mubr.f32.gmra.mrb[220].mxu1 %v7749_v11 }
 0xbd7   :  { %v7751_v12 = vpop.eup %7750 }
 0xbd8   :  { %v7753_v30 = vpop.eup %7752 }
 0xbd9   :  { %6806 = vmatprep.mubr.f32.mxu1 %v7753_v30 }
 0xbda   :  { %6807 = vmatmul.mubr.f32.gmra.mrb[222].mxu1 %v7751_v12 }
 0xc91   :  { %v6787_v3 = vpop.f32.mrb[208].mxu1 }
 0xc92   :  { %v4216_v62 = vadd.f32 %v9490_v23, %v6787_v3  ;;  %v4210_v7 = vpop.f32.mrb[209].mxu1 }
 0xc93   :  { %v4211_v14 = vadd.f32 %v9490_v23, %v4210_v7 }
 0xc94   :  { %v4290_v13 = vsub.f32 %v4216_v62, %v9497_v34  ;;  %v4529_v2 = vsel %vm131_vm3, %v4216_v62, %v4483_v8 }
 0xc95   :  { %v4289_v17 = vsub.f32 %v4211_v14, %v9497_v34  ;;  %v4528_v21 = vsel %vm131_vm3, %v4211_v14, %v4481_v19  ;;  %v6790_v22 = vpop.f32.mrb[210].mxu1  ;;  %v4545_v42 = vsel %vm148_vm4, %v4529_v2, 1.0 }
 0xc96   :  { %v4306_v27 = vmul.f32 %v4290_v13, %v4290_v13  ;;  %v4544_v29 = vsel %vm148_vm4, %v4528_v21, 1.0  ;;  %v4226_v33 = vadd.f32 %v9490_v23, %v6790_v22  ;;  %v4220_v35 = vpop.f32.mrb[211].mxu1  ;;  %v4501_v13 = vpop.permute.xlu0 %4500 }
 0xc97   :  { %v4305_v41 = vmul.f32 %v4289_v17, %v4289_v17  ;;  %v4221_v43 = vadd.f32 %v9490_v23, %v4220_v35  ;;  %6848 = vmatprep.mubr.msk.f32.mxu1 %vm165_vm5, %v4544_v29 }
 0xc98   :  { %v4292_v49 = vsub.f32 %v4226_v33, %v9497_v34  ;;  %v4531_v51 = vsel %vm131_vm3, %v4226_v33, %v4487_v18  ;;  %6849 = vmatmul.mubr.msk.f32.vlgmr.msra.gmra.mrb[224].mxu1 %vm165_vm5, %v4545_v42 }
 0xc99   :  { %v7422_v40 = vpack.c.bf16 %v4306_v27, %v4305_v41  ;;  %v4291_v32 = vsub.f32 %v4221_v43, %v9497_v34  ;;  %v4530_v25 = vsel %vm131_vm3, %v4221_v43, %v4485_v16  ;;  %v6793_v38 = vpop.f32.mrb[212].mxu1  ;;  %7462 = vmatpush3.bf16.msra.mxu1 %v7952_v20  ;;  %v4547_v50 = vsel %vm148_vm4, %v4531_v51, 1.0 }
 0xc9a   :  { %v4308_v47 = vmul.f32 %v4292_v49, %v4292_v49  ;;  %v4546_v39 = vsel %vm148_vm4, %v4530_v25, 1.0  ;;  %v4236_v44 = vadd.f32 %v9490_v23, %v6793_v38  ;;  %v4230_v46 = vpop.f32.mrb[213].mxu1  ;;  %7464 = vmatprep.subr.bf16.mxu1 %v7987_v36  ;;  %v4505_v25 = vpop.permute.xlu0 %4504 }
 0xc9b   :  { %v4307_v55 = vmul.f32 %v4291_v32, %v4291_v32  ;;  %v4231_v5 = vadd.f32 %v9490_v23, %v4230_v46  ;;  %7424 = vmatpush3.bf16.xpose.msk.msra.mxu0 %vm8203_vm6, %v7422_v40  ;;  %6851 = vmatprep.mubr.msk.f32.mxu1 %vm165_vm5, %v4546_v39 }
 0xc9c   :  { %v4294_v20 = vsub.f32 %v4236_v44, %v9497_v34  ;;  %v4533_v9 = vsel %vm131_vm3, %v4236_v44, %v4491_v15  ;;  %6852 = vmatmul.mubr.msk.f32.gmra.mrb[226].mxu1 %vm165_vm5, %v4547_v50  ;;  %7425 = vmatprep.subr.bf16.mxu0 %v7834_v24 }
 0xc9d   :  { %v7426_v56 = vpack.c.bf16 %v4308_v47, %v4307_v55  ;;  %v4293_v59 = vsub.f32 %v4231_v5, %v9497_v34  ;;  %v4532_v61 = vsel %vm131_vm3, %v4231_v5, %v4489_v60  ;;  %v6796_v0 = vpop.f32.mrb[214].mxu1  ;;  %7466 = vmatpush3.bf16.msra.mxu1 %v7987_v36  ;;  %v4549_v30 = vsel %vm148_vm4, %v4533_v9, 1.0 }
 0xc9e   :  { %v9529_v4 = vmul.f32 %v4294_v20, %v4294_v20  ;;  %v4548_v6 = vsel %vm148_vm4, %v4532_v61, 1.0  ;;  %v4246_v10 = vadd.f32 %v9490_v23, %v6796_v0  ;;  %v4240_v11 = vpop.f32.mrb[215].mxu1  ;;  %7468 = vmatprep.subr.bf16.mxu1 %v8005_v45 }
 0xc9f   :  { %v4309_v12 = vmul.f32 %v4293_v59, %v4293_v59  ;;  %v4241_v19 = vadd.f32 %v9490_v23, %v4240_v11  ;;  %6854 = vmatprep.mubr.msk.f32.mxu1 %vm165_vm5, %v4548_v6 }
 0xca0   :  { %v4296_v8 = vsub.f32 %v4246_v10, %v9497_v34  ;;  %v4535_v36 = vsel %vm131_vm3, %v4246_v10, %v4495_v48  ;;  %6855 = vmatmul.mubr.msk.f32.gmra.mrb[228].mxu1 %vm165_vm5, %v4549_v30 }
 0xca1   :  { %v7430_v16 = vpack.c.bf16 %v9529_v4, %v4309_v12  ;;  %v4295_v18 = vsub.f32 %v4241_v19, %v9497_v34  ;;  %v4534_v60 = vsel %vm131_vm3, %v4241_v19, %v4493_v37  ;;  %v6799_v3 = vpop.f32.mrb[216].mxu1  ;;  %7470 = vmatpush3.bf16.msra.mxu1 %v8005_v45  ;;  %v4551_v17 = vsel %vm148_vm4, %v4535_v36, 1.0  ;;  %v4503_v45 = vpop.permute.xlu1 %4502 }
 0xca2   :  { %v9544_v15 = vmul.f32 %v4296_v8, %v4296_v8  ;;  %v4550_v62 = vsel %vm148_vm4, %v4534_v60, 1.0  ;;  %v4256_v7 = vadd.f32 %v9490_v23, %v6799_v3  ;;  %v4250_v14 = vpop.f32.mrb[217].mxu1  ;;  %7472 = vmatprep.subr.bf16.mxu1 %v8023_v54  ;;  %v4509_v19 = vpop.permute.xlu0 %4508 }
 0xca3   :  { %v9549_v2 = vmul.f32 %v4295_v18, %v4295_v18  ;;  %v4251_v21 = vadd.f32 %v9490_v23, %v4250_v14  ;;  %7428 = vmatpush3.bf16.xpose.msk.msra.mxu0 %vm8203_vm6, %v7426_v56  ;;  %6857 = vmatprep.mubr.msk.f32.mxu1 %vm165_vm5, %v4550_v62 }
 0xca4   :  { %v4298_v22 = vsub.f32 %v4256_v7, %v9497_v34  ;;  %v4537_v27 = vsel %vm131_vm3, %v4256_v7, %v4499_v1  ;;  %6858 = vmatmul.mubr.msk.f32.gmra.mrb[230].mxu1 %vm165_vm5, %v4551_v17  ;;  %7429 = vmatprep.subr.bf16.mxu0 %v7834_v24 }
 0xca5   :  { %v7434_v29 = vpack.c.bf16 %v9544_v15, %v9549_v2  ;;  %v4297_v33 = vsub.f32 %v4251_v21, %v9497_v34  ;;  %v4536_v35 = vsel %vm131_vm3, %v4251_v21, %v4497_v57  ;;  %v6802_v37 = vpop.f32.mrb[218].mxu1  ;;  %7474 = vmatpush3.bf16.msra.mxu1 %v8023_v54  ;;  %v4553_v51 = vsel %vm148_vm4, %v4537_v27, 1.0  ;;  %v4507_v46 = vpop.permute.xlu1 %4506 }
 0xca6   :  { %v9565_v41 = vmul.f32 %v4298_v22, %v4298_v22  ;;  %v4552_v42 = vsel %vm148_vm4, %v4536_v35, 1.0  ;;  %v4266_v43 = vadd.f32 %v9490_v23, %v6802_v37  ;;  %v4260_v48 = vpop.f32.mrb[219].mxu1  ;;  %7476 = vmatprep.subr.bf16.mxu1 %v8041_v63 }
 0xca7   :  { %v9570_v49 = vmul.f32 %v4297_v33, %v4297_v33  ;;  %v4261_v40 = vadd.f32 %v9490_v23, %v4260_v48  ;;  %6860 = vmatprep.mubr.msk.f32.mxu1 %vm165_vm5, %v4552_v42 }
 0xca8   :  { %v4300_v32 = vsub.f32 %v4266_v43, %v9497_v34  ;;  %v4539_v54 = vsel %vm131_vm3, %v4266_v43, %v4503_v45  ;;  %6861 = vmatmul.mubr.msk.f32.gmra.mrb[232].mxu1 %vm165_vm5, %v4553_v51 }
 0xca9   :  { %v7438_v38 = vpack.c.bf16 %v9565_v41, %v9570_v49  ;;  %v4299_v47 = vsub.f32 %v4261_v40, %v9497_v34  ;;  %v4538_v39 = vsel %vm131_vm3, %v4261_v40, %v4501_v13  ;;  %v6805_v44 = vpop.f32.mrb[220].mxu1  ;;  %7478 = vmatpush3.bf16.msra.mxu1 %v8041_v63  ;;  %v4555_v57 = vsel %vm148_vm4, %v4539_v54, 1.0  ;;  %v4511_v6 = vpop.permute.xlu1 %4510 }
 0xcaa   :  { %v4316_v55 = vmul.f32 %v4300_v32, %v4300_v32  ;;  %v4554_v50 = vsel %vm148_vm4, %v4538_v39, 1.0  ;;  %v4276_v5 = vadd.f32 %v9490_v23, %v6805_v44  ;;  %v4270_v20 = vpop.f32.mrb[221].mxu1  ;;  %7480 = vmatprep.subr.bf16.mxu1 %v8081_v26 }
 0xcab   :  { %v4315_v9 = vmul.f32 %v4299_v47, %v4299_v47  ;;  %v4271_v56 = vadd.f32 %v9490_v23, %v4270_v20  ;;  %7432 = vmatpush3.bf16.xpose.msk.msra.mxu0 %vm8203_vm6, %v7430_v16  ;;  %6863 = vmatprep.mubr.msk.f32.mxu1 %vm165_vm5, %v4554_v50 }
 0xcac   :  { %v4302_v63 = vsub.f32 %v4276_v5, %v9497_v34  ;;  %v4541_v59 = vsel %vm131_vm3, %v4276_v5, %v4507_v46  ;;  %6864 = vmatmul.mubr.msk.f32.gmra.mrb[234].mxu1 %vm165_vm5, %v4555_v57  ;;  %7433 = vmatprep.subr.bf16.mxu0 %v7834_v24 }
 0xcad   :  { %v7442_v61 = vpack.c.bf16 %v4316_v55, %v4315_v9  ;;  %v4301_v0 = vsub.f32 %v4271_v56, %v9497_v34  ;;  %v4540_v1 = vsel %vm131_vm3, %v4271_v56, %v4505_v25  ;;  %v6808_v4 = vpop.f32.mrb[222].mxu1  ;;  %7482 = vmatpush3.bf16.msra.mxu1 %v8081_v26  ;;  %v4557_v36 = vsel %vm148_vm4, %v4541_v59, 1.0 }
 0xcae   :  { %v4318_v10 = vmul.f32 %v4302_v63, %v4302_v63  ;;  %v4556_v11 = vsel %vm148_vm4, %v4540_v1, 1.0  ;;  %v4286_v12 = vadd.f32 %v9490_v23, %v6808_v4  ;;  %v4280_v30 = vpop.f32.mrb[223].mxu1  ;;  %7484 = vmatprep.subr.bf16.mxu1 %v8091_v28 }
 0xcaf   :  { %v4317_v8 = vmul.f32 %v4301_v0, %v4301_v0  ;;  %v4281_v16 = vadd.f32 %v9490_v23, %v4280_v30  ;;  %6866 = vmatprep.mubr.msk.f32.mxu1 %vm165_vm5, %v4556_v11 }
 0xcb0   :  { %v4304_v18 = vsub.f32 %v4286_v12, %v9497_v34  ;;  %6867 = vmatmul.mubr.msk.f32.gmra.mrb[236].mxu1 %vm165_vm5, %v4557_v36  ;;  %v4543_v26 = vsel %vm131_vm3, %v4286_v12, %v4511_v6 }
 0xcb1   :  { %v7446_v60 = vpack.c.bf16 %v4318_v10, %v4317_v8  ;;  %v4303_v3 = vsub.f32 %v4281_v16, %v9497_v34  ;;  %v4542_v62 = vsel %vm131_vm3, %v4281_v16, %v4509_v19  ;;  %v4559_v7 = vsel %vm148_vm4, %v4543_v26, 1.0  ;;  %7486 = vmatpush3.bf16.msra.mxu1 %v8091_v28  ;;  %v685_v28 = vpop.f32.mrb[0].mxu0 }
 0xcb2   :  { %v4320_v14 = vmul.f32 %v4304_v18, %v4304_v18  ;;  %v4558_v13 = vsel %vm148_vm4, %v4542_v62, 1.0  ;;  %7488 = vmatprep.subr.bf16.mxu1 %v8101_v31  ;;  %7754 = vrsqrt.f32 %v685_v28  ;;  %vm691_vm8 = vcmp.eq.f32.partialorder %v685_v28, inf }
 0xcb3   :  { %v4319_v17 = vmul.f32 %v4303_v3, %v4303_v3  ;;  %7436 = vmatpush3.bf16.xpose.msk.msra.mxu0 %vm8203_vm6, %v7434_v29  ;;  %6869 = vmatprep.mubr.msk.f32.mxu1 %vm165_vm5, %v4558_v13  ;;  %vm693_vm10 = vcmp.eq.f32.partialorder %v685_v28, 0.0  ;;  %v694_v51 = vand.u32 2147483648, %v685_v28 }
 0xcb4   :  { %6870 = vmatmul.mubr.msk.f32.gmra.mrb[238].mxu1 %vm165_vm5, %v4559_v7  ;;  %7437 = vmatprep.subr.bf16.mxu0 %v7834_v24 }
 0xcb5   :  { %v7450_v21 = vpack.c.bf16 %v4320_v14, %v4319_v17  ;;  %7490 = vmatpush3.bf16.msra.mxu1 %v8101_v31  ;;  %v6129_v31 = vpop.f32.mrb[1].mxu0 }
 0xcb6   :  { %v1310_v15 = vpop.f32.mrb[2].mxu0 }
 0xcb7   :  { %7756 = vrsqrt.f32 %v1310_v15  ;;  %v6248_v2 = vpop.f32.mrb[3].mxu0  ;;  %vm1316_vm9 = vcmp.eq.f32.partialorder %v1310_v15, inf  ;;  %v1319_v40 = vand.u32 2147483648, %v1310_v15  ;;  %vm1318_vm11 = vcmp.eq.f32.partialorder %v1310_v15, 0.0 }
 0xcb8   :  { %v1935_v45 = vpop.f32.mrb[4].mxu0 }
 0xcb9   :  { %7758 = vrsqrt.f32 %v1935_v45  ;;  %v6367_v22 = vpop.f32.mrb[5].mxu0  ;;  %vm1941_vm12 = vcmp.eq.f32.partialorder %v1935_v45, inf  ;;  %v1944_v55 = vand.u32 2147483648, %v1935_v45  ;;  %vm1943_vm14 = vcmp.eq.f32.partialorder %v1935_v45, 0.0 }
 0xcba   :  { %v2560_v27 = vpop.f32.mrb[6].mxu0 }
 0xcbb   :  { %7440 = vmatpush3.bf16.xpose.msk.msra.mxu0 %vm8203_vm6, %v7438_v38  ;;  %7760 = vrsqrt.f32 %v2560_v27  ;;  %v6486_v29 = vpop.f32.mrb[7].mxu0  ;;  %vm2566_vm13 = vcmp.eq.f32.partialorder %v2560_v27, inf  ;;  %v2569_v9 = vand.u32 2147483648, %v2560_v27  ;;  %vm2568_vm0 = vcmp.eq.f32.partialorder %v2560_v27, 0.0 }
 0xcbc   :  { %7441 = vmatprep.subr.bf16.mxu0 %v7834_v24  ;;  %v3185_v33 = vpop.f32.mrb[8].mxu0  ;;  %v7755_v41 = vpop.eup %7754 }
 0xcbd   :  { %7762 = vrsqrt.f32 %v3185_v33  ;;  %v6605_v35 = vpop.f32.mrb[9].mxu0  ;;  %v690_v43 = vmul.f32 %v7755_v41, %v685_v28  ;;  %vm3191_vm15 = vcmp.eq.f32.partialorder %v3185_v33, inf  ;;  %v3194_v63 = vand.u32 2147483648, %v3185_v33 }
 0xcbe   :  { %v3810_v37 = vpop.f32.mrb[10].mxu0  ;;  %vm3193_vm1 = vcmp.eq.f32.partialorder %v3185_v33, 0.0 }
 0xcbf   :  { %v6724_v42 = vpop.f32.mrb[11].mxu0  ;;  %7764 = vrsqrt.f32 %v3810_v37  ;;  %v692_v54 = vsel %vm691_vm8, %v685_v28, %v690_v43  ;;  %vm3816_vm2 = vcmp.eq.f32.partialorder %v3810_v37, inf  ;;  %v3819_v4 = vand.u32 2147483648, %v3810_v37 }
 0xcc0   :  { %v695_v44 = vsel %vm693_vm10, %v694_v51, %v692_v54  ;;  %vm3818_vm4 = vcmp.eq.f32.partialorder %v3810_v37, 0.0 }
 0xcc3   :  { %7444 = vmatpush3.bf16.xpose.msk.msra.mxu0 %vm8203_vm6, %v7442_v61 }
 0xcc4   :  { %7445 = vmatprep.subr.bf16.mxu0 %v7834_v24 }
 0xccb   :  { %7448 = vmatpush3.bf16.xpose.msk.msra.mxu0 %vm8203_vm6, %v7446_v60 }
 0xccc   :  { %7449 = vmatprep.subr.bf16.mxu0 %v7834_v24 }
 0xcd3   :  { %7452 = vmatpush3.bf16.xpose.msk.msra.mxu0 %vm8203_vm6, %v7450_v21 }
 0xcd4   :  { %7491 = vmatprep.subr.bf16.mxu0 %v7834_v24 }
 0xcda   :  { %6842 = vmatmul.mubr.msk.f32.vlgmr.msra.gmra.mrb[12].mxu0 %vm131_vm3, %v7837_v53 }
 0xcdb   :  { %6960 = vmatprep.mubr.msk.f32.mxu0 %vm7835_vm7, %v7836_v52  ;;  %v7757_v52 = vpop.eup %7756 }
 0xcdc   :  { %v1315_v48 = vmul.f32 %v7757_v52, %v1310_v15  ;;  %v7759_v49 = vpop.eup %7758 }
 0xcdd   :  { %v7761_v32 = vpop.eup %7760  ;;  %v1940_v38 = vmul.f32 %v7759_v49, %v1935_v45 }
 0xcde   :  { %v1317_v25 = vsel %vm1316_vm9, %v1310_v15, %v1315_v48  ;;  %v7763_v47 = vpop.eup %7762  ;;  %v2565_v39 = vmul.f32 %v7761_v32, %v2560_v27 }
 0xcdf   :  { %v1320_v46 = vsel %vm1318_vm11, %v1319_v40, %v1317_v25  ;;  %v1942_v50 = vsel %vm1941_vm12, %v1935_v45, %v1940_v38  ;;  %v3190_v5 = vmul.f32 %v7763_v47, %v3185_v33  ;;  %v7765_v20 = vpop.eup %7764 }
 0xce0   :  { %v2567_v57 = vsel %vm2566_vm13, %v2560_v27, %v2565_v39  ;;  %v1321_v56 = vadd.f32 %v1320_v46, %v695_v44  ;;  %v1945_v59 = vsel %vm1943_vm14, %v1944_v55, %v1942_v50  ;;  %v3815_v0 = vmul.f32 %v7765_v20, %v3810_v37 }
 0xce1   :  { %v3192_v61 = vsel %vm3191_vm15, %v3185_v33, %v3190_v5  ;;  %v2570_v6 = vsel %vm2568_vm0, %v2569_v9, %v2567_v57 }
 0xce2   :  { %v1946_v1 = vadd.f32 %v1945_v59, %v1321_v56  ;;  %v3195_v11 = vsel %vm3193_vm1, %v3194_v63, %v3192_v61  ;;  %v3817_v30 = vsel %vm3816_vm2, %v3810_v37, %v3815_v0 }
 0xce3   :  { %v3820_v19 = vsel %vm3818_vm4, %v3819_v4, %v3817_v30 }
 0xce4   :  { %v2571_v10 = vadd.f32 %v2570_v6, %v1946_v1 }
 0xce6   :  { %v3196_v12 = vadd.f32 %v3195_v11, %v2571_v10 }
 0xce8   :  { %v9638_v8 = vadd.f32 %v3820_v19, %v3196_v12 }
 0xd6b   :  { %v6850_v36 = vpop.f32.mrb[224].mxu1 }
 0xd6c   :  { %v4674_v16 = vpop.f32.mrb[225].mxu1 }
 0xd6d   :  { %7766 = vtanh.f32 %v4674_v16 }
 0xd6e   :  { %7768 = vtanh.f32 %v6850_v36 }
 0xd6f   :  { %v6853_v18 = vpop.f32.mrb[226].mxu1 }
 0xd70   :  { %v4684_v26 = vpop.f32.mrb[227].mxu1 }
 0xd71   :  { %7770 = vtanh.f32 %v4684_v26 }
 0xd72   :  { %7772 = vtanh.f32 %v6853_v18 }
 0xd73   :  { %v6856_v60 = vpop.f32.mrb[228].mxu1 }
 0xd74   :  { %v4694_v3 = vpop.f32.mrb[229].mxu1 }
 0xd75   :  { %7774 = vtanh.f32 %v4694_v3 }
 0xd76   :  { %7776 = vtanh.f32 %v6856_v60 }
 0xd77   :  { %v7767_v62 = vpop.eup %7766  ;;  %v6859_v7 = vpop.f32.mrb[230].mxu1 }
 0xd78   :  { %v7769_v14 = vpop.eup %7768  ;;  %v4704_v13 = vpop.f32.mrb[231].mxu1  ;;  %6904 = vmatprep.mubr.f32.mxu1 %v7767_v62 }
 0xd79   :  { %7778 = vtanh.f32 %v4704_v13  ;;  %6905 = vmatmul.mubr.f32.vlgmr.msra.gmra.mrb[240].mxu1 %v7769_v14 }
 0xd7a   :  { %7780 = vtanh.f32 %v6859_v7 }
 0xd7b   :  { %v7771_v17 = vpop.eup %7770  ;;  %v6862_v21 = vpop.f32.mrb[232].mxu1 }
 0xd7c   :  { %v7773_v28 = vpop.eup %7772  ;;  %v4714_v31 = vpop.f32.mrb[233].mxu1  ;;  %6907 = vmatprep.mubr.f32.mxu1 %v7771_v17 }
 0xd7d   :  { %7782 = vtanh.f32 %v4714_v31  ;;  %6908 = vmatmul.mubr.f32.gmra.mrb[242].mxu1 %v7773_v28 }
 0xd7e   :  { %7784 = vtanh.f32 %v6862_v21 }
 0xd7f   :  { %v7775_v15 = vpop.eup %7774  ;;  %v6865_v2 = vpop.f32.mrb[234].mxu1 }
 0xd80   :  { %v7777_v45 = vpop.eup %7776  ;;  %v4724_v22 = vpop.f32.mrb[235].mxu1  ;;  %6910 = vmatprep.mubr.f32.mxu1 %v7775_v15 }
 0xd81   :  { %7786 = vtanh.f32 %v4724_v22  ;;  %6911 = vmatmul.mubr.f32.gmra.mrb[244].mxu1 %v7777_v45 }
 0xd82   :  { %7788 = vtanh.f32 %v6865_v2 }
 0xd83   :  { %v7779_v27 = vpop.eup %7778  ;;  %v6868_v29 = vpop.f32.mrb[236].mxu1 }
 0xd84   :  { %v7781_v33 = vpop.eup %7780  ;;  %v4734_v35 = vpop.f32.mrb[237].mxu1  ;;  %6913 = vmatprep.mubr.f32.mxu1 %v7779_v27 }
 0xd85   :  { %7790 = vtanh.f32 %v4734_v35  ;;  %6914 = vmatmul.mubr.f32.gmra.mrb[246].mxu1 %v7781_v33 }
 0xd86   :  { %7792 = vtanh.f32 %v6868_v29 }
 0xd87   :  { %v7783_v37 = vpop.eup %7782  ;;  %v6871_v41 = vpop.f32.mrb[238].mxu1 }
 0xd88   :  { %v7785_v42 = vpop.eup %7784  ;;  %v4744_v52 = vpop.f32.mrb[239].mxu1  ;;  %6916 = vmatprep.mubr.f32.mxu1 %v7783_v37 }
 0xd89   :  { %7794 = vtanh.f32 %v4744_v52  ;;  %6917 = vmatmul.mubr.f32.gmra.mrb[248].mxu1 %v7785_v42 }
 0xd8a   :  { %7796 = vtanh.f32 %v6871_v41 }
 0xd8b   :  { %v7787_v43 = vpop.eup %7786 }
 0xd8c   :  { %v7789_v48 = vpop.eup %7788  ;;  %6919 = vmatprep.mubr.f32.mxu1 %v7787_v43 }
 0xd8d   :  { %6920 = vmatmul.mubr.f32.gmra.mrb[250].mxu1 %v7789_v48 }
 0xd8f   :  { %v7791_v49 = vpop.eup %7790 }
 0xd90   :  { %v7793_v51 = vpop.eup %7792  ;;  %6922 = vmatprep.mubr.f32.mxu1 %v7791_v49 }
 0xd91   :  { %6923 = vmatmul.mubr.f32.gmra.mrb[252].mxu1 %v7793_v51 }
 0xd93   :  { %v7795_v40 = vpop.eup %7794 }
 0xd94   :  { %v7797_v32 = vpop.eup %7796  ;;  %6925 = vmatprep.mubr.f32.mxu1 %v7795_v40 }
 0xd95   :  { %6926 = vmatmul.mubr.f32.gmra.mrb[254].mxu1 %v7797_v32 }
 0xdad   :  { %v4435_v54 = vpop.f32.mrb[12].mxu0 }
 0xdae   :  { %7798 = vrsqrt.f32 %v4435_v54  ;;  %v6843_v25 = vpop.f32.mrb[13].mxu0  ;;  %vm4441_vm5 = vcmp.eq.f32.partialorder %v4435_v54, inf  ;;  %v4444_v47 = vand.u32 2147483648, %v4435_v54  ;;  %vm4443_vm7 = vcmp.eq.f32.partialorder %v4435_v54, 0.0 }
 0xdb8   :  { %v7799_v38 = vpop.eup %7798 }
 0xdb9   :  { %v4440_v39 = vmul.f32 %v7799_v38, %v4435_v54 }
 0xdbb   :  { %v4442_v44 = vsel %vm4441_vm5, %v4435_v54, %v4440_v39 }
 0xdbc   :  { %v4445_v46 = vsel %vm4443_vm7, %v4444_v47, %v4442_v44 }
 0xdbd   :  { %v9641_v55 = vadd.f32 %v4445_v46, %v9638_v8 }
 0xe4c   :  { %v6906_v50 = vpop.f32.mrb[240].mxu1 }
 0xe4d   :  { %v4841_v5 = vadd.f32 %v9490_v23, %v6906_v50  ;;  %v4835_v20 = vpop.f32.mrb[241].mxu1 }
 0xe4e   :  { %v4836_v9 = vadd.f32 %v9490_v23, %v4835_v20 }
 0xe4f   :  { %v4915_v57 = vsub.f32 %v4841_v5, %v9497_v34 }
 0xe50   :  { %v4914_v56 = vsub.f32 %v4836_v9, %v9497_v34  ;;  %v6909_v63 = vpop.f32.mrb[242].mxu1 }
 0xe51   :  { %v4931_v59 = vmul.f32 %v4915_v57, %v4915_v57  ;;  %v4851_v61 = vadd.f32 %v9490_v23, %v6909_v63  ;;  %v4845_v0 = vpop.f32.mrb[243].mxu1 }
 0xe52   :  { %v4930_v1 = vmul.f32 %v4914_v56, %v4914_v56  ;;  %v4846_v4 = vadd.f32 %v9490_v23, %v4845_v0 }
 0xe53   :  { %v4917_v6 = vsub.f32 %v4851_v61, %v9497_v34 }
 0xe54   :  { %v7492_v10 = vpack.c.bf16 %v4931_v59, %v4930_v1  ;;  %v4916_v11 = vsub.f32 %v4846_v4, %v9497_v34  ;;  %v6912_v12 = vpop.f32.mrb[244].mxu1 }
 0xe55   :  { %v4933_v30 = vmul.f32 %v4917_v6, %v4917_v6  ;;  %v4861_v19 = vadd.f32 %v9490_v23, %v6912_v12  ;;  %v4855_v8 = vpop.f32.mrb[245].mxu1 }
 0xe56   :  { %v4932_v36 = vmul.f32 %v4916_v11, %v4916_v11  ;;  %v4856_v16 = vadd.f32 %v9490_v23, %v4855_v8  ;;  %7494 = vmatpush3.bf16.xpose.msk.msra.mxu0 %vm8203_vm6, %v7492_v10 }
 0xe57   :  { %v4919_v18 = vsub.f32 %v4861_v19, %v9497_v34  ;;  %7495 = vmatprep.subr.bf16.mxu0 %v7834_v24 }
 0xe58   :  { %v7496_v26 = vpack.c.bf16 %v4933_v30, %v4932_v36  ;;  %v4918_v60 = vsub.f32 %v4856_v16, %v9497_v34  ;;  %v6915_v3 = vpop.f32.mrb[246].mxu1 }
 0xe59   :  { %v4935_v62 = vmul.f32 %v4919_v18, %v4919_v18  ;;  %v4871_v7 = vadd.f32 %v9490_v23, %v6915_v3  ;;  %v4865_v14 = vpop.f32.mrb[247].mxu1 }
 0xe5a   :  { %v4934_v13 = vmul.f32 %v4918_v60, %v4918_v60  ;;  %v4866_v17 = vadd.f32 %v9490_v23, %v4865_v14 }
 0xe5b   :  { %v4921_v21 = vsub.f32 %v4871_v7, %v9497_v34 }
 0xe5c   :  { %v7500_v28 = vpack.c.bf16 %v4935_v62, %v4934_v13  ;;  %v4920_v31 = vsub.f32 %v4866_v17, %v9497_v34  ;;  %v6918_v15 = vpop.f32.mrb[248].mxu1 }
 0xe5d   :  { %v4937_v2 = vmul.f32 %v4921_v21, %v4921_v21  ;;  %v4881_v45 = vadd.f32 %v9490_v23, %v6918_v15  ;;  %v4875_v22 = vpop.f32.mrb[249].mxu1 }
 0xe5e   :  { %v4936_v27 = vmul.f32 %v4920_v31, %v4920_v31  ;;  %v4876_v29 = vadd.f32 %v9490_v23, %v4875_v22  ;;  %7498 = vmatpush3.bf16.xpose.msk.msra.mxu0 %vm8203_vm6, %v7496_v26 }
 0xe5f   :  { %v4923_v33 = vsub.f32 %v4881_v45, %v9497_v34  ;;  %7499 = vmatprep.subr.bf16.mxu0 %v7834_v24 }
 0xe60   :  { %v7504_v35 = vpack.c.bf16 %v4937_v2, %v4936_v27  ;;  %v4922_v37 = vsub.f32 %v4876_v29, %v9497_v34  ;;  %v6921_v41 = vpop.f32.mrb[250].mxu1 }
 0xe61   :  { %v4939_v42 = vmul.f32 %v4923_v33, %v4923_v33  ;;  %v4891_v52 = vadd.f32 %v9490_v23, %v6921_v41  ;;  %v4885_v43 = vpop.f32.mrb[251].mxu1 }
 0xe62   :  { %v4938_v48 = vmul.f32 %v4922_v37, %v4922_v37  ;;  %v4886_v49 = vadd.f32 %v9490_v23, %v4885_v43 }
 0xe63   :  { %v4925_v51 = vsub.f32 %v4891_v52, %v9497_v34 }
 0xe64   :  { %v7508_v40 = vpack.c.bf16 %v4939_v42, %v4938_v48  ;;  %v4924_v32 = vsub.f32 %v4886_v49, %v9497_v34  ;;  %v6924_v54 = vpop.f32.mrb[252].mxu1 }
 0xe65   :  { %v4941_v25 = vmul.f32 %v4925_v51, %v4925_v51  ;;  %v4901_v38 = vadd.f32 %v9490_v23, %v6924_v54  ;;  %v4895_v47 = vpop.f32.mrb[253].mxu1 }
 0xe66   :  { %v4940_v39 = vmul.f32 %v4924_v32, %v4924_v32  ;;  %v4896_v44 = vadd.f32 %v9490_v23, %v4895_v47  ;;  %7502 = vmatpush3.bf16.xpose.msk.msra.mxu0 %vm8203_vm6, %v7500_v28 }
 0xe67   :  { %v4927_v46 = vsub.f32 %v4901_v38, %v9497_v34  ;;  %7503 = vmatprep.subr.bf16.mxu0 %v7834_v24 }
 0xe68   :  { %v7512_v50 = vpack.c.bf16 %v4941_v25, %v4940_v39  ;;  %v4926_v5 = vsub.f32 %v4896_v44, %v9497_v34  ;;  %v6927_v20 = vpop.f32.mrb[254].mxu1 }
 0xe69   :  { %v4943_v9 = vmul.f32 %v4927_v46, %v4927_v46  ;;  %v4911_v57 = vadd.f32 %v9490_v23, %v6927_v20  ;;  %v4905_v56 = vpop.f32.mrb[255].mxu1 }
 0xe6a   :  { %v4942_v63 = vmul.f32 %v4926_v5, %v4926_v5  ;;  %v4906_v59 = vadd.f32 %v9490_v23, %v4905_v56 }
 0xe6b   :  { %v4929_v61 = vsub.f32 %v4911_v57, %v9497_v34 }
 0xe6c   :  { %v7516_v0 = vpack.c.bf16 %v4943_v9, %v4942_v63  ;;  %v4928_v1 = vsub.f32 %v4906_v59, %v9497_v34 }
 0xe6d   :  { %v4945_v4 = vmul.f32 %v4929_v61, %v4929_v61 }
 0xe6e   :  { %v4944_v6 = vmul.f32 %v4928_v1, %v4928_v1  ;;  %7506 = vmatpush3.bf16.xpose.msk.msra.mxu0 %vm8203_vm6, %v7504_v35 }
 0xe6f   :  { %7507 = vmatprep.subr.bf16.mxu0 %v7834_v24 }
 0xe70   :  { %v7520_v10 = vpack.c.bf16 %v4945_v4, %v4944_v6 }
 0xe76   :  { %7510 = vmatpush3.bf16.xpose.msk.msra.mxu0 %vm8203_vm6, %v7508_v40 }
 0xe77   :  { %7511 = vmatprep.subr.bf16.mxu0 %v7834_v24 }
 0xe7e   :  { %7514 = vmatpush3.bf16.xpose.msk.msra.mxu0 %vm8203_vm6, %v7512_v50 }
 0xe7f   :  { %7515 = vmatprep.subr.bf16.mxu0 %v7834_v24 }
 0xe86   :  { %7518 = vmatpush3.bf16.xpose.msk.msra.mxu0 %vm8203_vm6, %v7516_v0 }
 0xe87   :  { %7519 = vmatprep.subr.bf16.mxu0 %v7834_v24 }
 0xe8e   :  { %7522 = vmatpush3.bf16.xpose.msk.msra.mxu0 %vm8203_vm6, %v7520_v10 }
 0xe95   :  { %6961 = vmatmul.mubr.msk.f32.vlgmr.msra.gmra.mrb[14].mxu0 %vm131_vm3, %v7837_v53 }
 0xf68   :  { %v5060_v23 = vpop.f32.mrb[14].mxu0 }
 0xf69   :  { %7800 = vrsqrt.f32 %v5060_v23  ;;  %v6962_v34 = vpop.f32.mrb[15].mxu0  ;;  %vm5066_vm8 = vcmp.eq.f32.partialorder %v5060_v23, inf  ;;  %v5069_v30 = vand.u32 2147483648, %v5060_v23  ;;  %vm5068_vm9 = vcmp.eq.f32.partialorder %v5060_v23, 0.0 }
 0xf73   :  { %v7801_v11 = vpop.eup %7800 }
 0xf74   :  { %v5065_v12 = vmul.f32 %v7801_v11, %v5060_v23 }
 0xf76   :  { %v5067_v19 = vsel %vm5066_vm8, %v5060_v23, %v5065_v12 }
 0xf77   :  { %v5070_v8 = vsel %vm5068_vm9, %v5069_v30, %v5067_v19 }
 0xf78   :  { %v5071_v24 = vadd.f32 %v5070_v8, %v9641_v55 }
 0xf7a   :  { %v5072_v36 = vmul.f32 0.125, %v5071_v24 }
 0xf7c   :  { %5073 = vst [vmem:[#allocation2] sm:$0x1] %v5072_v36 }
 0xf7d   :  { %7819 = shalt.err (!%p7816_p4)
}
 0xf7e   :  { %s7820_s24 = scalar_lea.hbm %s9719_s6, 16 }
 0xf7f   :  { %p7821_p5 = scmp.ne.s32.totalorder %s9719_s6, %s7820_s24  ;;  %p7824_p6 = scmp.lt.u32.totalorder %s7820_s24, %s9719_s6 }
 0xf81   :  { %p7826_p7 = pnand %p7824_p6, %p7821_p5 }
 0xf83   :  { %7829 = shalt.err (!%p7826_p7)
}
 0xf84   :  { %5083 = dma.vmem_to_hbm [thread:$0]  %s5081_s5, 16, %s9719_s6, [#allocation3]  }
 0xf85   :  { %7830 = dma.done.wait [#allocation3], 16  }
 0xf86   :  { %7831 = vsyncadd [#allocation3], 4294967280 }
 0xf87   :  { %5087 = vsyncpa [#allocation3], 1 }

</bundles_post_ra>
